<compile_context>
chip_gen: v6e
topology: v6e:2x2x1
jax: 0.10.0
libtpu: 0.0.40
codegen_flags: <defaults>
</compile_context>

<pallas_src>
import functools
import numpy as np

import jax
import jax.numpy as jnp
from jax.experimental import pallas as pl
from jax.experimental.pallas import tpu as pltpu

_TN = 1024   # nets per grid step (lane-aligned, deep MXU contraction)


def _round_up(x, m):
    return ((x + m - 1) // m) * m


def _chip_params():
    """Per-chip VMEM budget / megacore policy."""
    try:
        vmem = int(pltpu.get_tpu_info().vmem_capacity_bytes)
    except Exception:  # conservative fallback if the query is unavailable
        vmem = 64 * 1024 * 1024
    if vmem <= 64 * 1024 * 1024:
        # v7x-like: 64 MiB/TC but 2 TensorCores -> keep >=2 bin-x tiles so the
        # "parallel" axis actually shards across cores; modest scoped-VMEM limit.
        return {"vmem_limit": 44 * 1024 * 1024, "min_bx_tiles": 2}
    # v5e / v6e: single TensorCore, 128 MiB VMEM -> cover all of num_bins_x in one
    # resident tile whenever it fits (no redundant OY recompute / net restream).
    return {"vmem_limit": 96 * 1024 * 1024, "min_bx_tiles": 1}


def _pick_tbx(num_bins_x, nby_pad, tn, vmem_limit, min_bx_tiles):
    """Pick the bin-x tile (multiple of 8) from the per-chip VMEM budget."""
    nbx8 = _round_up(num_bins_x, 8)
    # tbx-independent residents (f32 bytes): oy + its bf16 hi/lo temps,
    # both net-data double-buffers (y stream is lane-padded), plus slack.
    fixed = (2 * tn * nby_pad + 2 * 8 * tn + 2 * tn * 128) * 4 + (6 << 20)
    # per bin-x row: out double-buffer + ox (f32) + ox bf16 hi/lo temps.
    per_row = (2 * nby_pad + 2 * tn) * 4
    avail = vmem_limit - fixed
    tbx_cap = (avail // per_row) // 8 * 8 if avail > per_row * 8 else 8
    tbx = max(8, min(nbx8, tbx_cap))
    if min_bx_tiles > 1:
        split = _round_up(-(-nbx8 // min_bx_tiles), 8)
        tbx = max(8, min(tbx, split))
    nbx_pad = _round_up(num_bins_x, tbx)
    return tbx, nbx_pad


def _rudy_kernel(xd_ref, yd_ref, out_ref, *, xl, yl, bsx, bsy):
    # xd_ref:  (8, TN)  rows [x_min, x_max, scale, 0...]  (nets on lanes)
    # yd_ref:  (TN, 8)  cols [y_min, y_max, scale, 0...]  (nets on sublanes)
    # out_ref: (TBX, NBYp) f32 accumulator tile (resident across the net axis)
    n = pl.program_id(1)
    tbx, nby = out_ref.shape
    tn = xd_ref.shape[1]

    xd = xd_ref[...]                  # (8, TN)
    x_min = xd[0:1, :]                # (1, TN)
    x_max = xd[1:2, :]                # (1, TN)
    y_min = yd_ref[:, 0:1]            # (TN, 1)
    y_max = yd_ref[:, 1:2]            # (TN, 1)

    # bin-x edges for this output row tile: (TBX, 1)
    x0 = xl + (pl.program_id(0) * tbx).astype(jnp.float32) * bsx
    ix = jax.lax.broadcasted_iota(jnp.int32, (tbx, 1), 0).astype(jnp.float32)
    bin_xl = x0 + ix * bsx
    bin_xh = bin_xl + bsx
    # x-overlap of each bin row with each net bbox -> (TBX, TN)
    ox = jnp.maximum(jnp.minimum(x_max, bin_xh) - jnp.maximum(x_min, bin_xl), 0.0)

    # bin-y edges: (1, NBYp)
    iy = jax.lax.broadcasted_iota(jnp.int32, (1, nby), 1).astype(jnp.float32)
    bin_yl = yl + iy * bsy
    bin_yh = bin_yl + bsy
    # y-overlap -> (TN, NBYp)
    oy = jnp.maximum(jnp.minimum(y_max, bin_yh) - jnp.maximum(y_min, bin_yl), 0.0)

    # per-net scale (wt / ((dx+eps)(dy+eps)*bin_area)) on the smaller operand
    if tbx <= nby:
        ox = ox * xd[2:3, :]
    else:
        oy = oy * yd_ref[:, 2:3]

    # Manual bf16x3 matmul (== Precision.HIGH): 3 native bf16 MXU passes with
    # f32 accumulation -> ~f32 accuracy at half the cost of Precision.HIGHEST.
    ox_hi = ox.astype(jnp.bfloat16)
    ox_lo = (ox - ox_hi.astype(jnp.float32)).astype(jnp.bfloat16)
    oy_hi = oy.astype(jnp.bfloat16)
    oy_lo = (oy - oy_hi.astype(jnp.float32)).astype(jnp.bfloat16)
    contrib = jnp.dot(ox_hi, oy_hi, preferred_element_type=jnp.float32)
    contrib += jnp.dot(ox_hi, oy_lo, preferred_element_type=jnp.float32)
    contrib += jnp.dot(ox_lo, oy_hi, preferred_element_type=jnp.float32)

    @pl.when(n == 0)
    def _():
        out_ref[...] = contrib        # first net chunk: direct write (no zero-init RMW)

    @pl.when(n != 0)
    def _():
        out_ref[...] += contrib


def _rudy_pallas(xdat, ydat, *, num_bins_x, num_bins_y, xl, yl,
                 bin_size_x, bin_size_y):
    n_pad = xdat.shape[1]

    # lane-dense output: pad num_bins_y to a multiple of 128 (unmasked vst)
    nby_pad = _round_up(num_bins_y, 128)

    cfg = _chip_params()
    tbx, nbx_pad = _pick_tbx(num_bins_x, nby_pad, _TN,
                             cfg["vmem_limit"], cfg["min_bx_tiles"])
    grid = (nbx_pad // tbx, n_pad // _TN)

    kernel = functools.partial(
        _rudy_kernel, xl=float(xl), yl=float(yl),
        bsx=float(bin_size_x), bsy=float(bin_size_y))

    out = pl.pallas_call(
        kernel,
        out_shape=jax.ShapeDtypeStruct((nbx_pad, nby_pad), jnp.float32),
        grid_spec=pltpu.PrefetchScalarGridSpec(
            num_scalar_prefetch=0,
            grid=grid,
            in_specs=[
                pl.BlockSpec((8, _TN), lambda bx, n: (0, n)),    # x-side net data
                pl.BlockSpec((_TN, 8), lambda bx, n: (n, 0)),    # y-side (pre-transposed)
            ],
            out_specs=pl.BlockSpec((tbx, nby_pad), lambda bx, n: (bx, 0)),
        ),
        compiler_params=pltpu.CompilerParams(
            dimension_semantics=("parallel", "arbitrary"),
            vmem_limit_bytes=cfg["vmem_limit"]),
    )(xdat, ydat)

    return out[:num_bins_x, :num_bins_y]


class Rudy:
    """JAX/Pallas port of DREAMPlacePCB ops/rudy/rudy.py::Rudy."""

    def __init__(self, netpin_start, flat_netpin, net_weights, xl, xh, yl, yh,
                 num_bins_x, num_bins_y, deterministic_flag,
                 initial_utilization_map=None):
        netpin_start = np.asarray(netpin_start, dtype=np.int64)
        self.num_nets = int(netpin_start.shape[0] - 1)
        counts = (netpin_start[1:] - netpin_start[:-1]).astype(np.int64)
        # per-pin-slot net id (static CSR structure); sorted by construction
        self.seg_ids = jnp.asarray(
            np.repeat(np.arange(self.num_nets, dtype=np.int32), counts))
        self.has_pins = jnp.asarray(counts > 0)
        self.flat_netpin = jnp.asarray(np.asarray(flat_netpin, dtype=np.int32))
        self.net_weights = jnp.asarray(net_weights, dtype=jnp.float32)
        self.xl, self.xh = float(xl), float(xh)
        self.yl, self.yh = float(yl), float(yh)
        self.num_bins_x, self.num_bins_y = int(num_bins_x), int(num_bins_y)
        self.bin_size_x = (self.xh - self.xl) / self.num_bins_x
        self.bin_size_y = (self.yh - self.yl) / self.num_bins_y
        # deterministic_flag controls atomic ordering in the C++/CUDA impl; the
        # matmul-reduction formulation here is deterministic by construction.
        self.deterministic_flag = deterministic_flag
        self.initial_utilization_map = initial_utilization_map

    def __call__(self, pin_pos):
        dtype = pin_pos.dtype
        num_pins = pin_pos.shape[0] // 2
        pin_x = pin_pos[:num_pins]
        pin_y = pin_pos[num_pins:]

        # gather pin coords per (net, pin) slot, reduce per-net bounding boxes (glue)
        px = pin_x[self.flat_netpin]
        py = pin_y[self.flat_netpin]
        x_max = jax.ops.segment_max(px, self.seg_ids, num_segments=self.num_nets,
                                    indices_are_sorted=True)
        x_min = jax.ops.segment_min(px, self.seg_ids, num_segments=self.num_nets,
                                    indices_are_sorted=True)
        y_max = jax.ops.segment_max(py, self.seg_ids, num_segments=self.num_nets,
                                    indices_are_sorted=True)
        y_min = jax.ops.segment_min(py, self.seg_ids, num_segments=self.num_nets,
                                    indices_are_sorted=True)
        x_min = jnp.where(self.has_pins, x_min, self.xl)
        x_max = jnp.where(self.has_pins, x_max, self.xl)
        y_min = jnp.where(self.has_pins, y_min, self.yl)
        y_max = jnp.where(self.has_pins, y_max, self.yl)

        eps = jnp.finfo(jnp.float32).eps
        inv_bin_area = 1.0 / (self.bin_size_x * self.bin_size_y)
        wt = self.net_weights  # netWiringDistributionMapWeight == 1
        # 1/bin_area folded into the per-net scale so the kernel needs no epilogue.
        scale = (wt * inv_bin_area) / ((x_max - x_min + eps) * (y_max - y_min + eps))
        scale = jnp.where(self.has_pins, scale, 0.0)

        # pad nets to a multiple of the net-tile size (padded nets have scale = 0
        # and a degenerate bbox at (xl, yl) -> contribute exactly zero)
        n_pad = max(_TN, _round_up(self.num_nets, _TN))
        pad = n_pad - self.num_nets

        def padv(v, fill):
            return jnp.pad(v.astype(jnp.float32), (0, pad), constant_values=fill)

        zeros = jnp.zeros((n_pad,), jnp.float32)
        # x-side stream (nets on lanes): rows [x_min, x_max, scale, 0*5]
        xdat = jnp.stack(
            [padv(x_min, self.xl), padv(x_max, self.xl), padv(scale, 0.0),
             zeros, zeros, zeros, zeros, zeros], axis=0)            # (8, n_pad)
        # y-side stream, pre-transposed (nets on sublanes): cols [y_min, y_max, scale, 0*5]
        ydat = jnp.stack(
            [padv(y_min, self.yl), padv(y_max, self.yl), padv(scale, 0.0),
             zeros, zeros, zeros, zeros, zeros], axis=1)            # (n_pad, 8)

        util = _rudy_pallas(
            xdat, ydat,
            num_bins_x=self.num_bins_x, num_bins_y=self.num_bins_y,
            xl=self.xl, yl=self.yl,
            bin_size_x=self.bin_size_x, bin_size_y=self.bin_size_y)

        if self.initial_utilization_map is not None:
            util = util + self.initial_utilization_map.astype(jnp.float32)
        # TODO(synk): spatial sparsity — bucket nets by bin-x tile and pass per-tile
        # net ranges via PrefetchScalarGridSpec(num_scalar_prefetch>=1) so each output
        # tile only streams/multiplies nets whose bbox overlaps it.
        return util.astype(dtype)


def _rudy_reference(pin_pos, netpin_start, flat_netpin, net_weights,
                    xl, xh, yl, yh, num_bins_x, num_bins_y, initial_map):
    """NumPy re-implementation of the rudy_cpp forward loop (for validation)."""
    pin_pos = np.asarray(pin_pos, dtype=np.float32)
    num_pins = pin_pos.shape[0] // 2
    pin_x, pin_y = pin_pos[:num_pins], pin_pos[num_pins:]
    bsx = (xh - xl) / num_bins_x
    bsy = (yh - yl) / num_bins_y
    util = np.zeros((num_bins_x, num_bins_y), dtype=np.float32)
    eps = np.finfo(np.float32).eps
    num_nets = len(netpin_start) - 1
    for i in range(num_nets):
        s, e = int(netpin_start[i]), int(netpin_start[i + 1])
        if e <= s:
            continue
        pins = flat_netpin[s:e]
        x_min, x_max = pin_x[pins].min(), pin_x[pins].max()
        y_min, y_max = pin_y[pins].min(), pin_y[pins].max()
        bxl = max(int((x_min - xl) / bsx), 0)
        bxh = min(int((x_max - xl) / bsx) + 1, num_bins_x)
        byl = max(int((y_min - yl) / bsy), 0)
        byh = min(int((y_max - yl) / bsy) + 1, num_bins_y)
        wt = 1.0 * net_weights[i]
        for bx in range(bxl, bxh):
            for by in range(byl, byh):
                bin_xl = xl + bx * bsx
                bin_yl = yl + by * bsy
                ov = max(min(x_max, bin_xl + bsx) - max(x_min, bin_xl), 0.0) * \
                     max(min(y_max, bin_yl + bsy) - max(y_min, bin_yl), 0.0)
                util[bx, by] += ov * wt / (x_max - x_min + eps) / (y_max - y_min + eps)
    util *= 1.0 / (bsx * bsy)
    if initial_map is not None:
        util += np.asarray(initial_map, dtype=np.float32)
    return util


if __name__ == "__main__":
    key = jax.random.PRNGKey(0)
    k_x, k_y, k_perm = jax.random.split(key, 3)

    # small deterministic problem
    num_nets = 37
    xl, xh, yl, yh = 0.0, 32.0, 0.0, 64.0
    num_bins_x, num_bins_y = 32, 64

    counts = 2 + (np.arange(num_nets) % 5)                 # 2..6 pins per net
    netpin_start = np.concatenate([[0], np.cumsum(counts)]).astype(np.int32)
    num_pins = int(netpin_start[-1])                       # 145
    flat_netpin = np.asarray(
        jax.random.permutation(k_perm, num_pins), dtype=np.int32)

    pin_x = jax.random.uniform(k_x, (num_pins,), minval=xl, maxval=xh)
    pin_y = jax.random.uniform(k_y, (num_pins,), minval=yl, maxval=yh)
    pin_pos = jnp.concatenate([pin_x, pin_y]).astype(jnp.float32)  # (2*num_pins,)

    net_weights = jnp.linspace(0.5, 1.5, num_nets, dtype=jnp.float32)
    initial_map = jnp.full((num_bins_x, num_bins_y), 0.05, dtype=jnp.float32)

    rudy = Rudy(netpin_start, flat_netpin, net_weights, xl, xh, yl, yh,
                num_bins_x, num_bins_y, deterministic_flag=True,
                initial_utilization_map=initial_map)

    out = jax.block_until_ready(rudy(pin_pos))

    ref = _rudy_reference(np.asarray(pin_pos), netpin_start, flat_netpin,
                          np.asarray(net_weights), xl, xh, yl, yh,
                          num_bins_x, num_bins_y, np.asarray(initial_map))

    assert out.shape == (num_bins_x, num_bins_y)
    np.testing.assert_allclose(np.asarray(out), ref, rtol=5e-4, atol=1e-5)
    print("KERNEL_OK")
</pallas_src>

<mosaic_0001>
module attributes {stable_mosaic.version = 11 : i64} {
  func.func @_rudy_kernel(%arg0: i32, %arg1: i32, %arg2: memref<8x1024xf32, #tpu.memory_space<vmem>>, %arg3: memref<1024x8xf32, #tpu.memory_space<vmem>>, %arg4: memref<16x128xf32, #tpu.memory_space<vmem>>) attributes {dimension_semantics = [#tpu.dimension_semantics<parallel>, #tpu.dimension_semantics<arbitrary>], iteration_bounds = array<i64: 2, 1>, scalar_prefetch = 0 : i64, scratch_operands = 0 : i64, tpu.core_type = #tpu.core_type<tc>, window_params = [{transform_indices = @transform_0, window_bounds = array<i64: 8, 1024>}, {transform_indices = @transform_1, window_bounds = array<i64: 1024, 8>}, {transform_indices = @transform_2, window_bounds = array<i64: 16, 128>}]} {
    %c0 = arith.constant 0 : index
    %c0_0 = arith.constant 0 : index
    %0 = vector.load %arg2[%c0, %c0_0] : memref<8x1024xf32, #tpu.memory_space<vmem>>, vector<8x1024xf32>
    %1 = vector.extract_strided_slice %0 {offsets = [0, 0], sizes = [1, 1024], strides = [1, 1]} : vector<8x1024xf32> to vector<1x1024xf32>
    %2 = vector.extract_strided_slice %0 {offsets = [1, 0], sizes = [1, 1024], strides = [1, 1]} : vector<8x1024xf32> to vector<1x1024xf32>
    %c0_1 = arith.constant 0 : index
    %c0_2 = arith.constant 0 : index
    %3 = vector.load %arg3[%c0_1, %c0_2] : memref<1024x8xf32, #tpu.memory_space<vmem>>, vector<1024x1xf32>
    %c0_3 = arith.constant 0 : index
    %c1 = arith.constant 1 : index
    %4 = vector.load %arg3[%c0_3, %c1] : memref<1024x8xf32, #tpu.memory_space<vmem>>, vector<1024x1xf32>
    %c16_i32 = arith.constant 16 : i32
    %5 = arith.muli %arg0, %c16_i32 : i32
    %6 = arith.sitofp %5 : i32 to f32
    %cst = arith.constant 1.000000e+00 : f32
    %7 = arith.mulf %6, %cst : f32
    %cst_4 = arith.constant 0.000000e+00 : f32
    %8 = arith.addf %cst_4, %7 : f32
    %9 = tpu.iota {dimensions = array<i32: 0>} : vector<16x1xi32>
    %10 = arith.sitofp %9 : vector<16x1xi32> to vector<16x1xf32>
    %cst_5 = arith.constant 1.000000e+00 : f32
    %11 = vector.broadcast %cst_5 : f32 to vector<16x1xf32>
    %12 = arith.mulf %10, %11 : vector<16x1xf32>
    %13 = vector.broadcast %8 : f32 to vector<16x1xf32>
    %14 = arith.addf %13, %12 : vector<16x1xf32>
    %cst_6 = arith.constant 1.000000e+00 : f32
    %15 = vector.broadcast %cst_6 : f32 to vector<16x1xf32>
    %16 = arith.addf %14, %15 : vector<16x1xf32>
    %17 = vector.broadcast %2 : vector<1x1024xf32> to vector<16x1024xf32>
    %18 = vector.broadcast %16 : vector<16x1xf32> to vector<16x1024xf32>
    %19 = arith.minimumf %17, %18 : vector<16x1024xf32>
    %20 = vector.broadcast %1 : vector<1x1024xf32> to vector<16x1024xf32>
    %21 = vector.broadcast %14 : vector<16x1xf32> to vector<16x1024xf32>
    %22 = arith.maximumf %20, %21 : vector<16x1024xf32>
    %23 = arith.subf %19, %22 : vector<16x1024xf32>
    %cst_7 = arith.constant 0.000000e+00 : f32
    %24 = vector.broadcast %cst_7 : f32 to vector<16x1024xf32>
    %25 = arith.maximumf %23, %24 : vector<16x1024xf32>
    %26 = tpu.iota {dimensions = array<i32: 1>} : vector<1x128xi32>
    %27 = arith.sitofp %26 : vector<1x128xi32> to vector<1x128xf32>
    %cst_8 = arith.constant 1.000000e+00 : f32
    %28 = vector.broadcast %cst_8 : f32 to vector<1x128xf32>
    %29 = arith.mulf %27, %28 : vector<1x128xf32>
    %cst_9 = arith.constant 0.000000e+00 : f32
    %30 = vector.broadcast %cst_9 : f32 to vector<1x128xf32>
    %31 = arith.addf %30, %29 : vector<1x128xf32>
    %cst_10 = arith.constant 1.000000e+00 : f32
    %32 = vector.broadcast %cst_10 : f32 to vector<1x128xf32>
    %33 = arith.addf %31, %32 : vector<1x128xf32>
    %34 = vector.broadcast %4 : vector<1024x1xf32> to vector<1024x128xf32>
    %35 = vector.broadcast %33 : vector<1x128xf32> to vector<1024x128xf32>
    %36 = arith.minimumf %34, %35 : vector<1024x128xf32>
    %37 = vector.broadcast %3 : vector<1024x1xf32> to vector<1024x128xf32>
    %38 = vector.broadcast %31 : vector<1x128xf32> to vector<1024x128xf32>
    %39 = arith.maximumf %37, %38 : vector<1024x128xf32>
    %40 = arith.subf %36, %39 : vector<1024x128xf32>
    %cst_11 = arith.constant 0.000000e+00 : f32
    %41 = vector.broadcast %cst_11 : f32 to vector<1024x128xf32>
    %42 = arith.maximumf %40, %41 : vector<1024x128xf32>
    %43 = vector.extract_strided_slice %0 {offsets = [2, 0], sizes = [1, 1024], strides = [1, 1]} : vector<8x1024xf32> to vector<1x1024xf32>
    %44 = vector.broadcast %43 : vector<1x1024xf32> to vector<16x1024xf32>
    %45 = arith.mulf %25, %44 : vector<16x1024xf32>
    %46 = arith.truncf %45 : vector<16x1024xf32> to vector<16x1024xbf16>
    %47 = arith.extf %46 : vector<16x1024xbf16> to vector<16x1024xf32>
    %48 = arith.subf %45, %47 : vector<16x1024xf32>
    %49 = arith.truncf %48 : vector<16x1024xf32> to vector<16x1024xbf16>
    %50 = arith.truncf %42 : vector<1024x128xf32> to vector<1024x128xbf16>
    %51 = arith.extf %50 : vector<1024x128xbf16> to vector<1024x128xf32>
    %52 = arith.subf %42, %51 : vector<1024x128xf32>
    %53 = arith.truncf %52 : vector<1024x128xf32> to vector<1024x128xbf16>
    %cst_12 = arith.constant dense<0.000000e+00> : vector<16x128xf32>
    %54 = tpu.matmul %46, %50, %cst_12 {dimension_numbers = #tpu.dot_dimension_numbers<[1], [0], [0], [1], [0, 0, 1, 1], [], []>} : vector<16x1024xbf16>, vector<1024x128xbf16>, vector<16x128xf32> -> vector<16x128xf32>
    %cst_13 = arith.constant dense<0.000000e+00> : vector<16x128xf32>
    %55 = tpu.matmul %46, %53, %cst_13 {dimension_numbers = #tpu.dot_dimension_numbers<[1], [0], [0], [1], [0, 0, 1, 1], [], []>} : vector<16x1024xbf16>, vector<1024x128xbf16>, vector<16x128xf32> -> vector<16x128xf32>
    %56 = arith.addf %54, %55 : vector<16x128xf32>
    %cst_14 = arith.constant dense<0.000000e+00> : vector<16x128xf32>
    %57 = tpu.matmul %49, %50, %cst_14 {dimension_numbers = #tpu.dot_dimension_numbers<[1], [0], [0], [1], [0, 0, 1, 1], [], []>} : vector<16x1024xbf16>, vector<1024x128xbf16>, vector<16x128xf32> -> vector<16x128xf32>
    %58 = arith.addf %56, %57 : vector<16x128xf32>
    %c0_i32 = arith.constant 0 : i32
    %59 = arith.cmpi eq, %arg1, %c0_i32 : i32
    %60 = arith.extui %59 : i1 to i32
    %c0_i32_15 = arith.constant 0 : i32
    %61 = arith.cmpi ne, %60, %c0_i32_15 : i32
    scf.if %61 {
      %c0_18 = arith.constant 0 : index
      %c0_19 = arith.constant 0 : index
      %65 = vector.load %arg4[%c0_18, %c0_19] : memref<16x128xf32, #tpu.memory_space<vmem>>, vector<16x128xf32>
      tpu.vector_store %arg4[%c0_18, %c0_19], %58 {strides = array<i32>} : memref<16x128xf32, #tpu.memory_space<vmem>>, vector<16x128xf32>,
    } else {
    }
    %c0_i32_16 = arith.constant 0 : i32
    %62 = arith.cmpi ne, %arg1, %c0_i32_16 : i32
    %63 = arith.extui %62 : i1 to i32
    %c0_i32_17 = arith.constant 0 : i32
    %64 = arith.cmpi ne, %63, %c0_i32_17 : i32
    scf.if %64 {
      %c0_18 = arith.constant 0 : index
      %c0_19 = arith.constant 0 : index
      %65 = vector.load %arg4[%c0_18, %c0_19] : memref<16x128xf32, #tpu.memory_space<vmem>>, vector<16x128xf32>
      %66 = arith.addf %65, %58 : vector<16x128xf32>
      %c0_20 = arith.constant 0 : index
      %c0_21 = arith.constant 0 : index
      %67 = vector.load %arg4[%c0_20, %c0_21] : memref<16x128xf32, #tpu.memory_space<vmem>>, vector<16x128xf32>
      tpu.vector_store %arg4[%c0_20, %c0_21], %66 {strides = array<i32>} : memref<16x128xf32, #tpu.memory_space<vmem>>, vector<16x128xf32>,
    } else {
    }
    return
  }
  func.func @transform_0(%arg0: i32, %arg1: i32) -> (i32, i32) {
    %c0_i32 = arith.constant 0 : i32
    %c0_i32_0 = arith.constant 0 : i32
    return %c0_i32, %arg1 : i32, i32
  }
  func.func @transform_1(%arg0: i32, %arg1: i32) -> (i32, i32) {
    %c0_i32 = arith.constant 0 : i32
    %c0_i32_0 = arith.constant 0 : i32
    return %arg1, %c0_i32 : i32, i32
  }
  func.func @transform_2(%arg0: i32, %arg1: i32) -> (i32, i32) {
    %c0_i32 = arith.constant 0 : i32
    %c0_i32_0 = arith.constant 0 : i32
    return %arg0, %c0_i32 : i32, i32
  }
}

</mosaic_0001>

<bundles_post_ra>
// kernel: tpu_custom_call.1
= control target key start
LH: loop header
LB: loop body
LE: loop exit
PB: predicated region body
PF: predicated region fallthrough
CT: control target
= control target key end

     0   :  { %7 = vsyncpa [#allocation3], 0  ;;  %s6331_s0 = inlined_call_operand.vmem [shape: f32[8,1024], index: 0, kind: input, shape index: {}]   ;;  %s6332_s1 = inlined_call_operand.vmem [shape: f32[1024,8], index: 1, kind: input, shape index: {}]   ;;  %s6333_s2 = inlined_call_operand.hbm [shape: f32[32,128], index: 2, kind: output, shape index: {}]  }
   0x1   :  { %9 = vsyncpa [#allocation3 + $0x1], 0  ;;  %s3695_s9 = smov 0   ;;  %s3697_s10 = smov 0  }
   0x2   :  { %s3699_s11 = smov 0   ;;  %s3701_s12 = smov 0  }
   0x3   :  { %s3703_s13 = smov 0   ;;  %s3705_s14 = smov 0  }
   0x4 LB: > { %s3218_s15 = sadd.s32 4294967295, %s3673_s14   ;;  %s3219_s16 = sadd.s32 4294967294, %s3673_s14   ;;  %s3673_s14 = sphi %s3705_s14, %s15_s14   ;;  %s3669_s13 = sphi %s3703_s13, %s7148_s13   ;;  %s3665_s12 = sphi %s3701_s12, %s7147_s12   ;;  %s3661_s11 = sphi %s3699_s11, %s7146_s11   ;;  %s3657_s10 = sphi %s3697_s10, %s7145_s10   ;;  %s3653_s9 = sphi %s3695_s9, %s7144_s9  }
   0x5   : > { %s27_s17 = sadd.s32 1, %s3669_s13  ;;  %s86_s18 = sadd.s32 1, %s3661_s11 }
   0x6   : > { %p29_p0 = scmp.ge.s32.totalorder %s27_s17, 2  ;;  %p96_p1 = scmp.ne.s32.totalorder %s3661_s11, %s3657_s10 }
   0x7   : > { %p97_p2 = scmp.eq.s32.totalorder %s3218_s15, 1  ;;  %p102_p3 = scmp.ne.s32.totalorder %s3657_s10, %s3653_s9 }
   0x8   : > { %s7150_s17 = smov (%p29_p0, %s27_s17), 0  ;;  %p103_p5 = scmp.eq.s32.totalorder %s3219_s16, 1 }
   0x9   : > { %p3735_p4 = por %p97_p2, %p96_p1  ;;  %s83_s20 = ssub.s32 %s3669_s13, %s7150_s17 }
   0xa   : > { %p3223_p6 = scmp.ge.s32.totalorder %s3673_s14, 1  ;;  %p84_p7 = scmp.eq.s32.totalorder %s83_s20, 0 }
   0xb   : > { %p3742_p8 = por %p103_p5, %p102_p3  ;;  %p139_p9 = scmp.lt.s32.totalorder %s3673_s14, 3 }
   0xc   : > { %s3748_s22 = scalar_select %p84_p7, %s3661_s11, %s86_s18  }
   0xd   : > { %p140_p10 = pnand %p3223_p6, %p139_p9 }
   0xf   : > { %143 = sbr.rel (%p140_p10) target bundleno = 1040 (0x410), region = 28 }
  0x14   : > { %v3753_v0 = vld [vmem:[%s6332_s1 + $0x10] sm:$0xff]  ;;  %v3758_v1 = vld [vmem:[%s6332_s1] sm:$0xff]  ;;  %v3675_v2 = vmov 1   ;;  %v3765_v3 = vld [vmem:[%s6332_s1 + $0x18] sm:$0xff]  ;;  %s3225_s27 = sshll.u32 %s3665_s12, 4  ;;  %s163_s3 = sand.u32 1, %s3657_s10  }
  0x15   : > { %3556 = vset.pattern.permute.xlu1 %v3675_v2  ;;  %3555 = vset.pattern.permute.xlu0 %v3675_v2  ;;  %v3770_v4 = vld [vmem:[%s6332_s1 + $0x8] sm:$0xff]  ;;  %v3782_v6 = vld [vmem:[%s6332_s1 + $0x20] sm:$0xff]  ;;  %v3789_v7 = vld [vmem:[%s6332_s1 + $0x38] sm:$0xff]  ;;  %s317_s28 = scvt.s32.f32 %s3225_s27  ;;  %s3224_s4 = sshll.u32 %s163_s3, 4 }
  0x16   : > { %474 = vperm.xlu1 %3556, %v3753_v0   ;;  %464 = vperm.xlu0 %3555, %v3758_v1   ;;  %v3777_v5 = vld [vmem:[%s6332_s1 + $0x28] sm:$0xff]  ;;  %v3794_v8 = vld [vmem:[%s6332_s1 + $0x30] sm:$0xff]  ;;  %v3806_v10 = vld [vmem:[%s6332_s1 + $0x40] sm:$0xff]  ;;  %s165_s5 = scalar_lea.vmem [#allocation2], %s3224_s4  ;;  %s3231_s7 = sshll.u32 %s3665_s12, 8 }
  0x17   : > { %v3801_v9 = vld [vmem:[%s6332_s1 + $0x48] sm:$0xff]  ;;  %v3813_v11 = vld [vmem:[%s6332_s1 + $0x58] sm:$0xff]  ;;  %v3818_v12 = vld [vmem:[%s6332_s1 + $0x50] sm:$0xff]  ;;  %s3130_s6 = sshll.u32 %s165_s5, 4  ;;  %s6282_s16 = scalar_lea.hbm %s6333_s2, %s3231_s7  ;;  %s6277_s6 = int_to_ptr.vmem [resolvable:$true] %s3130_s6 }
  0x18   : > { %v3825_v13 = vld [vmem:[%s6332_s1 + $0x68] sm:$0xff]  ;;  %v3830_v14 = vld [vmem:[%s6332_s1 + $0x60] sm:$0xff]  ;;  %v3837_v15 = vld [vmem:[%s6332_s1 + $0x78] sm:$0xff]  ;;  %s6286_s18 = scalar_lea.sflag [#allocation3], %s163_s3  ;;  %s3597_s20 = scalar_lea.vmem %s6277_s6, 256 }
  0x19   : > { %v3842_v16 = vld [vmem:[%s6332_s1 + $0x70] sm:$0xff]  ;;  %v3849_v17 = vld [vmem:[%s6332_s1 + $0x88] sm:$0xff]  ;;  %v3854_v18 = vld [vmem:[%s6332_s1 + $0x80] sm:$0xff]  ;;  %p3598_p11 = scmp.ne.s32.totalorder %s6277_s6, %s3597_s20  ;;  %s3677_s12 = smov [#allocation2]  }
  0x1a   : > { %479 = vperm.xlu1 %3556, %v3765_v3   ;;  %469 = vperm.xlu0 %3555, %v3770_v4   ;;  %6557 = vst [vmem:[#allocation5_spill] sm:$0xff] %v3849_v17  ;;  %6558 = vst [vmem:[#allocation6_spill] sm:$0xff] %v3854_v18  ;;  %v3861_v19 = vld [vmem:[%s6332_s1 + $0x98] sm:$0xff]  ;;  %v3866_v20 = vld [vmem:[%s6332_s1 + $0x90] sm:$0xff]  ;;  %s3601_s23 = sshll.u32 %s3677_s12, 4  ;;  %s3602_s23 = int_to_ptr.vmem [resolvable:$false] %s3601_s23 }
  0x1b   : > { %v3873_v21 = vld [vmem:[%s6332_s1 + $0xa8] sm:$0xff]  ;;  %v3878_v22 = vld [vmem:[%s6332_s1 + $0xa0] sm:$0xff]  ;;  %v3885_v23 = vld [vmem:[%s6332_s1 + $0xb8] sm:$0xff]  ;;  %p3599_p12 = pnand %p3598_p11, %p3735_p4  ;;  %s3603_s24 = scalar_lea.vmem %s3602_s23, 512 }
  0x1c   : > { %v3890_v24 = vld [vmem:[%s6332_s1 + $0xb0] sm:$0xff]  ;;  %v3897_v25 = vld [vmem:[%s6332_s1 + $0xc8] sm:$0xff]  ;;  %v3902_v26 = vld [vmem:[%s6332_s1 + $0xc0] sm:$0xff]  ;;  %p3604_p0 = scmp.lt.s32.totalorder %s6277_s6, %s3602_s23  ;;  %p3605_p1 = scmp.lt.s32.totalorder %s3603_s24, %s3597_s20 }
  0x1d   : > { %v3909_v27 = vld [vmem:[%s6332_s1 + $0xd8] sm:$0xff]  ;;  %v3914_v28 = vld [vmem:[%s6332_s1 + $0xd0] sm:$0xff]  ;;  %v3921_v29 = vld [vmem:[%s6332_s1 + $0xe8] sm:$0xff]  ;;  %p3600_p13 = pneg %p3599_p12 }
  0x1e   : > { %489 = vperm.xlu1 %3556, %v3777_v5   ;;  %484 = vperm.xlu0 %3555, %v3782_v6   ;;  %v3926_v30 = vld [vmem:[%s6332_s1 + $0xe0] sm:$0xff]  ;;  %v3933_v31 = vld [vmem:[%s6332_s1 + $0xf8] sm:$0xff]  ;;  %v3938_v32 = vld [vmem:[%s6332_s1 + $0xf0] sm:$0xff]  ;;  %p3606_p2 = por %p3605_p1, %p3604_p0 }
  0x1f   : > { %v3945_v33 = vld [vmem:[%s6332_s1 + $0x108] sm:$0xff]  ;;  %v3950_v34 = vld [vmem:[%s6332_s1 + $0x100] sm:$0xff]  ;;  %v3957_v35 = vld [vmem:[%s6332_s1 + $0x118] sm:$0xff] }
  0x20   : > { %6559 = vst [vmem:[#allocation7_spill] sm:$0xff] %v3945_v33  ;;  %6560 = vst [vmem:[#allocation8_spill] sm:$0xff] %v3950_v34  ;;  %v3962_v36 = vld [vmem:[%s6332_s1 + $0x110] sm:$0xff]  ;;  %v3969_v37 = vld [vmem:[%s6332_s1 + $0x128] sm:$0xff]  ;;  %p3607_p3 = pnand %p3606_p2, %p3600_p13 }
  0x21   : > { %6561 = vst [vmem:[#allocation9_spill] sm:$0xff] %v3957_v35  ;;  %6562 = vst [vmem:[#allocation10_spill] sm:$0xff] %v3962_v36  ;;  %v3974_v38 = vld [vmem:[%s6332_s1 + $0x120] sm:$0xff]  ;;  %v3981_v39 = vld [vmem:[%s6332_s1 + $0x138] sm:$0xff] }
  0x22   : > { %499 = vperm.xlu1 %3556, %v3789_v7   ;;  %494 = vperm.xlu0 %3555, %v3794_v8   ;;  %v3986_v40 = vld [vmem:[%s6332_s1 + $0x130] sm:$0xff]  ;;  %v3993_v41 = vld [vmem:[%s6332_s1 + $0x148] sm:$0xff]  ;;  %v3998_v42 = vld [vmem:[%s6332_s1 + $0x140] sm:$0xff] }
  0x23   : > { %v4005_v43 = vld [vmem:[%s6332_s1 + $0x158] sm:$0xff]  ;;  %v4010_v44 = vld [vmem:[%s6332_s1 + $0x150] sm:$0xff]  ;;  %v4017_v45 = vld [vmem:[%s6332_s1 + $0x168] sm:$0xff] }
  0x24   : > { %v4022_v46 = vld [vmem:[%s6332_s1 + $0x160] sm:$0xff]  ;;  %v4029_v47 = vld [vmem:[%s6332_s1 + $0x178] sm:$0xff]  ;;  %v4034_v48 = vld [vmem:[%s6332_s1 + $0x170] sm:$0xff] }
  0x25   : > { %v4041_v49 = vld [vmem:[%s6332_s1 + $0x188] sm:$0xff]  ;;  %v4046_v50 = vld [vmem:[%s6332_s1 + $0x180] sm:$0xff]  ;;  %v4053_v51 = vld [vmem:[%s6332_s1 + $0x198] sm:$0xff] }
  0x26   : > { %509 = vperm.xlu1 %3556, %v3801_v9   ;;  %504 = vperm.xlu0 %3555, %v3806_v10   ;;  %6563 = vst [vmem:[#allocation11_spill] sm:$0xff] %v4041_v49  ;;  %6564 = vst [vmem:[#allocation12_spill] sm:$0xff] %v4046_v50  ;;  %v4058_v52 = vld [vmem:[%s6332_s1 + $0x190] sm:$0xff]  ;;  %v4065_v53 = vld [vmem:[%s6332_s1 + $0x1a8] sm:$0xff] }
  0x27   : > { %v4070_v54 = vld [vmem:[%s6332_s1 + $0x1a0] sm:$0xff]  ;;  %v4077_v55 = vld [vmem:[%s6332_s1 + $0x1b8] sm:$0xff]  ;;  %v4082_v56 = vld [vmem:[%s6332_s1 + $0x1b0] sm:$0xff] }
  0x28   : > { %v4089_v57 = vld [vmem:[%s6332_s1 + $0x1c8] sm:$0xff]  ;;  %v4094_v58 = vld [vmem:[%s6332_s1 + $0x1c0] sm:$0xff]  ;;  %v4101_v59 = vld [vmem:[%s6332_s1 + $0x1d8] sm:$0xff] }
  0x29   : > { %v4106_v60 = vld [vmem:[%s6332_s1 + $0x1d0] sm:$0xff]  ;;  %v4113_v61 = vld [vmem:[%s6332_s1 + $0x1e8] sm:$0xff]  ;;  %v4118_v62 = vld [vmem:[%s6332_s1 + $0x1e0] sm:$0xff] }
  0x2a   : > { %519 = vperm.xlu1 %3556, %v3813_v11   ;;  %514 = vperm.xlu0 %3555, %v3818_v12   ;;  %v4125_v63 = vld [vmem:[%s6332_s1 + $0x1f8] sm:$0xff]  ;;  %v4130_v2 = vld [vmem:[%s6332_s1 + $0x1f0] sm:$0xff] }
  0x2e   : > { %529 = vperm.xlu1 %3556, %v3825_v13   ;;  %524 = vperm.xlu0 %3555, %v3830_v14  }
  0x32   : > { %539 = vperm.xlu1 %3556, %v3837_v15   ;;  %534 = vperm.xlu0 %3555, %v3842_v16  }
  0x36   : > { %549 = vperm.xlu1 %3556, %v3849_v17   ;;  %544 = vperm.xlu0 %3555, %v3854_v18  }
  0x3a   : > { %559 = vperm.xlu1 %3556, %v3861_v19   ;;  %554 = vperm.xlu0 %3555, %v3866_v20  }
  0x3e   : > { %569 = vperm.xlu1 %3556, %v3873_v21   ;;  %564 = vperm.xlu0 %3555, %v3878_v22  }
  0x42   : > { %579 = vperm.xlu1 %3556, %v3885_v23   ;;  %574 = vperm.xlu0 %3555, %v3890_v24  }
  0x46   : > { %589 = vperm.xlu1 %3556, %v3897_v25   ;;  %584 = vperm.xlu0 %3555, %v3902_v26  }
  0x4a   : > { %599 = vperm.xlu1 %3556, %v3909_v27   ;;  %594 = vperm.xlu0 %3555, %v3914_v28  }
  0x4e   : > { %609 = vperm.xlu1 %3556, %v3921_v29   ;;  %604 = vperm.xlu0 %3555, %v3926_v30  }
  0x52   : > { %619 = vperm.xlu1 %3556, %v3933_v31   ;;  %614 = vperm.xlu0 %3555, %v3938_v32  }
  0x56   : > { %629 = vperm.xlu1 %3556, %v3945_v33   ;;  %624 = vperm.xlu0 %3555, %v3950_v34  }
  0x5a   : > { %639 = vperm.xlu1 %3556, %v3957_v35   ;;  %634 = vperm.xlu0 %3555, %v3962_v36  }
  0x5e   : > { %649 = vperm.xlu1 %3556, %v3969_v37   ;;  %644 = vperm.xlu0 %3555, %v3974_v38  }
  0x62   : > { %659 = vperm.xlu1 %3556, %v3981_v39   ;;  %654 = vperm.xlu0 %3555, %v3986_v40  }
  0x66   : > { %669 = vperm.xlu1 %3556, %v3993_v41   ;;  %664 = vperm.xlu0 %3555, %v3998_v42  }
  0x6a   : > { %679 = vperm.xlu1 %3556, %v4005_v43   ;;  %674 = vperm.xlu0 %3555, %v4010_v44  }
  0x6e   : > { %689 = vperm.xlu1 %3556, %v4017_v45   ;;  %684 = vperm.xlu0 %3555, %v4022_v46  }
  0x72   : > { %699 = vperm.xlu1 %3556, %v4029_v47   ;;  %694 = vperm.xlu0 %3555, %v4034_v48  }
  0x76   : > { %709 = vperm.xlu1 %3556, %v4041_v49   ;;  %704 = vperm.xlu0 %3555, %v4046_v50   ;;  %v253_v49 = vld [vmem:[%s6332_s1 + $0x208] sm:$0xff]  ;;  %v252_v50 = vld [vmem:[%s6332_s1 + $0x200] sm:$0xff] }
  0x7a   : > { %719 = vperm.xlu1 %3556, %v4053_v51   ;;  %714 = vperm.xlu0 %3555, %v4058_v52  }
  0x7e   : > { %729 = vperm.xlu1 %3556, %v4065_v53   ;;  %724 = vperm.xlu0 %3555, %v4070_v54  }
  0x82   : > { %739 = vperm.xlu1 %3556, %v4077_v55   ;;  %734 = vperm.xlu0 %3555, %v4082_v56  }
  0x86   : > { %749 = vperm.xlu1 %3556, %v4089_v57   ;;  %744 = vperm.xlu0 %3555, %v4094_v58  }
  0x8a   : > { %759 = vperm.xlu1 %3556, %v4101_v59   ;;  %754 = vperm.xlu0 %3555, %v4106_v60  }
  0x8e   : > { %769 = vperm.xlu1 %3556, %v4113_v61   ;;  %764 = vperm.xlu0 %3555, %v4118_v62  }
  0x91   : > { %v4132_v33 = vpop.permute.xlu1 %474  ;;  %v4134_v34 = vpop.permute.xlu0 %464 }
  0x92   : > { %6565 = vst [vmem:[#allocation13_spill] sm:$0xff] %v4132_v33  ;;  %6566 = vst [vmem:[#allocation14_spill] sm:$0xff] %v4134_v34  ;;  %779 = vperm.xlu1 %3556, %v4125_v63   ;;  %774 = vperm.xlu0 %3555, %v4130_v2   ;;  %v255_v34 = vld [vmem:[%s6332_s1 + $0x218] sm:$0xff]  ;;  %v254_v33 = vld [vmem:[%s6332_s1 + $0x210] sm:$0xff] }
  0x95   : > { %v4144_v17 = vpop.permute.xlu1 %479  ;;  %v4146_v18 = vpop.permute.xlu0 %469 }
  0x96   : > { %6567 = vst [vmem:[#allocation15_spill] sm:$0xff] %v4144_v17  ;;  %6568 = vst [vmem:[#allocation16_spill] sm:$0xff] %v4146_v18  ;;  %789 = vperm.xlu1 %3556, %v253_v49   ;;  %784 = vperm.xlu0 %3555, %v252_v50   ;;  %v257_v18 = vld [vmem:[%s6332_s1 + $0x228] sm:$0xff]  ;;  %v256_v49 = vld [vmem:[%s6332_s1 + $0x220] sm:$0xff] }
  0x99   : > { %v4154_v35 = vpop.permute.xlu1 %489  ;;  %v4156_v36 = vpop.permute.xlu0 %484 }
  0x9a   : > { %6569 = vst [vmem:[#allocation17_spill] sm:$0xff] %v4154_v35  ;;  %6570 = vst [vmem:[#allocation18_spill] sm:$0xff] %v4156_v36  ;;  %799 = vperm.xlu1 %3556, %v255_v34   ;;  %794 = vperm.xlu0 %3555, %v254_v33   ;;  %v259_v36 = vld [vmem:[%s6332_s1 + $0x238] sm:$0xff]  ;;  %v258_v33 = vld [vmem:[%s6332_s1 + $0x230] sm:$0xff] }
  0x9d   : > { %v4164_v50 = vpop.permute.xlu1 %499  ;;  %v4166_v17 = vpop.permute.xlu0 %494 }
  0x9e   : > { %6571 = vst [vmem:[#allocation19_spill] sm:$0xff] %v4164_v50  ;;  %6572 = vst [vmem:[#allocation20_spill] sm:$0xff] %v4166_v17  ;;  %809 = vperm.xlu1 %3556, %v257_v18   ;;  %804 = vperm.xlu0 %3555, %v256_v49   ;;  %v261_v17 = vld [vmem:[%s6332_s1 + $0x248] sm:$0xff]  ;;  %v260_v18 = vld [vmem:[%s6332_s1 + $0x240] sm:$0xff] }
  0xa1   : > { %v4174_v34 = vpop.permute.xlu1 %509  ;;  %v4176_v35 = vpop.permute.xlu0 %504 }
  0xa2   : > { %6573 = vst [vmem:[#allocation21_spill] sm:$0xff] %v4174_v34  ;;  %6574 = vst [vmem:[#allocation22_spill] sm:$0xff] %v4176_v35  ;;  %819 = vperm.xlu1 %3556, %v259_v36   ;;  %814 = vperm.xlu0 %3555, %v258_v33   ;;  %v4191_v35 = vld [vmem:[%s6332_s1 + $0x258] sm:$0xff]  ;;  %v4196_v36 = vld [vmem:[%s6332_s1 + $0x250] sm:$0xff] }
  0xa3   : > { %6577 = vst [vmem:[#allocation25_spill] sm:$0xff] %v4191_v35  ;;  %6578 = vst [vmem:[#allocation26_spill] sm:$0xff] %v4196_v36 }
  0xa5   : > { %v4184_v49 = vpop.permute.xlu1 %519  ;;  %v4186_v50 = vpop.permute.xlu0 %514 }
  0xa6   : > { %6575 = vst [vmem:[#allocation23_spill] sm:$0xff] %v4184_v49  ;;  %6576 = vst [vmem:[#allocation24_spill] sm:$0xff] %v4186_v50  ;;  %829 = vperm.xlu1 %3556, %v261_v17   ;;  %824 = vperm.xlu0 %3555, %v260_v18   ;;  %v4207_v17 = vld [vmem:[%s6332_s1 + $0x268] sm:$0xff]  ;;  %v4212_v18 = vld [vmem:[%s6332_s1 + $0x260] sm:$0xff] }
  0xa7   : > { %6581 = vst [vmem:[#allocation29_spill] sm:$0xff] %v4207_v17  ;;  %6582 = vst [vmem:[#allocation30_spill] sm:$0xff] %v4212_v18 }
  0xa9   : > { %v4198_v33 = vpop.permute.xlu1 %529  ;;  %v4200_v34 = vpop.permute.xlu0 %524 }
  0xaa   : > { %6579 = vst [vmem:[#allocation27_spill] sm:$0xff] %v4198_v33  ;;  %6580 = vst [vmem:[#allocation28_spill] sm:$0xff] %v4200_v34  ;;  %839 = vperm.xlu1 %3556, %v4191_v35   ;;  %834 = vperm.xlu0 %3555, %v4196_v36   ;;  %v4223_v35 = vld [vmem:[%s6332_s1 + $0x278] sm:$0xff]  ;;  %v4228_v36 = vld [vmem:[%s6332_s1 + $0x270] sm:$0xff] }
  0xab   : > { %6585 = vst [vmem:[#allocation33_spill] sm:$0xff] %v4223_v35  ;;  %6586 = vst [vmem:[#allocation34_spill] sm:$0xff] %v4228_v36 }
  0xad   : > { %v4214_v50 = vpop.permute.xlu1 %539  ;;  %v4216_v49 = vpop.permute.xlu0 %534 }
  0xae   : > { %6583 = vst [vmem:[#allocation31_spill] sm:$0xff] %v4214_v50  ;;  %6584 = vst [vmem:[#allocation32_spill] sm:$0xff] %v4216_v49  ;;  %849 = vperm.xlu1 %3556, %v4207_v17   ;;  %844 = vperm.xlu0 %3555, %v4212_v18   ;;  %v269_v17 = vld [vmem:[%s6332_s1 + $0x288] sm:$0xff]  ;;  %v268_v18 = vld [vmem:[%s6332_s1 + $0x280] sm:$0xff] }
  0xb1   : > { %v4230_v34 = vpop.permute.xlu1 %549  ;;  %v4232_v33 = vpop.permute.xlu0 %544 }
  0xb2   : > { %6587 = vst [vmem:[#allocation35_spill] sm:$0xff] %v4230_v34  ;;  %6588 = vst [vmem:[#allocation36_spill] sm:$0xff] %v4232_v33  ;;  %859 = vperm.xlu1 %3556, %v4223_v35   ;;  %854 = vperm.xlu0 %3555, %v4228_v36   ;;  %v271_v35 = vld [vmem:[%s6332_s1 + $0x298] sm:$0xff]  ;;  %v270_v36 = vld [vmem:[%s6332_s1 + $0x290] sm:$0xff] }
  0xb5   : > { %v4242_v49 = vpop.permute.xlu1 %559  ;;  %v4244_v50 = vpop.permute.xlu0 %554 }
  0xb6   : > { %6589 = vst [vmem:[#allocation37_spill] sm:$0xff] %v4242_v49  ;;  %6590 = vst [vmem:[#allocation38_spill] sm:$0xff] %v4244_v50  ;;  %869 = vperm.xlu1 %3556, %v269_v17   ;;  %864 = vperm.xlu0 %3555, %v268_v18   ;;  %v273_v50 = vld [vmem:[%s6332_s1 + $0x2a8] sm:$0xff]  ;;  %v272_v17 = vld [vmem:[%s6332_s1 + $0x2a0] sm:$0xff] }
  0xb9   : > { %v4252_v33 = vpop.permute.xlu1 %569  ;;  %v4254_v34 = vpop.permute.xlu0 %564 }
  0xba   : > { %6591 = vst [vmem:[#allocation39_spill] sm:$0xff] %v4252_v33  ;;  %6592 = vst [vmem:[#allocation40_spill] sm:$0xff] %v4254_v34  ;;  %879 = vperm.xlu1 %3556, %v271_v35   ;;  %874 = vperm.xlu0 %3555, %v270_v36   ;;  %v275_v34 = vld [vmem:[%s6332_s1 + $0x2b8] sm:$0xff]  ;;  %v274_v35 = vld [vmem:[%s6332_s1 + $0x2b0] sm:$0xff] }
  0xbd   : > { %v4262_v18 = vpop.permute.xlu1 %579  ;;  %v4264_v49 = vpop.permute.xlu0 %574 }
  0xbe   : > { %6593 = vst [vmem:[#allocation41_spill] sm:$0xff] %v4262_v18  ;;  %6594 = vst [vmem:[#allocation42_spill] sm:$0xff] %v4264_v49  ;;  %889 = vperm.xlu1 %3556, %v273_v50   ;;  %884 = vperm.xlu0 %3555, %v272_v17   ;;  %v277_v49 = vld [vmem:[%s6332_s1 + $0x2c8] sm:$0xff]  ;;  %v276_v50 = vld [vmem:[%s6332_s1 + $0x2c0] sm:$0xff] }
  0xc1   : > { %v4272_v36 = vpop.permute.xlu1 %589  ;;  %v4274_v33 = vpop.permute.xlu0 %584 }
  0xc2   : > { %6595 = vst [vmem:[#allocation43_spill] sm:$0xff] %v4272_v36  ;;  %6596 = vst [vmem:[#allocation44_spill] sm:$0xff] %v4274_v33  ;;  %899 = vperm.xlu1 %3556, %v275_v34   ;;  %894 = vperm.xlu0 %3555, %v274_v35   ;;  %v4289_v33 = vld [vmem:[%s6332_s1 + $0x2d8] sm:$0xff]  ;;  %v4294_v34 = vld [vmem:[%s6332_s1 + $0x2d0] sm:$0xff] }
  0xc3   : > { %6599 = vst [vmem:[#allocation47_spill] sm:$0xff] %v4289_v33  ;;  %6600 = vst [vmem:[#allocation48_spill] sm:$0xff] %v4294_v34 }
  0xc5   : > { %v4282_v17 = vpop.permute.xlu1 %599  ;;  %v4284_v18 = vpop.permute.xlu0 %594 }
  0xc6   : > { %6597 = vst [vmem:[#allocation45_spill] sm:$0xff] %v4282_v17  ;;  %6598 = vst [vmem:[#allocation46_spill] sm:$0xff] %v4284_v18  ;;  %909 = vperm.xlu1 %3556, %v277_v49   ;;  %904 = vperm.xlu0 %3555, %v276_v50   ;;  %v4305_v49 = vld [vmem:[%s6332_s1 + $0x2e8] sm:$0xff]  ;;  %v4310_v50 = vld [vmem:[%s6332_s1 + $0x2e0] sm:$0xff] }
  0xc7   : > { %6603 = vst [vmem:[#allocation51_spill] sm:$0xff] %v4305_v49  ;;  %6604 = vst [vmem:[#allocation52_spill] sm:$0xff] %v4310_v50 }
  0xc9   : > { %v4296_v35 = vpop.permute.xlu1 %609  ;;  %v4298_v36 = vpop.permute.xlu0 %604 }
  0xca   : > { %6601 = vst [vmem:[#allocation49_spill] sm:$0xff] %v4296_v35  ;;  %6602 = vst [vmem:[#allocation50_spill] sm:$0xff] %v4298_v36  ;;  %919 = vperm.xlu1 %3556, %v4289_v33   ;;  %914 = vperm.xlu0 %3555, %v4294_v34   ;;  %v4321_v33 = vld [vmem:[%s6332_s1 + $0x2f8] sm:$0xff]  ;;  %v4326_v34 = vld [vmem:[%s6332_s1 + $0x2f0] sm:$0xff] }
  0xcb   : > { %6607 = vst [vmem:[#allocation55_spill] sm:$0xff] %v4321_v33  ;;  %6608 = vst [vmem:[#allocation56_spill] sm:$0xff] %v4326_v34 }
  0xcd   : > { %v4312_v18 = vpop.permute.xlu1 %619  ;;  %v4314_v17 = vpop.permute.xlu0 %614 }
  0xce   : > { %6605 = vst [vmem:[#allocation53_spill] sm:$0xff] %v4312_v18  ;;  %6606 = vst [vmem:[#allocation54_spill] sm:$0xff] %v4314_v17  ;;  %929 = vperm.xlu1 %3556, %v4305_v49   ;;  %924 = vperm.xlu0 %3555, %v4310_v50   ;;  %v285_v49 = vld [vmem:[%s6332_s1 + $0x308] sm:$0xff]  ;;  %v284_v50 = vld [vmem:[%s6332_s1 + $0x300] sm:$0xff] }
  0xd1   : > { %v4328_v36 = vpop.permute.xlu1 %629  ;;  %v4330_v35 = vpop.permute.xlu0 %624 }
  0xd2   : > { %6609 = vst [vmem:[#allocation57_spill] sm:$0xff] %v4328_v36  ;;  %6610 = vst [vmem:[#allocation58_spill] sm:$0xff] %v4330_v35  ;;  %939 = vperm.xlu1 %3556, %v4321_v33   ;;  %934 = vperm.xlu0 %3555, %v4326_v34   ;;  %v287_v35 = vld [vmem:[%s6332_s1 + $0x318] sm:$0xff]  ;;  %v286_v36 = vld [vmem:[%s6332_s1 + $0x310] sm:$0xff] }
  0xd5   : > { %v4340_v17 = vpop.permute.xlu1 %639  ;;  %v4342_v18 = vpop.permute.xlu0 %634 }
  0xd6   : > { %6611 = vst [vmem:[#allocation59_spill] sm:$0xff] %v4340_v17  ;;  %6612 = vst [vmem:[#allocation60_spill] sm:$0xff] %v4342_v18  ;;  %949 = vperm.xlu1 %3556, %v285_v49   ;;  %944 = vperm.xlu0 %3555, %v284_v50   ;;  %v289_v18 = vld [vmem:[%s6332_s1 + $0x328] sm:$0xff]  ;;  %v288_v49 = vld [vmem:[%s6332_s1 + $0x320] sm:$0xff] }
  0xd9   : > { %v4350_v33 = vpop.permute.xlu1 %649  ;;  %v4352_v34 = vpop.permute.xlu0 %644 }
  0xda   : > { %6613 = vst [vmem:[#allocation61_spill] sm:$0xff] %v4350_v33  ;;  %6614 = vst [vmem:[#allocation62_spill] sm:$0xff] %v4352_v34  ;;  %959 = vperm.xlu1 %3556, %v287_v35   ;;  %954 = vperm.xlu0 %3555, %v286_v36   ;;  %v291_v34 = vld [vmem:[%s6332_s1 + $0x338] sm:$0xff]  ;;  %v290_v36 = vld [vmem:[%s6332_s1 + $0x330] sm:$0xff] }
  0xdd   : > { %v4360_v50 = vpop.permute.xlu1 %659  ;;  %v4362_v17 = vpop.permute.xlu0 %654 }
  0xde   : > { %6615 = vst [vmem:[#allocation63_spill] sm:$0xff] %v4360_v50  ;;  %6616 = vst [vmem:[#allocation64_spill] sm:$0xff] %v4362_v17  ;;  %969 = vperm.xlu1 %3556, %v289_v18   ;;  %964 = vperm.xlu0 %3555, %v288_v49   ;;  %v293_v17 = vld [vmem:[%s6332_s1 + $0x348] sm:$0xff]  ;;  %v292_v18 = vld [vmem:[%s6332_s1 + $0x340] sm:$0xff] }
  0xe1   : > { %v4370_v35 = vpop.permute.xlu1 %669  ;;  %v4372_v33 = vpop.permute.xlu0 %664 }
  0xe2   : > { %6617 = vst [vmem:[#allocation65_spill] sm:$0xff] %v4370_v35  ;;  %6618 = vst [vmem:[#allocation66_spill] sm:$0xff] %v4372_v33  ;;  %979 = vperm.xlu1 %3556, %v291_v34   ;;  %974 = vperm.xlu0 %3555, %v290_v36   ;;  %v4387_v33 = vld [vmem:[%s6332_s1 + $0x358] sm:$0xff]  ;;  %v4392_v34 = vld [vmem:[%s6332_s1 + $0x350] sm:$0xff] }
  0xe3   : > { %6621 = vst [vmem:[#allocation69_spill] sm:$0xff] %v4387_v33  ;;  %6622 = vst [vmem:[#allocation70_spill] sm:$0xff] %v4392_v34 }
  0xe5   : > { %v4380_v49 = vpop.permute.xlu1 %679  ;;  %v4382_v50 = vpop.permute.xlu0 %674 }
  0xe6   : > { %6619 = vst [vmem:[#allocation67_spill] sm:$0xff] %v4380_v49  ;;  %6620 = vst [vmem:[#allocation68_spill] sm:$0xff] %v4382_v50  ;;  %989 = vperm.xlu1 %3556, %v293_v17   ;;  %984 = vperm.xlu0 %3555, %v292_v18   ;;  %v4403_v17 = vld [vmem:[%s6332_s1 + $0x368] sm:$0xff]  ;;  %v4408_v18 = vld [vmem:[%s6332_s1 + $0x360] sm:$0xff] }
  0xe7   : > { %6625 = vst [vmem:[#allocation73_spill] sm:$0xff] %v4403_v17  ;;  %6626 = vst [vmem:[#allocation74_spill] sm:$0xff] %v4408_v18 }
  0xe9   : > { %v4394_v36 = vpop.permute.xlu1 %689  ;;  %v4396_v35 = vpop.permute.xlu0 %684 }
  0xea   : > { %6623 = vst [vmem:[#allocation71_spill] sm:$0xff] %v4394_v36  ;;  %6624 = vst [vmem:[#allocation72_spill] sm:$0xff] %v4396_v35  ;;  %999 = vperm.xlu1 %3556, %v4387_v33   ;;  %994 = vperm.xlu0 %3555, %v4392_v34   ;;  %v4419_v33 = vld [vmem:[%s6332_s1 + $0x378] sm:$0xff]  ;;  %v4424_v34 = vld [vmem:[%s6332_s1 + $0x370] sm:$0xff] }
  0xeb   : > { %6629 = vst [vmem:[#allocation77_spill] sm:$0xff] %v4419_v33  ;;  %6630 = vst [vmem:[#allocation78_spill] sm:$0xff] %v4424_v34 }
  0xed   : > { %v4410_v50 = vpop.permute.xlu1 %699  ;;  %v4412_v49 = vpop.permute.xlu0 %694 }
  0xee   : > { %6627 = vst [vmem:[#allocation75_spill] sm:$0xff] %v4410_v50  ;;  %6628 = vst [vmem:[#allocation76_spill] sm:$0xff] %v4412_v49  ;;  %1009 = vperm.xlu1 %3556, %v4403_v17   ;;  %1004 = vperm.xlu0 %3555, %v4408_v18   ;;  %v301_v17 = vld [vmem:[%s6332_s1 + $0x388] sm:$0xff]  ;;  %v300_v18 = vld [vmem:[%s6332_s1 + $0x380] sm:$0xff] }
  0xf1   : > { %v4426_v35 = vpop.permute.xlu1 %709  ;;  %v4428_v36 = vpop.permute.xlu0 %704 }
  0xf2   : > { %6631 = vst [vmem:[#allocation79_spill] sm:$0xff] %v4426_v35  ;;  %6632 = vst [vmem:[#allocation80_spill] sm:$0xff] %v4428_v36  ;;  %1019 = vperm.xlu1 %3556, %v4419_v33   ;;  %1014 = vperm.xlu0 %3555, %v4424_v34   ;;  %v303_v33 = vld [vmem:[%s6332_s1 + $0x398] sm:$0xff]  ;;  %v302_v34 = vld [vmem:[%s6332_s1 + $0x390] sm:$0xff] }
  0xf5   : > { %v4438_v49 = vpop.permute.xlu1 %719  ;;  %v4440_v50 = vpop.permute.xlu0 %714 }
  0xf6   : > { %6633 = vst [vmem:[#allocation81_spill] sm:$0xff] %v4438_v49  ;;  %6634 = vst [vmem:[#allocation82_spill] sm:$0xff] %v4440_v50  ;;  %1029 = vperm.xlu1 %3556, %v301_v17   ;;  %1024 = vperm.xlu0 %3555, %v300_v18   ;;  %v305_v50 = vld [vmem:[%s6332_s1 + $0x3a8] sm:$0xff]  ;;  %v304_v17 = vld [vmem:[%s6332_s1 + $0x3a0] sm:$0xff] }
  0xf9   : > { %v4448_v36 = vpop.permute.xlu1 %729  ;;  %v4450_v35 = vpop.permute.xlu0 %724 }
  0xfa   : > { %6635 = vst [vmem:[#allocation83_spill] sm:$0xff] %v4448_v36  ;;  %6636 = vst [vmem:[#allocation84_spill] sm:$0xff] %v4450_v35  ;;  %1039 = vperm.xlu1 %3556, %v303_v33   ;;  %1034 = vperm.xlu0 %3555, %v302_v34   ;;  %v307_v35 = vld [vmem:[%s6332_s1 + $0x3b8] sm:$0xff]  ;;  %v306_v33 = vld [vmem:[%s6332_s1 + $0x3b0] sm:$0xff] }
  0xfd   : > { %v4458_v18 = vpop.permute.xlu1 %739  ;;  %v4460_v49 = vpop.permute.xlu0 %734 }
  0xfe   : > { %6637 = vst [vmem:[#allocation85_spill] sm:$0xff] %v4458_v18  ;;  %6638 = vst [vmem:[#allocation86_spill] sm:$0xff] %v4460_v49  ;;  %1049 = vperm.xlu1 %3556, %v305_v50   ;;  %1044 = vperm.xlu0 %3555, %v304_v17   ;;  %v4475_v49 = vld [vmem:[%s6332_s1 + $0x3c8] sm:$0xff]  ;;  %v4480_v50 = vld [vmem:[%s6332_s1 + $0x3c0] sm:$0xff] }
  0xff   : > { %6641 = vst [vmem:[#allocation89_spill] sm:$0xff] %v4475_v49  ;;  %6642 = vst [vmem:[#allocation90_spill] sm:$0xff] %v4480_v50 }
 0x101   : > { %v4468_v34 = vpop.permute.xlu1 %749  ;;  %v4470_v36 = vpop.permute.xlu0 %744 }
 0x102   : > { %6639 = vst [vmem:[#allocation87_spill] sm:$0xff] %v4468_v34  ;;  %6640 = vst [vmem:[#allocation88_spill] sm:$0xff] %v4470_v36  ;;  %1059 = vperm.xlu1 %3556, %v307_v35   ;;  %1054 = vperm.xlu0 %3555, %v306_v33   ;;  %v4491_v35 = vld [vmem:[%s6332_s1 + $0x3d8] sm:$0xff]  ;;  %v4496_v33 = vld [vmem:[%s6332_s1 + $0x3d0] sm:$0xff] }
 0x103   : > { %6645 = vst [vmem:[#allocation93_spill] sm:$0xff] %v4491_v35  ;;  %6646 = vst [vmem:[#allocation94_spill] sm:$0xff] %v4496_v33 }
 0x105   : > { %v4482_v17 = vpop.permute.xlu1 %759  ;;  %v4484_v18 = vpop.permute.xlu0 %754 }
 0x106   : > { %6643 = vst [vmem:[#allocation91_spill] sm:$0xff] %v4482_v17  ;;  %6644 = vst [vmem:[#allocation92_spill] sm:$0xff] %v4484_v18  ;;  %1069 = vperm.xlu1 %3556, %v4475_v49   ;;  %1064 = vperm.xlu0 %3555, %v4480_v50   ;;  %v4507_v49 = vld [vmem:[%s6332_s1 + $0x3e8] sm:$0xff]  ;;  %v4512_v50 = vld [vmem:[%s6332_s1 + $0x3e0] sm:$0xff] }
 0x107   : > { %6649 = vst [vmem:[#allocation97_spill] sm:$0xff] %v4507_v49  ;;  %6650 = vst [vmem:[#allocation98_spill] sm:$0xff] %v4512_v50 }
 0x109   : > { %v4498_v36 = vpop.permute.xlu1 %769  ;;  %v4500_v34 = vpop.permute.xlu0 %764 }
 0x10a   : > { %6647 = vst [vmem:[#allocation95_spill] sm:$0xff] %v4498_v36  ;;  %6648 = vst [vmem:[#allocation96_spill] sm:$0xff] %v4500_v34  ;;  %1079 = vperm.xlu1 %3556, %v4491_v35   ;;  %1074 = vperm.xlu0 %3555, %v4496_v33   ;;  %v4523_v35 = vld [vmem:[%s6332_s1 + $0x3f8] sm:$0xff]  ;;  %v4528_v33 = vld [vmem:[%s6332_s1 + $0x3f0] sm:$0xff] }
 0x10d   : > { %v4514_v18 = vpop.permute.xlu1 %779  ;;  %v4516_v17 = vpop.permute.xlu0 %774 }
 0x10e   : > { %6651 = vst [vmem:[#allocation99_spill] sm:$0xff] %v4514_v18  ;;  %6652 = vst [vmem:[#allocation100_spill] sm:$0xff] %v4516_v17  ;;  %1089 = vperm.xlu1 %3556, %v4507_v49   ;;  %1084 = vperm.xlu0 %3555, %v4512_v50   ;;  %v3676_v17 = vmov 0  }
 0x111   : > { %v4530_v34 = vpop.permute.xlu1 %789  ;;  %v4532_v36 = vpop.permute.xlu0 %784 }
 0x112   : > { %6653 = vst [vmem:[#allocation101_spill] sm:$0xff] %v4530_v34  ;;  %6654 = vst [vmem:[#allocation102_spill] sm:$0xff] %v4532_v36  ;;  %1099 = vperm.xlu1 %3556, %v4523_v35   ;;  %1094 = vperm.xlu0 %3555, %v4528_v33  }
 0x115   : > { %v4536_v49 = vpop.permute.xlu1 %799  ;;  %v4538_v50 = vpop.permute.xlu0 %794 }
 0x116   : > { %6655 = vst [vmem:[#allocation103_spill] sm:$0xff] %v4536_v49  ;;  %6656 = vst [vmem:[#allocation104_spill] sm:$0xff] %v4538_v50  ;;  %3558 = vset.pattern.permute.xlu1 %v3676_v17  ;;  %3557 = vset.pattern.permute.xlu0 %v3676_v17  ;;  %v6724_v50 = vld [vmem:[#allocation17_spill] sm:$0xff] }
 0x117   : > { %1235 = vperm.xlu1 %3558, %v3770_v4   ;;  %1231 = vperm.xlu0 %3557, %v3758_v1  }
 0x119   : > { %v4542_v18 = vpop.permute.xlu1 %809  ;;  %v4544_v34 = vpop.permute.xlu0 %804 }
 0x11a   : > { %6657 = vst [vmem:[#allocation105_spill] sm:$0xff] %v4542_v18  ;;  %6658 = vst [vmem:[#allocation106_spill] sm:$0xff] %v4544_v34 }
 0x11b   : > { %1239 = vperm.xlu1 %3558, %v3753_v0   ;;  %1243 = vperm.xlu0 %3557, %v3765_v3  }
 0x11d   : > { %v4548_v36 = vpop.permute.xlu1 %819  ;;  %v4550_v49 = vpop.permute.xlu0 %814 }
 0x11e   : > { %6659 = vst [vmem:[#allocation107_spill] sm:$0xff] %v4548_v36  ;;  %6660 = vst [vmem:[#allocation108_spill] sm:$0xff] %v4550_v49 }
 0x11f   : > { %1247 = vperm.xlu1 %3558, %v3782_v6   ;;  %1251 = vperm.xlu0 %3557, %v3777_v5  }
 0x121   : > { %v4554_v17 = vpop.permute.xlu1 %829  ;;  %v4556_v4 = vpop.permute.xlu0 %824 }
 0x122   : > { %6661 = vst [vmem:[#allocation109_spill] sm:$0xff] %v4554_v17  ;;  %6662 = vst [vmem:[#allocation110_spill] sm:$0xff] %v4556_v4  ;;  %v6772_v17 = vld [vmem:[#allocation72_spill] sm:$0xff] }
 0x123   : > { %1255 = vperm.xlu1 %3558, %v3794_v8   ;;  %1259 = vperm.xlu0 %3557, %v3789_v7  }
 0x125   : > { %v4560_v1 = vpop.permute.xlu1 %839  ;;  %v4562_v0 = vpop.permute.xlu0 %834 }
 0x126   : > { %6663 = vst [vmem:[#allocation111_spill] sm:$0xff] %v4560_v1  ;;  %6664 = vst [vmem:[#allocation112_spill] sm:$0xff] %v4562_v0  ;;  %v6757_v1 = vld [vmem:[#allocation33_spill] sm:$0xff] }
 0x127   : > { %1263 = vperm.xlu1 %3558, %v3806_v10   ;;  %1351 = vperm.xlu0 %3557, %v3938_v32  }
 0x129   : > { %v4566_v3 = vpop.permute.xlu1 %849  ;;  %v4568_v6 = vpop.permute.xlu0 %844 }
 0x12a   : > { %6665 = vst [vmem:[#allocation113_spill] sm:$0xff] %v4566_v3  ;;  %6666 = vst [vmem:[#allocation114_spill] sm:$0xff] %v4568_v6  ;;  %v6755_v3 = vld [vmem:[#allocation54_spill] sm:$0xff] }
 0x12b   : > { %1355 = vperm.xlu1 %3558, %v3933_v31   ;;  %1287 = vperm.xlu0 %3557, %v3842_v16  }
 0x12d   : > { %v4572_v5 = vpop.permute.xlu1 %859  ;;  %v4574_v8 = vpop.permute.xlu0 %854 }
 0x12e   : > { %6667 = vst [vmem:[#allocation115_spill] sm:$0xff] %v4572_v5 }
 0x12f   : > { %1291 = vperm.xlu1 %3558, %v3837_v15   ;;  %1479 = vperm.xlu0 %3557, %v4130_v2  }
 0x131   : > { %v4578_v7 = vpop.permute.xlu1 %869  ;;  %v4580_v10 = vpop.permute.xlu0 %864 }
 0x132   : > { %6668 = vst [vmem:[#allocation116_spill] sm:$0xff] %v4578_v7  ;;  %6669 = vst [vmem:[#allocation117_spill] sm:$0xff] %v4580_v10  ;;  %v6721_v10 = vld [vmem:[#allocation14_spill] sm:$0xff] }
 0x133   : > { %1483 = vperm.xlu1 %3558, %v4125_v63   ;;  %1415 = vperm.xlu0 %3557, %v4034_v48  }
 0x135   : > { %v4584_v32 = vpop.permute.xlu1 %879  ;;  %v4586_v31 = vpop.permute.xlu0 %874 }
 0x136   : > { %6670 = vst [vmem:[#allocation118_spill] sm:$0xff] %v4584_v32  ;;  %6671 = vst [vmem:[#allocation119_spill] sm:$0xff] %v4586_v31  ;;  %v6723_v31 = vld [vmem:[#allocation16_spill] sm:$0xff] }
 0x137   : > { %1419 = vperm.xlu1 %3558, %v4029_v47   ;;  %1343 = vperm.xlu0 %3557, %v3926_v30   ;;  %v6735_v32 = vld [vmem:[#allocation28_spill] sm:$0xff] }
 0x139   : > { %v4590_v16 = vpop.permute.xlu1 %889  ;;  %v4592_v15 = vpop.permute.xlu0 %884 }
 0x13a   : > { %6672 = vst [vmem:[#allocation120_spill] sm:$0xff] %v4590_v16  ;;  %6673 = vst [vmem:[#allocation121_spill] sm:$0xff] %v4592_v15  ;;  %v6730_v15 = vld [vmem:[#allocation8_spill] sm:$0xff] }
 0x13b   : > { %1347 = vperm.xlu1 %3558, %v3921_v29   ;;  %1279 = vperm.xlu0 %3557, %v3830_v14  }
 0x13d   : > { %v4596_v2 = vpop.permute.xlu1 %899  ;;  %v4598_v63 = vpop.permute.xlu0 %894 }
 0x13e   : > { %6674 = vst [vmem:[#allocation122_spill] sm:$0xff] %v4596_v2  ;;  %6675 = vst [vmem:[#allocation123_spill] sm:$0xff] %v4598_v63  ;;  %v6773_v63 = vld [vmem:[#allocation75_spill] sm:$0xff] }
 0x13f   : > { %1283 = vperm.xlu1 %3558, %v3825_v13   ;;  %1471 = vperm.xlu0 %3557, %v4118_v62  }
 0x141   : > { %v4602_v48 = vpop.permute.xlu1 %909  ;;  %v4604_v47 = vpop.permute.xlu0 %904 }
 0x142   : > { %6676 = vst [vmem:[#allocation124_spill] sm:$0xff] %v4602_v48  ;;  %6677 = vst [vmem:[#allocation125_spill] sm:$0xff] %v4604_v47  ;;  %v6746_v48 = vld [vmem:[#allocation56_spill] sm:$0xff] }
 0x143   : > { %1475 = vperm.xlu1 %3558, %v4113_v61   ;;  %1407 = vperm.xlu0 %3557, %v4022_v46  }
 0x145   : > { %v4608_v30 = vpop.permute.xlu1 %919  ;;  %v4610_v29 = vpop.permute.xlu0 %914 }
 0x146   : > { %6678 = vst [vmem:[#allocation126_spill] sm:$0xff] %v4608_v30  ;;  %6679 = vst [vmem:[#allocation127_spill] sm:$0xff] %v4610_v29  ;;  %v6753_v29 = vld [vmem:[#allocation50_spill] sm:$0xff] }
 0x147   : > { %1411 = vperm.xlu1 %3558, %v4017_v45   ;;  %1335 = vperm.xlu0 %3557, %v3914_v28  }
 0x149   : > { %v4614_v14 = vpop.permute.xlu1 %929  ;;  %v4616_v13 = vpop.permute.xlu0 %924 }
 0x14a   : > { %6680 = vst [vmem:[#allocation128_spill] sm:$0xff] %v4614_v14  ;;  %6681 = vst [vmem:[#allocation129_spill] sm:$0xff] %v4616_v13  ;;  %v6756_v14 = vld [vmem:[#allocation34_spill] sm:$0xff] }
 0x14b   : > { %1339 = vperm.xlu1 %3558, %v3909_v27   ;;  %1271 = vperm.xlu0 %3557, %v3818_v12  }
 0x14d   : > { %v4620_v62 = vpop.permute.xlu1 %939  ;;  %v4622_v61 = vpop.permute.xlu0 %934 }
 0x14f   : > { %1275 = vperm.xlu1 %3558, %v3813_v11   ;;  %1463 = vperm.xlu0 %3557, %v4106_v60  }
 0x151   : > { %v4626_v46 = vpop.permute.xlu1 %949  ;;  %v4628_v45 = vpop.permute.xlu0 %944 }
 0x152   : > { %6682 = vst [vmem:[#allocation130_spill] sm:$0xff] %v4626_v46  ;;  %6683 = vst [vmem:[#allocation131_spill] sm:$0xff] %v4628_v45 }
 0x153   : > { %1467 = vperm.xlu1 %3558, %v4101_v59   ;;  %1399 = vperm.xlu0 %3557, %v4010_v44  }
 0x155   : > { %v4632_v28 = vpop.permute.xlu1 %959  ;;  %v4634_v27 = vpop.permute.xlu0 %954 }
 0x156   : > { %6684 = vst [vmem:[#allocation132_spill] sm:$0xff] %v4632_v28  ;;  %6685 = vst [vmem:[#allocation133_spill] sm:$0xff] %v4634_v27  ;;  %v6711_v27 = vld [vmem:[#allocation9_spill] sm:$0xff] }
 0x157   : > { %1403 = vperm.xlu1 %3558, %v4005_v43   ;;  %1327 = vperm.xlu0 %3557, %v3902_v26  }
 0x159   : > { %v4638_v12 = vpop.permute.xlu1 %969  ;;  %v4640_v11 = vpop.permute.xlu0 %964 }
 0x15a   : > { %6686 = vst [vmem:[#allocation134_spill] sm:$0xff] %v4638_v12  ;;  %6687 = vst [vmem:[#allocation135_spill] sm:$0xff] %v4640_v11  ;;  %v6725_v11 = vld [vmem:[#allocation18_spill] sm:$0xff]  ;;  %v6736_v12 = vld [vmem:[#allocation31_spill] sm:$0xff] }
 0x15b   : > { %1331 = vperm.xlu1 %3558, %v3897_v25   ;;  %1267 = vperm.xlu0 %3557, %v3801_v9  }
 0x15d   : > { %v4644_v60 = vpop.permute.xlu1 %979  ;;  %v4646_v59 = vpop.permute.xlu0 %974 }
 0x15e   : > { %6688 = vst [vmem:[#allocation136_spill] sm:$0xff] %v4644_v60  ;;  %6689 = vst [vmem:[#allocation137_spill] sm:$0xff] %v4646_v59  ;;  %v6733_v59 = vld [vmem:[#allocation24_spill] sm:$0xff] }
 0x15f   : > { %1455 = vperm.xlu1 %3558, %v4094_v58   ;;  %1459 = vperm.xlu0 %3557, %v4089_v57  }
 0x161   : > { %v4650_v44 = vpop.permute.xlu1 %989  ;;  %v4652_v43 = vpop.permute.xlu0 %984 }
 0x162   : > { %6690 = vst [vmem:[#allocation138_spill] sm:$0xff] %v4650_v44  ;;  %6691 = vst [vmem:[#allocation139_spill] sm:$0xff] %v4652_v43  ;;  %v6747_v43 = vld [vmem:[#allocation55_spill] sm:$0xff] }
 0x163   : > { %1391 = vperm.xlu1 %3558, %v3998_v42   ;;  %1395 = vperm.xlu0 %3557, %v3993_v41  }
 0x165   : > { %v4656_v26 = vpop.permute.xlu1 %999  ;;  %v4658_v25 = vpop.permute.xlu0 %994 }
 0x166   : > { %6692 = vst [vmem:[#allocation140_spill] sm:$0xff] %v4656_v26  ;;  %6693 = vst [vmem:[#allocation141_spill] sm:$0xff] %v4658_v25 }
 0x167   : > { %1319 = vperm.xlu1 %3558, %v3890_v24   ;;  %1323 = vperm.xlu0 %3557, %v3885_v23  }
 0x169   : > { %v4662_v9 = vpop.permute.xlu1 %1009  ;;  %v4664_v58 = vpop.permute.xlu0 %1004 }
 0x16a   : > { %6694 = vst [vmem:[#allocation142_spill] sm:$0xff] %v4662_v9  ;;  %6695 = vst [vmem:[#allocation143_spill] sm:$0xff] %v4664_v58  ;;  %v6754_v58 = vld [vmem:[#allocation53_spill] sm:$0xff] }
 0x16b   : > { %1447 = vperm.xlu1 %3558, %v4082_v56   ;;  %1451 = vperm.xlu0 %3557, %v4077_v55  }
 0x16d   : > { %v4668_v57 = vpop.permute.xlu1 %1019  ;;  %v4670_v42 = vpop.permute.xlu0 %1014 }
 0x16e   : > { %6696 = vst [vmem:[#allocation144_spill] sm:$0xff] %v4668_v57  ;;  %6697 = vst [vmem:[#allocation145_spill] sm:$0xff] %v4670_v42  ;;  %v6774_v57 = vld [vmem:[#allocation76_spill] sm:$0xff] }
 0x16f   : > { %1383 = vperm.xlu1 %3558, %v3986_v40   ;;  %1387 = vperm.xlu0 %3557, %v3981_v39  }
 0x171   : > { %v4674_v41 = vpop.permute.xlu1 %1029  ;;  %v4676_v24 = vpop.permute.xlu0 %1024 }
 0x172   : > { %6698 = vst [vmem:[#allocation146_spill] sm:$0xff] %v4674_v41  ;;  %6699 = vst [vmem:[#allocation147_spill] sm:$0xff] %v4676_v24  ;;  %v6710_v41 = vld [vmem:[#allocation10_spill] sm:$0xff] }
 0x173   : > { %1311 = vperm.xlu1 %3558, %v3878_v22   ;;  %1315 = vperm.xlu0 %3557, %v3873_v21   ;;  %v319_v21 = vlaneseq }
 0x175   : > { %v4680_v23 = vpop.permute.xlu1 %1039  ;;  %v4682_v56 = vpop.permute.xlu0 %1034  ;;  %v4753_v16 = vshrl.u32 %v319_v21, 7 }
 0x176   : > { %6700 = vst [vmem:[#allocation148_spill] sm:$0xff] %v4680_v23  ;;  %6701 = vst [vmem:[#allocation149_spill] sm:$0xff] %v4682_v56  ;;  %v6714_v23 = vld [vmem:[#allocation6_spill] sm:$0xff] }
 0x177   : > { %1439 = vperm.xlu1 %3558, %v4070_v54   ;;  %1443 = vperm.xlu0 %3557, %v4065_v53   ;;  %v321_v60 = vadd.s32 8, %v4753_v16  ;;  %v322_v25 = vcvt.s32.f32 %v4753_v16  ;;  %v4819_v44 = vsub.s32 0, %v4753_v16  ;;  %v4915_v36 = vsub.s32 2, %v4753_v16 }
 0x179   : > { %v4686_v55 = vpop.permute.xlu1 %1049  ;;  %v4688_v40 = vpop.permute.xlu0 %1044 }
 0x17a   : > { %6702 = vst [vmem:[#allocation150_spill] sm:$0xff] %v4686_v55  ;;  %6703 = vst [vmem:[#allocation151_spill] sm:$0xff] %v4688_v40  ;;  %v6732_v55 = vld [vmem:[#allocation23_spill] sm:$0xff] }
 0x17b   : > { %1375 = vperm.xlu1 %3558, %v3974_v38   ;;  %1379 = vperm.xlu0 %3557, %v3969_v37   ;;  %v458_v38 = vand.u32 127, %v319_v21  ;;  %v6771_v21 = vld [vmem:[#allocation71_spill] sm:$0xff] }
 0x17d   : > { %v4692_v39 = vpop.permute.xlu1 %1059  ;;  %v4694_v22 = vpop.permute.xlu0 %1054 }
 0x17e   : > { %6704 = vst [vmem:[#allocation152_spill] sm:$0xff] %v4692_v39  ;;  %6705 = vst [vmem:[#allocation153_spill] sm:$0xff] %v4694_v22  ;;  %v6792_v22 = vld [vmem:[#allocation95_spill] sm:$0xff] }
 0x17f   : > { %1303 = vperm.xlu1 %3558, %v3866_v20   ;;  %1307 = vperm.xlu0 %3557, %v3861_v19   ;;  %v4710_v20 = vcvt.s32.f32 %v458_v38  ;;  %v6720_v38 = vld [vmem:[#allocation13_spill] sm:$0xff] }
 0x181   : > { %v4698_v54 = vpop.permute.xlu1 %1069  ;;  %v4700_v53 = vpop.permute.xlu0 %1064 }
 0x182   : > { %6706 = vst [vmem:[#allocation154_spill] sm:$0xff] %v4698_v54  ;;  %6707 = vst [vmem:[#allocation155_spill] sm:$0xff] %v4700_v53  ;;  %v6789_v54 = vld [vmem:[#allocation92_spill] sm:$0xff] }
 0x183   : > { %1431 = vperm.xlu1 %3558, %v4058_v52   ;;  %1435 = vperm.xlu0 %3557, %v4053_v51   ;;  %v6715_v52 = vld [vmem:[#allocation5_spill] sm:$0xff]  ;;  %v4719_v51 = vadd.f32 1.0, %v4710_v20 }
 0x185   : > { %v4704_v24 = vpop.permute.xlu1 %1079  ;;  %v4706_v37 = vpop.permute.xlu0 %1074  ;;  %v1132_v13 = vmin.f32 %v6755_v3, %v4719_v51 }
 0x186   : > { %6708 = vst [vmem:[#allocation156_spill] sm:$0xff] %v4704_v24  ;;  %6709 = vst [vmem:[#allocation157_spill] sm:$0xff] %v4706_v37  ;;  %v323_v37 = vcvt.s32.f32 %v321_v60  ;;  %v324_v24 = vstv %s317_s28  ;;  %v4812_v60 = vld [vmem:[%s6331_s0 + $0x8] sm:$0xff] }
 0x187   : > { %1367 = vperm.xlu1 %3558, %v6710_v41   ;;  %1371 = vperm.xlu0 %3557, %v6711_v27   ;;  %v6718_v41 = vld [vmem:[#allocation12_spill] sm:$0xff]  ;;  %v6719_v27 = vld [vmem:[#allocation11_spill] sm:$0xff]  ;;  %v4814_v4 = vadd.f32 %v324_v24, %v322_v25  ;;  %v6781_v25 = vld [vmem:[#allocation78_spill] sm:$0xff] }
 0x188   : > { %v4816_v2 = vadd.f32 %v324_v24, %v323_v37 }
 0x189   : > { %v4712_v19 = vpop.permute.xlu1 %1089  ;;  %v4714_v56 = vpop.permute.xlu0 %1084  ;;  %v4836_v30 = vadd.f32 1.0, %v4814_v4 }
 0x18a   : > { %6712 = vst [vmem:[#allocation10_spill] sm:$0xff] %v4712_v19  ;;  %6713 = vst [vmem:[#allocation9_spill] sm:$0xff] %v4714_v56  ;;  %v6750_v19 = vld [vmem:[#allocation45_spill] sm:$0xff]  ;;  %v6751_v56 = vld [vmem:[#allocation46_spill] sm:$0xff] }
 0x18b   : > { %1295 = vperm.xlu1 %3558, %v6714_v23   ;;  %1299 = vperm.xlu0 %3557, %v6715_v52   ;;  %v6722_v23 = vld [vmem:[#allocation15_spill] sm:$0xff] }
 0x18c   : > { %v6734_v52 = vld [vmem:[#allocation27_spill] sm:$0xff] }
 0x18d   : > { %v4721_v28 = vpop.permute.xlu1 %1099  ;;  %v4723_v45 = vpop.permute.xlu0 %1094 }
 0x18e   : > { %6716 = vst [vmem:[#allocation6_spill] sm:$0xff] %v4721_v28  ;;  %6717 = vst [vmem:[#allocation5_spill] sm:$0xff] %v4723_v45 }
 0x18f   : > { %1423 = vperm.xlu1 %3558, %v6718_v41   ;;  %1427 = vperm.xlu0 %3557, %v6719_v27   ;;  %v6731_v41 = vld [vmem:[#allocation7_spill] sm:$0xff]  ;;  %v6782_v27 = vld [vmem:[#allocation77_spill] sm:$0xff] }
 0x192   : > { %v4741_v46 = vpop.permute.xlu1 %1235  ;;  %v4743_v40 = vpop.permute.xlu0 %1231 }
 0x193   : > { %1359 = vperm.xlu1 %3558, %v6730_v15   ;;  %1363 = vperm.xlu0 %3557, %v6731_v41   ;;  %v6737_v15 = vld [vmem:[#allocation32_spill] sm:$0xff]  ;;  %v1742_v37 = vmax.f32 %v4743_v40, %v4710_v20 }
 0x196   : > { %v4779_v53 = vpop.permute.xlu1 %1239  ;;  %v4781_v41 = vpop.permute.xlu0 %1243 }
 0x197   : > { %1607 = vperm.xlu1 %3558, %v6746_v48   ;;  %1611 = vperm.xlu0 %3557, %v6747_v43   ;;  %v4801_v48 = vsub.s32 1, %v4753_v16  ;;  %v6752_v43 = vld [vmem:[#allocation49_spill] sm:$0xff]  ;;  %v6794_v16 = vld [vmem:[#allocation99_spill] sm:$0xff] }
 0x199   : > { %v336_v24 = vrot.slane %v4812_v60, %v4801_v48 }
 0x19a   : > { %v4805_v26 = vpop.permute.xlu1 %1247  ;;  %v4807_v9 = vpop.permute.xlu0 %1251 }
 0x19b   : > { %1543 = vperm.xlu1 %3558, %v6756_v14   ;;  %1547 = vperm.xlu0 %3557, %v6757_v1   ;;  %v4843_v1 = vadd.f32 1.0, %v4816_v2  ;;  %v384_v14 = vrot.slane %v4812_v60, %v4819_v44  ;;  %v362_v3 = vmin.f32 %v336_v24, %v4836_v30 }
 0x19d   : > { %v370_v34 = vmin.f32 %v336_v24, %v4843_v1  ;;  %v410_v18 = vmax.f32 %v384_v14, %v4814_v4  ;;  %v418_v6 = vmax.f32 %v384_v14, %v4816_v2  ;;  %v6793_v14 = vld [vmem:[#allocation96_spill] sm:$0xff] }
 0x19e   : > { %v4853_v49 = vpop.permute.xlu1 %1255  ;;  %v4855_v39 = vpop.permute.xlu0 %1259 }
 0x19f   : > { %6766 = vst [vmem:[#allocation12_spill] sm:$0xff] %v4855_v39  ;;  %1735 = vperm.xlu1 %3558, %v4528_v33   ;;  %1739 = vperm.xlu0 %3557, %v4523_v35   ;;  %v426_v39 = vsub.f32 %v362_v3, %v410_v18  ;;  %v1165_v35 = vmin.f32 %v6794_v16, %v4719_v51 }
 0x1a1   : > { %v442_v0 = vmax.f32 %v426_v39, 0.0 }
 0x1a2   : > { %v4885_v47 = vpop.permute.xlu1 %1263  ;;  %v1352_v7 = vpop.permute.xlu0 %1351 }
 0x1a3   : > { %6778 = vst [vmem:[#allocation11_spill] sm:$0xff] %v4885_v47  ;;  %v1772_v24 = vmax.f32 %v1352_v7, %v4710_v20  ;;  %1671 = vperm.xlu1 %3558, %v6781_v25   ;;  %1675 = vperm.xlu0 %3557, %v6782_v27   ;;  %v1743_v25 = vmax.f32 %v4741_v46, %v4710_v20 }
 0x1a4   : > { %v434_v27 = vsub.f32 %v370_v34, %v418_v6  ;;  %v6790_v34 = vld [vmem:[#allocation52_spill] sm:$0xff]  ;;  %v6791_v6 = vld [vmem:[#allocation51_spill] sm:$0xff] }
 0x1a5   : > { %v1900_v42 = vsub.f32 %v1132_v13, %v1772_v24  ;;  %v6795_v13 = vmin.f32 %v6723_v31, %v4719_v51  ;;  %v6799_v31 = vmin.f32 %v6737_v15, %v4719_v51 }
 0x1a6   : > { %v1356_v18 = vpop.permute.xlu1 %1355  ;;  %v1288_v3 = vpop.permute.xlu0 %1287  ;;  %v450_v33 = vmax.f32 %v434_v27, 0.0  ;;  %v6798_v27 = vmin.f32 %v6721_v10, %v4719_v51  ;;  %v6807_v10 = vld [vmem:[#allocation98_spill] sm:$0xff] }
 0x1a7   : > { %v1773_v7 = vmax.f32 %v1356_v18, %v4710_v20  ;;  %v1756_v46 = vmax.f32 %v1288_v3, %v4710_v20  ;;  %1599 = vperm.xlu1 %3558, %v6790_v34   ;;  %1603 = vperm.xlu0 %3557, %v6791_v6   ;;  %v4930_v24 = vsub.f32 %v6795_v13, %v1743_v25  ;;  %v6797_v6 = vld [vmem:[#allocation100_spill] sm:$0xff]  ;;  %v2028_v39 = vmax.f32 %v1900_v42, 0.0 }
 0x1a8   : > { %v6796_v18 = vmin.f32 %v6754_v58, %v4719_v51  ;;  %v2133_v34 = vrot.slane %v4812_v60, %v4915_v36  ;;  %v1164_v47 = vmin.f32 %v6797_v6, %v4719_v51  ;;  %v4944_v16 = vsub.f32 %v6798_v27, %v1742_v37  ;;  %v6801_v6 = vld [vmem:[#allocation29_spill] sm:$0xff]  ;;  %v4979_v60 = vld [vmem:[%s6331_s0 + $0x18] sm:$0xff] }
 0x1a9   : > { %v1884_v25 = vsub.f32 %v6799_v31, %v1756_v46 }
 0x1aa   : > { %v1901_v3 = vsub.f32 %v6796_v18, %v1773_v7  ;;  %v1292_v58 = vpop.permute.xlu1 %1291  ;;  %v1480_v7 = vpop.permute.xlu0 %1479  ;;  %v6800_v18 = vld [vmem:[#allocation30_spill] sm:$0xff]  ;;  %v4957_v15 = vmul.f32 %v2133_v34, %v442_v0  ;;  %v4959_v46 = vmul.f32 %v2133_v34, %v450_v33 }
 0x1ab   : > { %v1757_v13 = vmax.f32 %v1292_v58, %v4710_v20  ;;  %1535 = vperm.xlu1 %3558, %v6800_v18   ;;  %1539 = vperm.xlu0 %3557, %v6801_v6   ;;  %v1804_v37 = vmax.f32 %v1480_v7, %v4710_v20  ;;  %v6804_v58 = vmin.f32 %v6736_v12, %v4719_v51  ;;  %v2012_v0 = vmax.f32 %v1884_v25, 0.0 }
 0x1ac   : > { %v2029_v40 = vmax.f32 %v1901_v3, 0.0  ;;  %6802 = vst [vmem:[#allocation13_spill] sm:$0xff] %v4957_v15  ;;  %6803 = vst [vmem:[#allocation14_spill] sm:$0xff] %v4959_v46  ;;  %v1744_v7 = vmax.f32 %v4779_v53, %v4710_v20  ;;  %v4974_v34 = vpack.c.bf16 %v4959_v46, %v4957_v15  ;;  %v6808_v53 = vld [vmem:[#allocation97_spill] sm:$0xff]  ;;  %v6811_v15 = vmax.f32 %v4930_v24, 0.0 }
 0x1ad   : > { %v1885_v18 = vsub.f32 %v6804_v58, %v1757_v13  ;;  %v1932_v3 = vsub.f32 %v1164_v47, %v1804_v37  ;;  %v1745_v47 = vmax.f32 %v4781_v41, %v4710_v20  ;;  %v6813_v37 = vmin.f32 %v6774_v57, %v4719_v51  ;;  %v6816_v41 = vld [vmem:[#allocation73_spill] sm:$0xff] }
 0x1ae   : > { %v4967_v42 = vpack.c.bf16 %v2029_v40, %v2028_v39  ;;  %v1484_v6 = vpop.permute.xlu1 %1483  ;;  %v1416_v33 = vpop.permute.xlu0 %1415  ;;  %6806 = vst [vmem:[#allocation16_spill] sm:$0xff] %v4974_v34  ;;  %2638 = vmatprep.mubr.bf16.mxu0 %v4974_v34 }
 0x1af   : > { %v2013_v12 = vmax.f32 %v1885_v18, 0.0  ;;  %v1805_v13 = vmax.f32 %v1484_v6, %v4710_v20  ;;  %v1788_v58 = vmax.f32 %v1416_v33, %v4710_v20  ;;  %1727 = vperm.xlu1 %3558, %v6807_v10   ;;  %1731 = vperm.xlu0 %3557, %v6808_v53   ;;  %v344_v10 = vrot.slane %v4979_v60, %v4801_v48 }
 0x1b0   : > { %6805 = vst [vmem:[#allocation15_spill] sm:$0xff] %v4967_v42  ;;  %v2316_v25 = vunpack.c.l.bf16 %v4967_v42  ;;  %v2317_v46 = vunpack.c.h.bf16 %v4967_v42  ;;  %v6810_v53 = vmax.f32 %v4944_v16, 0.0  ;;  %v2060_v28 = vmax.f32 %v1932_v3, 0.0 }
 0x1b1   : > { %v4992_v18 = vpack.c.bf16 %v2013_v12, %v2012_v0  ;;  %v1933_v6 = vsub.f32 %v1165_v35, %v1805_v13  ;;  %v5007_v31 = vsub.f32 %v6813_v37, %v1788_v58  ;;  %v6814_v13 = vmin.f32 %v6720_v38, %v4719_v51 }
 0x1b2   : > { %v2444_v33 = vsub.f32 %v2028_v39, %v2316_v25  ;;  %v5000_v27 = vpack.c.bf16 %v6811_v15, %v6810_v53  ;;  %v1420_v34 = vpop.permute.xlu1 %1419  ;;  %v1344_v35 = vpop.permute.xlu0 %1343  ;;  %v2445_v39 = vsub.f32 %v2029_v40, %v2317_v46  ;;  %v6815_v53 = vld [vmem:[#allocation74_spill] sm:$0xff]  ;;  %v6817_v38 = vmin.f32 %v6773_v63, %v4719_v51 }
 0x1b3   : > { %6809 = vst [vmem:[#allocation17_spill] sm:$0xff] %v4992_v18  ;;  %v5012_v25 = vsub.f32 %v6814_v13, %v1744_v7  ;;  %v1789_v42 = vmax.f32 %v1420_v34, %v4710_v20  ;;  %v1770_v15 = vmax.f32 %v1344_v35, %v4710_v20  ;;  %1663 = vperm.xlu1 %3558, %v6815_v53   ;;  %v2300_v57 = vunpack.c.l.bf16 %v4992_v18 }
 0x1b4   : > { %6812 = vst [vmem:[#allocation18_spill] sm:$0xff] %v5000_v27  ;;  %1667 = vperm.xlu0 %3557, %v6816_v41   ;;  %v2557_v58 = vpack.c.bf16 %v2445_v39, %v2444_v33  ;;  %v2301_v37 = vunpack.c.h.bf16 %v4992_v18  ;;  %v2061_v40 = vmax.f32 %v1933_v6, 0.0  ;;  %v6818_v7 = vmin.f32 %v6753_v29, %v4719_v51 }
 0x1b5   : > { %v1917_v46 = vsub.f32 %v6817_v38, %v1789_v42  ;;  %v2428_v35 = vsub.f32 %v2012_v0, %v2300_v57  ;;  %v364_v13 = vmin.f32 %v344_v10, %v4836_v30  ;;  %v2044_v53 = vmax.f32 %v5007_v31, 0.0  ;;  %v6821_v0 = vld [vmem:[#allocation47_spill] sm:$0xff] }
 0x1b6   : > { %v5026_v34 = vsub.f32 %v6818_v7, %v1770_v15  ;;  %3232 = vmatprep.subr.bf16.mxu0 %v2557_v58  ;;  %v1348_v33 = vpop.permute.xlu1 %1347  ;;  %v1280_v39 = vpop.permute.xlu0 %1279  ;;  %v2429_v41 = vsub.f32 %v2013_v12, %v2301_v37  ;;  %v5030_v3 = vpack.c.bf16 %v2061_v40, %v2060_v28  ;;  %v392_v63 = vrot.slane %v4979_v60, %v4819_v44  ;;  %v6820_v15 = vld [vmem:[#allocation48_spill] sm:$0xff] }
 0x1b7   : > { %v2045_v42 = vmax.f32 %v1917_v46, 0.0  ;;  %v1771_v6 = vmax.f32 %v1348_v33, %v4710_v20  ;;  %v1754_v29 = vmax.f32 %v1280_v39, %v4710_v20  ;;  %1591 = vperm.xlu1 %3558, %v6820_v15   ;;  %v372_v31 = vmin.f32 %v344_v10, %v4843_v1 }
 0x1b8   : > { %6819 = vst [vmem:[#allocation8_spill] sm:$0xff] %v5030_v3  ;;  %1595 = vperm.xlu0 %3557, %v6821_v0   ;;  %v2549_v57 = vpack.c.bf16 %v2429_v41, %v2428_v35  ;;  %v2348_v58 = vunpack.c.l.bf16 %v5030_v3  ;;  %v2349_v12 = vunpack.c.h.bf16 %v5030_v3  ;;  %v412_v37 = vmax.f32 %v392_v63, %v4814_v4 }
 0x1b9   : > { %v5042_v38 = vpack.c.bf16 %v2045_v42, %v2044_v53  ;;  %v2026_v46 = vmax.f32 %v5026_v34, 0.0  ;;  %v6822_v7 = vmin.f32 %v6752_v43, %v4719_v51  ;;  %v420_v39 = vmax.f32 %v392_v63, %v4816_v2  ;;  %v6824_v43 = vld [vmem:[#allocation26_spill] sm:$0xff] }
 0x1ba   : > { %v6823_v10 = vmin.f32 %v6735_v32, %v4719_v51  ;;  %3233 = vmatpush3.bf16.msra.mxu0 %v2549_v57  ;;  %v1284_v41 = vpop.permute.xlu1 %1283  ;;  %v1472_v15 = vpop.permute.xlu0 %1471  ;;  %v2476_v0 = vsub.f32 %v2060_v28, %v2348_v58  ;;  %v2477_v3 = vsub.f32 %v2061_v40, %v2349_v12  ;;  %v428_v18 = vsub.f32 %v364_v13, %v412_v37 }
 0x1bb   : > { %v1899_v33 = vsub.f32 %v6822_v7, %v1771_v6  ;;  %v1755_v34 = vmax.f32 %v1284_v41, %v4710_v20  ;;  %v1802_v5 = vmax.f32 %v1472_v15, %v4710_v20  ;;  %1527 = vperm.xlu1 %3558, %v6824_v43   ;;  %v6825_v6 = vld [vmem:[#allocation25_spill] sm:$0xff]  ;;  %v2141_v32 = vrot.slane %v4979_v60, %v4915_v36 }
 0x1bc   : > { %v5052_v35 = vsub.f32 %v6823_v10, %v1754_v29  ;;  %1531 = vperm.xlu0 %3557, %v6825_v6   ;;  %v2573_v63 = vpack.c.bf16 %v2477_v3, %v2476_v0  ;;  %v2332_v29 = vunpack.c.l.bf16 %v5042_v38  ;;  %v2333_v57 = vunpack.c.h.bf16 %v5042_v38  ;;  %v6829_v0 = vld [vmem:[#allocation94_spill] sm:$0xff] }
 0x1bd   : > { %v2027_v45 = vmax.f32 %v1899_v33, 0.0  ;;  %v436_v28 = vsub.f32 %v372_v31, %v420_v39  ;;  %v6826_v40 = vmin.f32 %v6722_v23, %v4719_v51  ;;  %v6827_v12 = vmin.f32 %v6734_v52, %v4719_v51 }
 0x1be   : > { %v444_v7 = vmax.f32 %v428_v18, 0.0  ;;  %v6828_v60 = vmin.f32 %v6793_v14, %v4719_v51  ;;  %3254 = vmatprep.subr.bf16.mxu1 %v2573_v63  ;;  %v1476_v33 = vpop.permute.xlu1 %1475  ;;  %v1408_v31 = vpop.permute.xlu0 %1407  ;;  %v2460_v39 = vsub.f32 %v2044_v53, %v2332_v29  ;;  %v2461_v10 = vsub.f32 %v2045_v42, %v2333_v57  ;;  %v6830_v18 = vld [vmem:[#allocation93_spill] sm:$0xff] }
 0x1bf   : > { %v5065_v13 = vsub.f32 %v6826_v40, %v1745_v47  ;;  %v5067_v58 = vpack.c.bf16 %v2027_v45, %v2026_v46  ;;  %v1883_v37 = vsub.f32 %v6827_v12, %v1755_v34  ;;  %v452_v23 = vmax.f32 %v436_v28, 0.0  ;;  %1719 = vperm.xlu1 %3558, %v6829_v0  }
 0x1c0   : > { %v5075_v3 = vsub.f32 %v6828_v60, %v1802_v5  ;;  %v2010_v47 = vmax.f32 %v5052_v35, 0.0  ;;  %v1803_v15 = vmax.f32 %v1476_v33, %v4710_v20  ;;  %v1786_v52 = vmax.f32 %v1408_v31, %v4710_v20  ;;  %1723 = vperm.xlu0 %3557, %v6830_v18   ;;  %v6835_v31 = vld [vmem:[#allocation70_spill] sm:$0xff] }
 0x1c1   : > { %v2011_v41 = vmax.f32 %v1883_v37, 0.0  ;;  %v2565_v14 = vpack.c.bf16 %v2461_v10, %v2460_v39  ;;  %v2314_v5 = vunpack.c.l.bf16 %v5067_v58  ;;  %v2315_v34 = vunpack.c.h.bf16 %v5067_v58  ;;  %v6836_v39 = vld [vmem:[#allocation69_spill] sm:$0xff] }
 0x1c2   : > { %v5084_v43 = vmul.f32 %v2141_v32, %v444_v7  ;;  %v6452_v53 = vmax.f32 %v5012_v25, 0.0  ;;  %v6832_v35 = vmin.f32 %v6792_v22, %v4719_v51  ;;  %v5092_v63 = vmul.f32 %v2141_v32, %v452_v23  ;;  %v1412_v28 = vpop.permute.xlu1 %1411  ;;  %v1336_v40 = vpop.permute.xlu0 %1335 }
 0x1c3   : > { %v5087_v42 = vpack.c.bf16 %v2011_v41, %v2010_v47  ;;  %v6451_v29 = vmax.f32 %v5065_v13, 0.0  ;;  %v2058_v57 = vmax.f32 %v5075_v3, 0.0  ;;  %3255 = vmatpush3.bf16.msra.mxu1 %v2565_v14  ;;  %v2442_v12 = vsub.f32 %v2026_v46, %v2314_v5  ;;  %1655 = vperm.xlu1 %3558, %v6835_v31  }
 0x1c4   : > { %6831 = vst [vmem:[#allocation7_spill] sm:$0xff] %v5084_v43  ;;  %v1931_v6 = vsub.f32 %v6832_v35, %v1803_v15  ;;  %6833 = vst [vmem:[#allocation23_spill] sm:$0xff] %v5092_v63  ;;  %v2443_v37 = vsub.f32 %v2027_v45, %v2315_v34  ;;  %v6834_v60 = vmin.f32 %v6772_v17, %v4719_v51  ;;  %1659 = vperm.xlu0 %3557, %v6836_v39  }
 0x1c5   : > { %v1787_v22 = vmax.f32 %v1412_v28, %v4710_v20  ;;  %v1768_v32 = vmax.f32 %v1336_v40, %v4710_v20  ;;  %v2298_v10 = vunpack.c.l.bf16 %v5087_v42  ;;  %v2299_v46 = vunpack.c.h.bf16 %v5087_v42  ;;  %v3560_v40 = vld [vmem:[%s6332_s1 + $0x2c8] sm:$0xff] }
 0x1c6   : > { %v2059_v7 = vmax.f32 %v1931_v6, 0.0  ;;  %v5099_v33 = vsub.f32 %v6834_v60, %v1786_v52  ;;  %v2556_v3 = vpack.c.bf16 %v2443_v37, %v2442_v12  ;;  %v5109_v45 = vpack.c.bf16 %v5092_v63, %v5084_v43  ;;  %v1340_v5 = vpop.permute.xlu1 %1339  ;;  %v1272_v34 = vpop.permute.xlu0 %1271 }
 0x1c7   : > { %v1746_v17 = vmax.f32 %v4805_v26, %v4710_v20  ;;  %v1747_v23 = vmax.f32 %v4807_v9, %v4710_v20  ;;  %v6837_v52 = vmin.f32 %v6771_v21, %v4719_v51  ;;  %v6838_v18 = vmin.f32 %v6751_v56, %v4719_v51  ;;  %v3559_v56 = vld [vmem:[%s6332_s1 + $0x2c0] sm:$0xff] }
 0x1c8   : > { %v5115_v15 = vpack.c.bf16 %v2059_v7, %v2058_v57  ;;  %3234 = vmatprep.subr.bf16.mxu0 %v2556_v3  ;;  %v2426_v35 = vsub.f32 %v2010_v47, %v2298_v10  ;;  %v2427_v6 = vsub.f32 %v2011_v41, %v2299_v46  ;;  %2679 = vmatprep.mubr.bf16.mxu1 %v5109_v45  ;;  %v2042_v26 = vmax.f32 %v5099_v33, 0.0 }
 0x1c9   : > { %v1915_v0 = vsub.f32 %v6837_v52, %v1787_v22  ;;  %v5123_v14 = vsub.f32 %v6838_v18, %v1768_v32  ;;  %v1769_v28 = vmax.f32 %v1340_v5, %v4710_v20  ;;  %v1752_v21 = vmax.f32 %v1272_v34, %v4710_v20  ;;  %1583 = vperm.xlu1 %3558, %v3559_v56  }
 0x1ca   : > { %1587 = vperm.xlu0 %3557, %v3560_v40   ;;  %v2548_v47 = vpack.c.bf16 %v2427_v6, %v2426_v35  ;;  %v2346_v41 = vunpack.c.l.bf16 %v5115_v15  ;;  %v2347_v12 = vunpack.c.h.bf16 %v5115_v15  ;;  %v2286_v37 = vunpack.c.l.bf16 %v5000_v27  ;;  %v1276_v46 = vpop.permute.xlu1 %1275  ;;  %v1464_v52 = vpop.permute.xlu0 %1463 }
 0x1cb   : > { %v2043_v9 = vmax.f32 %v1915_v0, 0.0  ;;  %v5142_v60 = vpack.c.bf16 %v6451_v29, %v6452_v53  ;;  %v6840_v22 = vmin.f32 %v6750_v19, %v4719_v51  ;;  %v2287_v31 = vunpack.c.h.bf16 %v5000_v27 }
 0x1cc   : > { %v6841_v39 = vmin.f32 %v6725_v11, %v4719_v51  ;;  %v2024_v10 = vmax.f32 %v5123_v14, 0.0  ;;  %3235 = vmatpush3.bf16.msra.mxu0 %v2548_v47  ;;  %v2474_v0 = vsub.f32 %v2058_v57, %v2346_v41  ;;  %v2475_v18 = vsub.f32 %v2059_v7, %v2347_v12  ;;  %v3561_v11 = vld [vmem:[%s6332_s1 + $0x240] sm:$0xff]  ;;  %v3562_v57 = vld [vmem:[%s6332_s1 + $0x248] sm:$0xff] }
 0x1cd   : > { %6839 = vst [vmem:[#allocation24_spill] sm:$0xff] %v5142_v60  ;;  %v5144_v33 = vpack.c.bf16 %v2043_v9, %v2042_v26  ;;  %v1897_v32 = vsub.f32 %v6840_v22, %v1769_v28  ;;  %v6842_v34 = vmin.f32 %v6733_v59, %v4719_v51  ;;  %v1753_v35 = vmax.f32 %v1276_v46, %v4710_v20  ;;  %v5172_v59 = vld [vmem:[%s6331_s0] sm:$0xff] }
 0x1ce   : > { %v5153_v3 = vsub.f32 %v6841_v39, %v1746_v17  ;;  %v1800_v6 = vmax.f32 %v1464_v52, %v4710_v20  ;;  %1519 = vperm.xlu1 %3558, %v3561_v11   ;;  %1523 = vperm.xlu0 %3557, %v3562_v57   ;;  %v6843_v7 = vmin.f32 %v6724_v50, %v4719_v51  ;;  %v6845_v41 = vmax.f32 %v4944_v16, 0.0  ;;  %v1468_v39 = vpop.permute.xlu1 %1467  ;;  %v1400_v46 = vpop.permute.xlu0 %1399  ;;  %v6850_v57 = vld [vmem:[#allocation91_spill] sm:$0xff] }
 0x1cf   : > { %v2025_v5 = vmax.f32 %v1897_v32, 0.0  ;;  %v5159_v19 = vsub.f32 %v6842_v34, %v1752_v21  ;;  %v2572_v14 = vpack.c.bf16 %v2475_v18, %v2474_v0  ;;  %v2330_v28 = vunpack.c.l.bf16 %v5144_v33  ;;  %v6848_v18 = vld [vmem:[#allocation90_spill] sm:$0xff] }
 0x1d0   : > { %v5177_v17 = vsub.f32 %v6843_v7, %v1747_v23  ;;  %v2331_v21 = vunpack.c.h.bf16 %v5144_v33  ;;  %v6844_v40 = vmin.f32 %v6732_v55, %v4719_v51  ;;  %v5188_v12 = vsub.f32 %v6845_v41, %v2286_v37 }
 0x1d1   : > { %v5181_v56 = vpack.c.bf16 %v2025_v5, %v2024_v10  ;;  %v6846_v22 = vmax.f32 %v4930_v24, 0.0  ;;  %v6847_v23 = vmin.f32 %v6789_v54, %v4719_v51  ;;  %3256 = vmatprep.subr.bf16.mxu1 %v2572_v14  ;;  %v2458_v52 = vsub.f32 %v2042_v26, %v2330_v28  ;;  %v6849_v54 = vld [vmem:[#allocation89_spill] sm:$0xff]  ;;  %v6852_v28 = vld [vmem:[#allocation12_spill] sm:$0xff] }
 0x1d2   : > { %v1881_v47 = vsub.f32 %v6844_v40, %v1753_v35  ;;  %v2459_v0 = vsub.f32 %v2043_v9, %v2331_v21  ;;  %v5201_v55 = vrot.slane %v5172_v59, %v4801_v48  ;;  %v2008_v16 = vmax.f32 %v5159_v19, 0.0  ;;  %1711 = vperm.xlu1 %3558, %v6848_v18   ;;  %1715 = vperm.xlu0 %3557, %v6849_v54   ;;  %v1328_v41 = vpop.permute.xlu0 %1327  ;;  %v3563_v18 = vld [vmem:[%s6332_s1 + $0x340] sm:$0xff] }
 0x1d3   : > { %v5192_v50 = vsub.f32 %v6846_v22, %v2287_v31  ;;  %v5197_v32 = vsub.f32 %v6847_v23, %v1800_v6  ;;  %v1801_v24 = vmax.f32 %v1468_v39, %v4710_v20  ;;  %v1784_v31 = vmax.f32 %v1400_v46, %v4710_v20  ;;  %v6853_v46 = vld [vmem:[#allocation68_spill] sm:$0xff] }
 0x1d4   : > { %v2009_v37 = vmax.f32 %v1881_v47, 0.0  ;;  %v6450_v34 = vmax.f32 %v5153_v3, 0.0  ;;  %v2564_v35 = vpack.c.bf16 %v2459_v0, %v2458_v52  ;;  %v2312_v26 = vunpack.c.l.bf16 %v5181_v56  ;;  %v1404_v47 = vpop.permute.xlu1 %1403 }
 0x1d5   : > { %v2313_v9 = vunpack.c.h.bf16 %v5181_v56  ;;  %v6449_v6 = vmax.f32 %v5177_v17, 0.0  ;;  %v1748_v19 = vmax.f32 %v4853_v49, %v4710_v20  ;;  %v6851_v7 = vmin.f32 %v6850_v57, %v4719_v51 }
 0x1d6   : > { %v5214_v11 = vpack.c.bf16 %v2009_v37, %v2008_v16  ;;  %v1749_v21 = vmax.f32 %v6852_v28, %v4710_v20  ;;  %v2056_v40 = vmax.f32 %v5197_v32, 0.0  ;;  %3257 = vmatpush3.bf16.msra.mxu1 %v2564_v35  ;;  %v2440_v22 = vsub.f32 %v2024_v10, %v2312_v26  ;;  %1647 = vperm.xlu1 %3558, %v3563_v18   ;;  %v3564_v10 = vld [vmem:[%s6332_s1 + $0x348] sm:$0xff] }
 0x1d7   : > { %v1929_v14 = vsub.f32 %v6851_v7, %v1801_v24  ;;  %v2441_v23 = vsub.f32 %v2025_v5, %v2313_v9  ;;  %v6854_v49 = vmin.f32 %v6853_v46, %v4719_v51  ;;  %v1785_v0 = vmax.f32 %v1404_v47, %v4710_v20  ;;  %1651 = vperm.xlu0 %3557, %v3564_v10   ;;  %v6855_v5 = vld [vmem:[#allocation11_spill] sm:$0xff] }
 0x1d8   : > { %v1766_v24 = vmax.f32 %v1328_v41, %v4710_v20  ;;  %v1750_v32 = vmax.f32 %v6855_v5, %v4710_v20  ;;  %v2297_v35 = vunpack.c.h.bf16 %v5214_v11  ;;  %v6856_v9 = vld [vmem:[#allocation67_spill] sm:$0xff]  ;;  %v5250_v47 = vpack.c.bf16 %v6449_v6, %v6450_v34  ;;  %v6859_v41 = vld [vmem:[#allocation44_spill] sm:$0xff]  ;;  %v1332_v46 = vpop.permute.xlu1 %1331 }
 0x1d9   : > { %v2057_v39 = vmax.f32 %v1929_v14, 0.0  ;;  %v5225_v52 = vsub.f32 %v6854_v49, %v1784_v31  ;;  %v2555_v54 = vpack.c.bf16 %v2441_v23, %v2440_v22  ;;  %v2296_v31 = vunpack.c.l.bf16 %v5214_v11  ;;  %v1268_v49 = vpop.permute.xlu0 %1267  ;;  %v3565_v6 = vld [vmem:[%s6332_s1 + $0x2b0] sm:$0xff] }
 0x1da   : > { %v6857_v57 = vmin.f32 %v6856_v9, %v4719_v51  ;;  %6858 = vst [vmem:[#allocation27_spill] sm:$0xff] %v5250_v47  ;;  %v6860_v22 = vmin.f32 %v6859_v41, %v4719_v51  ;;  %1575 = vperm.xlu1 %3558, %v3565_v6   ;;  %v6866_v34 = vld [vmem:[#allocation43_spill] sm:$0xff]  ;;  %v6885_v27 = vmax.f32 %v5012_v25, 0.0  ;;  %v3573_v25 = vld [vmem:[%s6332_s1 + $0x2a0] sm:$0xff] }
 0x1db   : > { %v5239_v26 = vpack.c.bf16 %v2057_v39, %v2056_v40  ;;  %3236 = vmatprep.subr.bf16.mxu0 %v2555_v54  ;;  %v2424_v18 = vsub.f32 %v2008_v16, %v2296_v31  ;;  %v2040_v5 = vmax.f32 %v5225_v52, 0.0  ;;  %v6861_v54 = vld [vmem:[#allocation22_spill] sm:$0xff]  ;;  %v1751_v52 = vmax.f32 %v1268_v49, %v4710_v20 }
 0x1dc   : > { %v1913_v7 = vsub.f32 %v6857_v57, %v1785_v0  ;;  %v5255_v23 = vsub.f32 %v6860_v22, %v1766_v24  ;;  %v2425_v0 = vsub.f32 %v2009_v37, %v2297_v35  ;;  %v1767_v57 = vmax.f32 %v1332_v46, %v4710_v20  ;;  %v3566_v24 = vld [vmem:[%s6332_s1 + $0x2b8] sm:$0xff] }
 0x1dd   : > { %v2345_v10 = vunpack.c.h.bf16 %v5239_v26  ;;  %1579 = vperm.xlu0 %3557, %v3566_v24   ;;  %v6862_v16 = vmin.f32 %v6861_v54, %v4719_v51  ;;  %v2344_v35 = vunpack.c.l.bf16 %v5239_v26  ;;  %v6867_v24 = vmin.f32 %v6866_v34, %v4719_v51  ;;  %v6868_v54 = vld [vmem:[#allocation19_spill] sm:$0xff] }
 0x1de   : > { %v2041_v9 = vmax.f32 %v1913_v7, 0.0  ;;  %v2547_v31 = vpack.c.bf16 %v2425_v0, %v2424_v18  ;;  %v6863_v7 = vld [vmem:[#allocation20_spill] sm:$0xff]  ;;  %v2022_v49 = vmax.f32 %v5255_v23, 0.0  ;;  %v6870_v18 = vld [vmem:[#allocation21_spill] sm:$0xff] }
 0x1df   : > { %v5269_v37 = vsub.f32 %v6862_v16, %v1750_v32  ;;  %v6864_v41 = vmin.f32 %v6863_v7, %v4719_v51  ;;  %v2473_v6 = vsub.f32 %v2057_v39, %v2345_v10  ;;  %v1895_v29 = vsub.f32 %v6867_v24, %v1767_v57  ;;  %v1460_v39 = vpop.permute.xlu0 %1459  ;;  %v3568_v23 = vld [vmem:[%s6332_s1 + $0x238] sm:$0xff] }
 0x1e0   : > { %v5278_v46 = vpack.c.bf16 %v2041_v9, %v2040_v5  ;;  %v6869_v32 = vmin.f32 %v6868_v54, %v4719_v51  ;;  %v6871_v0 = vmin.f32 %v6870_v18, %v4719_v51  ;;  %3237 = vmatpush3.bf16.msra.mxu0 %v2547_v31  ;;  %v2472_v10 = vsub.f32 %v2056_v40, %v2344_v35  ;;  %v6872_v54 = vld [vmem:[#allocation88_spill] sm:$0xff] }
 0x1e1   : > { %v5276_v22 = vsub.f32 %v6864_v41, %v1748_v19  ;;  %v1456_v19 = vpop.permute.xlu1 %1455  ;;  %v2023_v28 = vmax.f32 %v1895_v29, 0.0  ;;  %v1799_v57 = vmax.f32 %v1460_v39, %v4710_v20  ;;  %1515 = vperm.xlu0 %3557, %v3568_v23  }
 0x1e2   : > { %6865 = vst [vmem:[#allocation28_spill] sm:$0xff] %v5278_v46  ;;  %v5286_v16 = vsub.f32 %v6869_v32, %v1749_v21  ;;  %v1879_v7 = vsub.f32 %v6871_v0, %v1751_v52  ;;  %v2329_v41 = vunpack.c.h.bf16 %v5278_v46  ;;  %v1798_v34 = vmax.f32 %v1456_v19, %v4710_v20  ;;  %v3567_v21 = vld [vmem:[%s6332_s1 + $0x230] sm:$0xff] }
 0x1e3   : > { %1511 = vperm.xlu1 %3558, %v3567_v21   ;;  %v2006_v52 = vmax.f32 %v5269_v37, 0.0  ;;  %v2571_v31 = vpack.c.bf16 %v2473_v6, %v2472_v10  ;;  %v2328_v29 = vunpack.c.l.bf16 %v5278_v46  ;;  %v5303_v24 = vpack.c.bf16 %v2023_v28, %v2022_v49  ;;  %v6874_v0 = vld [vmem:[#allocation87_spill] sm:$0xff] }
 0x1e4   : > { %v2007_v40 = vmax.f32 %v1879_v7, 0.0  ;;  %v2457_v35 = vsub.f32 %v2041_v9, %v2329_v41  ;;  %v6873_v32 = vmin.f32 %v6872_v54, %v4719_v51  ;;  %v6875_v19 = vmin.f32 %v6874_v0, %v4719_v51  ;;  %v1396_v7 = vpop.permute.xlu0 %1395  ;;  %v3570_v54 = vld [vmem:[%s6332_s1 + $0x3b8] sm:$0xff] }
 0x1e5   : > { %v6456_v21 = vmax.f32 %v5276_v22, 0.0  ;;  %v6455_v23 = vmax.f32 %v5286_v16, 0.0  ;;  %3258 = vmatprep.subr.bf16.mxu1 %v2571_v31  ;;  %v1392_v6 = vpop.permute.xlu1 %1391  ;;  %v2456_v9 = vsub.f32 %v2040_v5, %v2328_v29  ;;  %v2311_v10 = vunpack.c.h.bf16 %v5303_v24  ;;  %1707 = vperm.xlu0 %3557, %v3570_v54  }
 0x1e6   : > { %v1926_v18 = vsub.f32 %v6873_v32, %v1798_v34  ;;  %v1927_v39 = vsub.f32 %v6875_v19, %v1799_v57  ;;  %v5313_v37 = vpack.c.bf16 %v2007_v40, %v2006_v52  ;;  %v1782_v34 = vmax.f32 %v1392_v6, %v4710_v20  ;;  %v3569_v57 = vld [vmem:[%s6332_s1 + $0x3b0] sm:$0xff]  ;;  %v6876_v19 = vld [vmem:[#allocation66_spill] sm:$0xff] }
 0x1e7   : > { %1703 = vperm.xlu1 %3558, %v3569_v57   ;;  %v1783_v5 = vmax.f32 %v1396_v7, %v4710_v20  ;;  %v2563_v29 = vpack.c.bf16 %v2457_v35, %v2456_v9  ;;  %v2310_v32 = vunpack.c.l.bf16 %v5303_v24  ;;  %v5336_v54 = vpack.c.bf16 %v6455_v23, %v6456_v21  ;;  %v6878_v7 = vld [vmem:[#allocation65_spill] sm:$0xff]  ;;  %v3571_v23 = vld [vmem:[%s6332_s1 + $0x330] sm:$0xff] }
 0x1e8   : > { %v2054_v41 = vmax.f32 %v1926_v18, 0.0  ;;  %v2055_v53 = vmax.f32 %v1927_v39, 0.0  ;;  %v2295_v31 = vunpack.c.h.bf16 %v5313_v37  ;;  %v2439_v18 = vsub.f32 %v2023_v28, %v2311_v10  ;;  %v1324_v10 = vpop.permute.xlu0 %1323 }
 0x1e9   : > { %v6877_v39 = vmin.f32 %v6876_v19, %v4719_v51  ;;  %v2294_v57 = vunpack.c.l.bf16 %v5313_v37  ;;  %v6879_v35 = vmin.f32 %v6878_v7, %v4719_v51  ;;  %3259 = vmatpush3.bf16.msra.mxu1 %v2563_v29  ;;  %v1320_v28 = vpop.permute.xlu1 %1319  ;;  %v2438_v63 = vsub.f32 %v2022_v49, %v2310_v32 }
 0x1ea   : > { %v5326_v0 = vpack.c.bf16 %v2055_v53, %v2054_v41  ;;  %v2423_v14 = vsub.f32 %v2007_v40, %v2295_v31  ;;  %v1765_v43 = vmax.f32 %v1324_v10, %v4710_v20  ;;  %v3572_v40 = vld [vmem:[%s6332_s1 + $0x338] sm:$0xff] }
 0x1eb   : > { %v1910_v6 = vsub.f32 %v6877_v39, %v1782_v34  ;;  %v1911_v9 = vsub.f32 %v6879_v35, %v1783_v5  ;;  %v1764_v39 = vmax.f32 %v1320_v28, %v4710_v20  ;;  %1639 = vperm.xlu1 %3558, %v3571_v23   ;;  %1643 = vperm.xlu0 %3557, %v3572_v40   ;;  %v6882_v28 = vld [vmem:[#allocation41_spill] sm:$0xff]  ;;  %v6884_v23 = vunpack.c.l.bf16 %v5142_v60 }
 0x1ec   : > { %v2343_v19 = vunpack.c.h.bf16 %v5326_v0  ;;  %v2554_v5 = vpack.c.bf16 %v2439_v18, %v2438_v63  ;;  %v2422_v49 = vsub.f32 %v2006_v52, %v2294_v57  ;;  %v2342_v29 = vunpack.c.l.bf16 %v5326_v0 }
 0x1ed   : > { %v2038_v34 = vmax.f32 %v1910_v6, 0.0  ;;  %v2039_v31 = vmax.f32 %v1911_v9, 0.0  ;;  %v6880_v6 = vld [vmem:[#allocation42_spill] sm:$0xff]  ;;  %v6883_v10 = vmin.f32 %v6882_v28, %v4719_v51  ;;  %v5361_v46 = vsub.f32 %v6885_v27, %v6884_v23  ;;  %v1448_v63 = vpop.permute.xlu1 %1447  ;;  %v6891_v28 = vld [vmem:[#allocation85_spill] sm:$0xff] }
 0x1ee   : > { %v2471_v32 = vsub.f32 %v2055_v53, %v2343_v19  ;;  %v6881_v7 = vmin.f32 %v6880_v6, %v4719_v51  ;;  %3238 = vmatprep.subr.bf16.mxu0 %v2554_v5  ;;  %v2546_v52 = vpack.c.bf16 %v2423_v14, %v2422_v49  ;;  %v1452_v53 = vpop.permute.xlu0 %1451  ;;  %v2470_v18 = vsub.f32 %v2054_v41, %v2342_v29  ;;  %v3574_v14 = vld [vmem:[%s6332_s1 + $0x2a8] sm:$0xff] }
 0x1ef   : > { %v1893_v21 = vsub.f32 %v6883_v10, %v1765_v43  ;;  %v5363_v9 = vpack.c.bf16 %v2039_v31, %v2038_v34  ;;  %v6887_v57 = vunpack.c.h.bf16 %v5142_v60  ;;  %v6888_v19 = vmax.f32 %v5065_v13, 0.0  ;;  %1567 = vperm.xlu1 %3558, %v3573_v25   ;;  %1571 = vperm.xlu0 %3557, %v3574_v14   ;;  %v6889_v29 = vld [vmem:[#allocation86_spill] sm:$0xff] }
 0x1f0   : > { %v1892_v35 = vsub.f32 %v6881_v7, %v1764_v39  ;;  %v1796_v6 = vmax.f32 %v1448_v63, %v4710_v20  ;;  %v1797_v27 = vmax.f32 %v1452_v53, %v4710_v20  ;;  %3239 = vmatpush3.bf16.msra.mxu0 %v2546_v52  ;;  %v2570_v41 = vpack.c.bf16 %v2471_v32, %v2470_v18 }
 0x1f1   : > { %6886 = vst [vmem:[#allocation31_spill] sm:$0xff] %v5363_v9  ;;  %v5369_v39 = vsub.f32 %v6888_v19, %v6887_v57  ;;  %v2021_v40 = vmax.f32 %v1893_v21, 0.0  ;;  %v2327_v13 = vunpack.c.h.bf16 %v5363_v9  ;;  %v2326_v21 = vunpack.c.l.bf16 %v5363_v9  ;;  %v1384_v52 = vpop.permute.xlu1 %1383  ;;  %v6898_v9 = vld [vmem:[#allocation63_spill] sm:$0xff] }
 0x1f2   : > { %v2020_v43 = vmax.f32 %v1892_v35, 0.0  ;;  %v2292_v5 = vunpack.c.l.bf16 %v5336_v54  ;;  %v6890_v7 = vmin.f32 %v6889_v29, %v4719_v51  ;;  %v6892_v10 = vmin.f32 %v6891_v28, %v4719_v51  ;;  %3260 = vmatprep.subr.bf16.mxu1 %v2570_v41  ;;  %v1388_v32 = vpop.permute.xlu0 %1387 }
 0x1f3   : > { %v2293_v63 = vunpack.c.h.bf16 %v5336_v54  ;;  %v2455_v53 = vsub.f32 %v2039_v31, %v2327_v13  ;;  %v2454_v18 = vsub.f32 %v2038_v34, %v2326_v21  ;;  %v2290_v57 = vunpack.c.l.bf16 %v5250_v47  ;;  %v3576_v31 = vld [vmem:[%s6332_s1 + $0x228] sm:$0xff] }
 0x1f4   : > { %v5382_v49 = vpack.c.bf16 %v2021_v40, %v2020_v43  ;;  %v1924_v35 = vsub.f32 %v6890_v7, %v1796_v6  ;;  %v1925_v23 = vsub.f32 %v6892_v10, %v1797_v27  ;;  %v2291_v19 = vunpack.c.h.bf16 %v5250_v47  ;;  %v3575_v27 = vld [vmem:[%s6332_s1 + $0x220] sm:$0xff]  ;;  %1507 = vperm.xlu0 %3557, %v3576_v31   ;;  %v6895_v10 = vld [vmem:[#allocation64_spill] sm:$0xff] }
 0x1f5   : > { %v1780_v6 = vmax.f32 %v1384_v52, %v4710_v20  ;;  %1503 = vperm.xlu1 %3558, %v3575_v27   ;;  %v1781_v34 = vmax.f32 %v1388_v32, %v4710_v20  ;;  %v2562_v13 = vpack.c.bf16 %v2455_v53, %v2454_v18  ;;  %v6893_v21 = vmax.f32 %v5276_v22, 0.0  ;;  %v1312_v53 = vpop.permute.xlu1 %1311 }
 0x1f6   : > { %v2309_v25 = vunpack.c.h.bf16 %v5382_v49  ;;  %v2052_v14 = vmax.f32 %v1924_v35, 0.0  ;;  %v2053_v29 = vmax.f32 %v1925_v23, 0.0  ;;  %v2308_v41 = vunpack.c.l.bf16 %v5382_v49  ;;  %v1316_v18 = vpop.permute.xlu0 %1315 }
 0x1f7   : > { %v2420_v7 = vsub.f32 %v6893_v21, %v2292_v5  ;;  %v6896_v23 = vmin.f32 %v6895_v10, %v4719_v51  ;;  %v6897_v27 = vmax.f32 %v5286_v16, 0.0  ;;  %v6899_v31 = vmin.f32 %v6898_v9, %v4719_v51  ;;  %3261 = vmatpush3.bf16.msra.mxu1 %v2562_v13 }
 0x1f8   : > { %v2437_v35 = vsub.f32 %v2021_v40, %v2309_v25  ;;  %v5405_v28 = vpack.c.bf16 %v2053_v29, %v2052_v14  ;;  %v2436_v47 = vsub.f32 %v2020_v43, %v2308_v41  ;;  %v6900_v22 = vmax.f32 %v5153_v3, 0.0  ;;  %v3578_v3 = vld [vmem:[%s6332_s1 + $0x3a8] sm:$0xff]  ;;  %v6902_v41 = vld [vmem:[#allocation40_spill] sm:$0xff] }
 0x1f9   : > { %v1908_v52 = vsub.f32 %v6896_v23, %v1780_v6  ;;  %v2421_v60 = vsub.f32 %v6897_v27, %v2293_v63  ;;  %v1909_v32 = vsub.f32 %v6899_v31, %v1781_v34  ;;  %v6901_v5 = vmax.f32 %v5177_v17, 0.0  ;;  %v3577_v34 = vld [vmem:[%s6332_s1 + $0x3a0] sm:$0xff]  ;;  %1699 = vperm.xlu0 %3557, %v3578_v3   ;;  %v6904_v23 = vld [vmem:[#allocation39_spill] sm:$0xff] }
 0x1fa   : > { %6894 = vst [vmem:[#allocation32_spill] sm:$0xff] %v5405_v28  ;;  %v5417_v40 = vsub.f32 %v6900_v22, %v2290_v57  ;;  %v2341_v6 = vunpack.c.h.bf16 %v5405_v28  ;;  %v1762_v63 = vmax.f32 %v1312_v53, %v4710_v20  ;;  %v1763_v9 = vmax.f32 %v1316_v18, %v4710_v20  ;;  %1695 = vperm.xlu1 %3558, %v3577_v34  }
 0x1fb   : > { %v5421_v25 = vsub.f32 %v6901_v5, %v2291_v19  ;;  %v2036_v16 = vmax.f32 %v1908_v52, 0.0  ;;  %v2037_v17 = vmax.f32 %v1909_v32, 0.0  ;;  %v2553_v43 = vpack.c.bf16 %v2437_v35, %v2436_v47  ;;  %v1440_v32 = vpop.permute.xlu1 %1439  ;;  %v1444_v47 = vpop.permute.xlu0 %1443 }
 0x1fc   : > { %v2340_v57 = vunpack.c.l.bf16 %v5405_v28  ;;  %v380_v19 = vrot.slane %v5172_v59, %v4819_v44  ;;  %v2469_v13 = vsub.f32 %v2053_v29, %v2341_v6  ;;  %v6903_v21 = vmin.f32 %v6902_v41, %v4719_v51 }
 0x1fd   : > { %v6905_v52 = vmin.f32 %v6904_v23, %v4719_v51  ;;  %v2545_v31 = vpack.c.bf16 %v2421_v60, %v2420_v7  ;;  %v5441_v53 = vpack.c.bf16 %v2037_v17, %v2036_v16  ;;  %3240 = vmatprep.subr.bf16.mxu0 %v2553_v43  ;;  %v361_v29 = vmin.f32 %v5201_v55, %v4836_v30  ;;  %v3579_v60 = vld [vmem:[%s6332_s1 + $0x320] sm:$0xff]  ;;  %v3580_v7 = vld [vmem:[%s6332_s1 + $0x328] sm:$0xff] }
 0x1fe   : > { %v1890_v10 = vsub.f32 %v6903_v21, %v1762_v63  ;;  %v2468_v35 = vsub.f32 %v2052_v14, %v2340_v57  ;;  %v1794_v6 = vmax.f32 %v1440_v32, %v4710_v20  ;;  %v1795_v63 = vmax.f32 %v1444_v47, %v4710_v20  ;;  %1631 = vperm.xlu1 %3558, %v3579_v60   ;;  %v6907_v57 = vld [vmem:[#allocation84_spill] sm:$0xff] }
 0x1ff   : > { %v1891_v27 = vsub.f32 %v6905_v52, %v1763_v9  ;;  %6906 = vst [vmem:[#allocation56_spill] sm:$0xff] %v5441_v53  ;;  %3241 = vmatpush3.bf16.msra.mxu0 %v2545_v31  ;;  %v2325_v14 = vunpack.c.h.bf16 %v5441_v53  ;;  %1635 = vperm.xlu0 %3557, %v3580_v7   ;;  %v2324_v34 = vunpack.c.l.bf16 %v5441_v53  ;;  %v409_v3 = vmax.f32 %v380_v19, %v4814_v4  ;;  %v1380_v32 = vpop.permute.xlu0 %1379 }
 0x200   : > { %v2018_v22 = vmax.f32 %v1890_v10, 0.0  ;;  %v2569_v9 = vpack.c.bf16 %v2469_v13, %v2468_v35  ;;  %v6908_v41 = vmin.f32 %v6907_v57, %v4719_v51  ;;  %v6909_v10 = vld [vmem:[#allocation83_spill] sm:$0xff]  ;;  %v1376_v13 = vpop.permute.xlu1 %1375  ;;  %v369_v35 = vmin.f32 %v5201_v55, %v4843_v1 }
 0x201   : > { %v2019_v5 = vmax.f32 %v1891_v27, 0.0  ;;  %v6910_v23 = vmin.f32 %v6909_v10, %v4719_v51  ;;  %v2544_v27 = vpack.c.bf16 %v5421_v25, %v5417_v40  ;;  %v2453_v31 = vsub.f32 %v2037_v17, %v2325_v14  ;;  %v3581_v40 = vld [vmem:[%s6332_s1 + $0x290] sm:$0xff] }
 0x202   : > { %v1922_v21 = vsub.f32 %v6908_v41, %v1794_v6  ;;  %3262 = vmatprep.subr.bf16.mxu1 %v2569_v9  ;;  %v2452_v47 = vsub.f32 %v2036_v16, %v2324_v34  ;;  %v417_v60 = vmax.f32 %v380_v19, %v4816_v2  ;;  %v1778_v41 = vmax.f32 %v1376_v13, %v4710_v20  ;;  %v5479_v25 = vld [vmem:[%s6331_s0 + $0x10] sm:$0xff]  ;;  %v3582_v16 = vld [vmem:[%s6332_s1 + $0x298] sm:$0xff]  ;;  %v6912_v34 = vld [vmem:[#allocation62_spill] sm:$0xff] }
 0x203   : > { %v5458_v43 = vpack.c.bf16 %v2019_v5, %v2018_v22  ;;  %v1923_v52 = vsub.f32 %v6910_v23, %v1795_v63  ;;  %1559 = vperm.xlu1 %3558, %v3581_v40   ;;  %v1779_v55 = vmax.f32 %v1380_v32, %v4710_v20  ;;  %1563 = vperm.xlu0 %3557, %v3582_v16  }
 0x204   : > { %v2050_v6 = vmax.f32 %v1922_v21, 0.0  ;;  %v2561_v17 = vpack.c.bf16 %v2453_v31, %v2452_v47  ;;  %v425_v63 = vsub.f32 %v361_v29, %v409_v3  ;;  %v6913_v21 = vmin.f32 %v6912_v34, %v4719_v51  ;;  %v1304_v31 = vpop.permute.xlu1 %1303  ;;  %v1308_v47 = vpop.permute.xlu0 %1307  ;;  %v6916_v34 = vld [vmem:[#allocation38_spill] sm:$0xff] }
 0x205   : > { %v2307_v7 = vunpack.c.h.bf16 %v5458_v43  ;;  %v2051_v57 = vmax.f32 %v1923_v52, 0.0  ;;  %v2306_v19 = vunpack.c.l.bf16 %v5458_v43  ;;  %v5493_v23 = vrot.slane %v5172_v59, %v4915_v36  ;;  %v6914_v52 = vld [vmem:[#allocation61_spill] sm:$0xff] }
 0x206   : > { %v1906_v10 = vsub.f32 %v6913_v21, %v1778_v41  ;;  %v6915_v13 = vmin.f32 %v6914_v52, %v4719_v51  ;;  %3263 = vmatpush3.bf16.msra.mxu1 %v2561_v17  ;;  %v5498_v29 = vsub.f32 %v369_v35, %v417_v60  ;;  %v1760_v59 = vmax.f32 %v1304_v31, %v4710_v20  ;;  %v6918_v52 = vld [vmem:[#allocation37_spill] sm:$0xff] }
 0x207   : > { %v2435_v14 = vsub.f32 %v2019_v5, %v2307_v7  ;;  %v5486_v9 = vpack.c.bf16 %v2051_v57, %v2050_v6  ;;  %v2434_v40 = vsub.f32 %v2018_v22, %v2306_v19  ;;  %v5502_v5 = vrot.slane %v5479_v25, %v4801_v48  ;;  %v3584_v22 = vld [vmem:[%s6332_s1 + $0x218] sm:$0xff] }
 0x208   : > { %v1907_v32 = vsub.f32 %v6915_v13, %v1779_v55  ;;  %v2034_v7 = vmax.f32 %v1906_v10, 0.0  ;;  %v1761_v41 = vmax.f32 %v1308_v47, %v4710_v20  ;;  %v3583_v55 = vld [vmem:[%s6332_s1 + $0x210] sm:$0xff]  ;;  %1499 = vperm.xlu0 %3557, %v3584_v22   ;;  %v388_v17 = vrot.slane %v5479_v25, %v4819_v44 }
 0x209   : > { %6911 = vst [vmem:[#allocation55_spill] sm:$0xff] %v5486_v9  ;;  %v2339_v3 = vunpack.c.h.bf16 %v5486_v9  ;;  %1495 = vperm.xlu1 %3558, %v3583_v55   ;;  %v2552_v35 = vpack.c.bf16 %v2435_v14, %v2434_v40  ;;  %v2338_v60 = vunpack.c.l.bf16 %v5486_v9  ;;  %v6917_v21 = vmin.f32 %v6916_v34, %v4719_v51  ;;  %v1432_v55 = vpop.permute.xlu1 %1431  ;;  %v1436_v14 = vpop.permute.xlu0 %1435 }
 0x20a   : > { %v2035_v16 = vmax.f32 %v1907_v32, 0.0  ;;  %v6919_v13 = vmin.f32 %v6918_v52, %v4719_v51  ;;  %v441_v31 = vmax.f32 %v425_v63, 0.0  ;;  %v363_v22 = vmin.f32 %v5502_v5, %v4836_v30  ;;  %v3585_v63 = vld [vmem:[%s6332_s1 + $0x390] sm:$0xff] }
 0x20b   : > { %v2467_v19 = vsub.f32 %v2051_v57, %v2339_v3  ;;  %v1888_v10 = vsub.f32 %v6917_v21, %v1760_v59  ;;  %3242 = vmatprep.subr.bf16.mxu0 %v2552_v35  ;;  %v2466_v40 = vsub.f32 %v2050_v6, %v2338_v60  ;;  %v371_v57 = vmin.f32 %v5502_v5, %v4843_v1  ;;  %v3586_v35 = vld [vmem:[%s6332_s1 + $0x398] sm:$0xff] }
 0x20c   : > { %v1889_v32 = vsub.f32 %v6919_v13, %v1761_v41  ;;  %v5522_v47 = vpack.c.bf16 %v2035_v16, %v2034_v7  ;;  %v1792_v59 = vmax.f32 %v1432_v55, %v4710_v20  ;;  %3243 = vmatpush3.bf16.msra.mxu0 %v2544_v27  ;;  %v1793_v41 = vmax.f32 %v1436_v14, %v4710_v20 }
 0x20d   : > { %v2016_v3 = vmax.f32 %v1888_v10, 0.0  ;;  %1687 = vperm.xlu1 %3558, %v3585_v63   ;;  %1691 = vperm.xlu0 %3557, %v3586_v35   ;;  %v2568_v5 = vpack.c.bf16 %v2467_v19, %v2466_v40  ;;  %v411_v21 = vmax.f32 %v388_v17, %v4814_v4  ;;  %v6921_v10 = vld [vmem:[#allocation82_spill] sm:$0xff]  ;;  %v419_v63 = vmax.f32 %v388_v17, %v4816_v2  ;;  %v1368_v35 = vpop.permute.xlu1 %1367  ;;  %v1372_v19 = vpop.permute.xlu0 %1371  ;;  %v3587_v17 = vld [vmem:[%s6332_s1 + $0x310] sm:$0xff] }
 0x20e   : > { %6920 = vst [vmem:[#allocation45_spill] sm:$0xff] %v5522_v47  ;;  %v2017_v34 = vmax.f32 %v1889_v32, 0.0  ;;  %v2323_v6 = vunpack.c.h.bf16 %v5522_v47  ;;  %v2322_v60 = vunpack.c.l.bf16 %v5522_v47  ;;  %v6922_v52 = vmin.f32 %v6921_v10, %v4719_v51  ;;  %v6923_v32 = vld [vmem:[#allocation81_spill] sm:$0xff] }
 0x20f   : > { %v6924_v55 = vmin.f32 %v6923_v32, %v4719_v51  ;;  %3264 = vmatprep.subr.bf16.mxu1 %v2568_v5  ;;  %v449_v47 = vmax.f32 %v5498_v29, 0.0  ;;  %v5550_v9 = vmul.f32 %v5493_v23, %v441_v31  ;;  %v3588_v29 = vld [vmem:[%s6332_s1 + $0x318] sm:$0xff] }
 0x210   : > { %v5539_v27 = vpack.c.bf16 %v2017_v34, %v2016_v3  ;;  %v1920_v13 = vsub.f32 %v6922_v52, %v1792_v59  ;;  %v2451_v18 = vsub.f32 %v2035_v16, %v2323_v6  ;;  %v2450_v40 = vsub.f32 %v2034_v7, %v2322_v60  ;;  %v6927_v60 = vld [vmem:[#allocation60_spill] sm:$0xff] }
 0x211   : > { %v1921_v14 = vsub.f32 %v6924_v55, %v1793_v41  ;;  %6925 = vst [vmem:[#allocation46_spill] sm:$0xff] %v5550_v9  ;;  %v1776_v52 = vmax.f32 %v1368_v35, %v4710_v20  ;;  %1623 = vperm.xlu1 %3558, %v3587_v17   ;;  %v1777_v16 = vmax.f32 %v1372_v19, %v4710_v20  ;;  %v1296_v17 = vpop.permute.xlu1 %1295  ;;  %v1300_v28 = vpop.permute.xlu0 %1299 }
 0x212   : > { %v2305_v53 = vunpack.c.h.bf16 %v5539_v27  ;;  %v2048_v10 = vmax.f32 %v1920_v13, 0.0  ;;  %1627 = vperm.xlu0 %3557, %v3588_v29   ;;  %v2560_v7 = vpack.c.bf16 %v2451_v18, %v2450_v40  ;;  %v2304_v31 = vunpack.c.l.bf16 %v5539_v27 }
 0x213   : > { %v2049_v59 = vmax.f32 %v1921_v14, 0.0  ;;  %v427_v41 = vsub.f32 %v363_v22, %v411_v21  ;;  %v6928_v13 = vmin.f32 %v6927_v60, %v4719_v51  ;;  %v435_v55 = vsub.f32 %v371_v57, %v419_v63  ;;  %v6929_v14 = vld [vmem:[#allocation59_spill] sm:$0xff]  ;;  %v3589_v63 = vld [vmem:[%s6332_s1 + $0x280] sm:$0xff] }
 0x214   : > { %v2433_v6 = vsub.f32 %v2017_v34, %v2305_v53  ;;  %v6930_v35 = vmin.f32 %v6929_v14, %v4719_v51  ;;  %3265 = vmatpush3.bf16.msra.mxu1 %v2560_v7  ;;  %v2432_v29 = vsub.f32 %v2016_v3, %v2304_v31  ;;  %v5571_v18 = vmul.f32 %v5493_v23, %v449_v47  ;;  %v3590_v23 = vld [vmem:[%s6332_s1 + $0x288] sm:$0xff]  ;;  %v6934_v31 = vld [vmem:[#allocation35_spill] sm:$0xff] }
 0x215   : > { %v5562_v5 = vpack.c.bf16 %v2049_v59, %v2048_v10  ;;  %v1904_v32 = vsub.f32 %v6928_v13, %v1776_v52  ;;  %v2137_v53 = vrot.slane %v5479_v25, %v4915_v36  ;;  %v1758_v21 = vmax.f32 %v1296_v17, %v4710_v20  ;;  %1551 = vperm.xlu1 %3558, %v3589_v63   ;;  %v3592_v63 = vld [vmem:[%s6332_s1 + $0x208] sm:$0xff] }
 0x216   : > { %v1905_v19 = vsub.f32 %v6930_v35, %v1777_v16  ;;  %6931 = vst [vmem:[#allocation50_spill] sm:$0xff] %v5571_v18  ;;  %v1759_v57 = vmax.f32 %v1300_v28, %v4710_v20  ;;  %1555 = vperm.xlu0 %3557, %v3590_v23   ;;  %v2551_v47 = vpack.c.bf16 %v2433_v6, %v2432_v29  ;;  %v443_v3 = vmax.f32 %v427_v41, 0.0  ;;  %v6932_v16 = vld [vmem:[#allocation36_spill] sm:$0xff]  ;;  %v1424_v35 = vpop.permute.xlu1 %1423 }
 0x217   : > { %6926 = vst [vmem:[#allocation49_spill] sm:$0xff] %v5562_v5  ;;  %v2337_v22 = vunpack.c.h.bf16 %v5562_v5  ;;  %v2032_v34 = vmax.f32 %v1904_v32, 0.0  ;;  %v2336_v25 = vunpack.c.l.bf16 %v5562_v5  ;;  %v6933_v7 = vmin.f32 %v6932_v16, %v4719_v51 }
 0x218   : > { %v2033_v40 = vmax.f32 %v1905_v19, 0.0  ;;  %v6935_v60 = vmin.f32 %v6934_v31, %v4719_v51  ;;  %v451_v32 = vmax.f32 %v435_v55, 0.0  ;;  %3244 = vmatprep.subr.bf16.mxu0 %v2551_v47  ;;  %v1428_v19 = vpop.permute.xlu0 %1427  ;;  %v6938_v55 = vpack.c.bf16 %v5369_v39, %v5361_v46  ;;  %v6940_v39 = vld [vmem:[#allocation80_spill] sm:$0xff] }
 0x219   : > { %v2465_v52 = vsub.f32 %v2049_v59, %v2337_v22  ;;  %v1886_v28 = vsub.f32 %v6933_v7, %v1758_v21  ;;  %v2464_v17 = vsub.f32 %v2048_v10, %v2336_v25  ;;  %v5597_v59 = vpack.c.bf16 %v5571_v18, %v5550_v9  ;;  %v3591_v10 = vld [vmem:[%s6332_s1 + $0x200] sm:$0xff] }
 0x21a   : > { %v1887_v13 = vsub.f32 %v6935_v60, %v1759_v57  ;;  %v5591_v14 = vpack.c.bf16 %v2033_v40, %v2032_v34  ;;  %v1790_v22 = vmax.f32 %v1424_v35, %v4710_v20  ;;  %3245 = vmatpush3.bf16.msra.mxu0 %v6938_v55  ;;  %v1791_v21 = vmax.f32 %v1428_v19, %v4710_v20 }
 0x21b   : > { %6937 = vst [vmem:[#allocation54_spill] sm:$0xff] %v5597_v59  ;;  %v2014_v41 = vmax.f32 %v1886_v28, 0.0  ;;  %1487 = vperm.xlu1 %3558, %v3591_v10   ;;  %1491 = vperm.xlu0 %3557, %v3592_v63   ;;  %v2567_v23 = vpack.c.bf16 %v2465_v52, %v2464_v17  ;;  %v5612_v25 = vmul.f32 %v2137_v53, %v443_v3  ;;  %v6942_v28 = vld [vmem:[#allocation79_spill] sm:$0xff]  ;;  %v185_v52 = vld [vmem:[%s6331_s0 + $0x28] sm:$0xff]  ;;  %v1360_v3 = vpop.permute.xlu1 %1359 }
 0x21c   : > { %6936 = vst [vmem:[#allocation53_spill] sm:$0xff] %v5591_v14  ;;  %v2015_v29 = vmax.f32 %v1887_v13, 0.0  ;;  %v2321_v57 = vunpack.c.h.bf16 %v5591_v14  ;;  %v2320_v47 = vunpack.c.l.bf16 %v5591_v14  ;;  %v6941_v16 = vmin.f32 %v6940_v39, %v4719_v51  ;;  %v1364_v19 = vpop.permute.xlu0 %1363 }
 0x21d   : > { %6939 = vst [vmem:[#allocation34_spill] sm:$0xff] %v5612_v25  ;;  %v6943_v31 = vmin.f32 %v6942_v28, %v4719_v51  ;;  %v5622_v13 = vmul.f32 %v2137_v53, %v451_v32  ;;  %3266 = vmatprep.subr.bf16.mxu1 %v2567_v23  ;;  %v352_v55 = vrot.slane %v185_v52, %v4801_v48  ;;  %v3593_v32 = vld [vmem:[%s6332_s1 + $0x380] sm:$0xff] }
 0x21e   : > { %v5614_v46 = vpack.c.bf16 %v2015_v29, %v2014_v41  ;;  %v1918_v7 = vsub.f32 %v6941_v16, %v1790_v22  ;;  %v2449_v35 = vsub.f32 %v2033_v40, %v2321_v57  ;;  %v2448_v17 = vsub.f32 %v2032_v34, %v2320_v47  ;;  %v3594_v34 = vld [vmem:[%s6332_s1 + $0x388] sm:$0xff] }
 0x21f   : > { %v1919_v60 = vsub.f32 %v6943_v31, %v1791_v21  ;;  %6944 = vst [vmem:[#allocation33_spill] sm:$0xff] %v5622_v13  ;;  %v400_v10 = vrot.slane %v185_v52, %v4819_v44  ;;  %v1774_v53 = vmax.f32 %v1360_v3, %v4710_v20  ;;  %1679 = vperm.xlu1 %3558, %v3593_v32   ;;  %v6948_v3 = vld [vmem:[#allocation57_spill] sm:$0xff] }
 0x220   : > { %v2303_v22 = vunpack.c.h.bf16 %v5614_v46  ;;  %v2046_v63 = vmax.f32 %v1918_v7, 0.0  ;;  %v1775_v40 = vmax.f32 %v1364_v19, %v4710_v20  ;;  %1683 = vperm.xlu0 %3557, %v3594_v34   ;;  %v2559_v21 = vpack.c.bf16 %v2449_v35, %v2448_v17  ;;  %v6946_v7 = vld [vmem:[#allocation58_spill] sm:$0xff]  ;;  %v1608_v34 = vpop.permute.xlu1 %1607  ;;  %v1612_v35 = vpop.permute.xlu0 %1611 }
 0x221   : > { %v2047_v39 = vmax.f32 %v1919_v60, 0.0  ;;  %v2302_v57 = vunpack.c.l.bf16 %v5614_v46  ;;  %v366_v23 = vmin.f32 %v352_v55, %v4836_v30  ;;  %v6947_v28 = vmin.f32 %v6946_v7, %v4719_v51 }
 0x222   : > { %v2431_v47 = vsub.f32 %v2015_v29, %v2303_v22  ;;  %v374_v60 = vmin.f32 %v352_v55, %v4843_v1  ;;  %v6949_v19 = vmin.f32 %v6948_v3, %v4719_v51  ;;  %3267 = vmatpush3.bf16.msra.mxu1 %v2559_v21  ;;  %v414_v6 = vmax.f32 %v400_v10, %v4814_v4  ;;  %v3595_v55 = vld [vmem:[%s6332_s1 + $0x300] sm:$0xff] }
 0x223   : > { %v5640_v16 = vpack.c.bf16 %v2047_v39, %v2046_v63  ;;  %v1902_v31 = vsub.f32 %v6947_v28, %v1774_v53  ;;  %v2430_v17 = vsub.f32 %v2014_v41, %v2302_v57  ;;  %v422_v29 = vmax.f32 %v400_v10, %v4816_v2  ;;  %1615 = vperm.xlu1 %3558, %v3595_v55   ;;  %v3596_v41 = vld [vmem:[%s6332_s1 + $0x308] sm:$0xff] }
 0x224   : > { %v1903_v32 = vsub.f32 %v6949_v19, %v1775_v40  ;;  %v1836_v7 = vmax.f32 %v1608_v34, %v4710_v20  ;;  %v1837_v53 = vmax.f32 %v1612_v35, %v4710_v20  ;;  %1619 = vperm.xlu0 %3557, %v3596_v41   ;;  %v430_v57 = vsub.f32 %v366_v23, %v414_v6  ;;  %v1544_v55 = vpop.permute.xlu1 %1543  ;;  %v1548_v9 = vpop.permute.xlu0 %1547 }
 0x225   : > { %6945 = vst [vmem:[#allocation71_spill] sm:$0xff] %v5640_v16  ;;  %v2335_v22 = vunpack.c.h.bf16 %v5640_v16  ;;  %v2030_v18 = vmax.f32 %v1902_v31, 0.0  ;;  %v2550_v21 = vpack.c.bf16 %v2431_v47, %v2430_v17  ;;  %v2334_v10 = vunpack.c.l.bf16 %v5640_v16 }
 0x226   : > { %v2031_v40 = vmax.f32 %v1903_v32, 0.0  ;;  %v6950_v31 = vmin.f32 %v4622_v61, %v4719_v51  ;;  %v6951_v19 = vmin.f32 %v4620_v62, %v4719_v51  ;;  %v438_v35 = vsub.f32 %v374_v60, %v422_v29 }
 0x227   : > { %v2463_v28 = vsub.f32 %v2047_v39, %v2335_v22  ;;  %3246 = vmatprep.subr.bf16.mxu0 %v2550_v21  ;;  %v2462_v41 = vsub.f32 %v2046_v63, %v2334_v10  ;;  %v446_v47 = vmax.f32 %v430_v57, 0.0  ;;  %v2149_v17 = vrot.slane %v185_v52, %v4915_v36  ;;  %v6956_v21 = vld [vmem:[#allocation115_spill] sm:$0xff] }
 0x228   : > { %v1964_v3 = vsub.f32 %v6950_v31, %v1836_v7  ;;  %v1965_v34 = vsub.f32 %v6951_v19, %v1837_v53  ;;  %v5667_v32 = vpack.c.bf16 %v2031_v40, %v2030_v18  ;;  %v1820_v23 = vmax.f32 %v1544_v55, %v4710_v20  ;;  %v1740_v31 = vpop.permute.xlu0 %1739 }
 0x229   : > { %v6953_v61 = vpack.c.bf16 %v5192_v50, %v5188_v12  ;;  %v1821_v62 = vmax.f32 %v1548_v9, %v4710_v20  ;;  %v2566_v29 = vpack.c.bf16 %v2463_v28, %v2462_v41  ;;  %v454_v7 = vmax.f32 %v438_v35, 0.0  ;;  %v1736_v9 = vpop.permute.xlu1 %1735 }
 0x22a   : > { %6952 = vst [vmem:[#allocation72_spill] sm:$0xff] %v5667_v32  ;;  %v2092_v6 = vmax.f32 %v1964_v3, 0.0  ;;  %v2093_v39 = vmax.f32 %v1965_v34, 0.0  ;;  %v2319_v60 = vunpack.c.h.bf16 %v5667_v32  ;;  %v2318_v22 = vunpack.c.l.bf16 %v5667_v32 }
 0x22b   : > { %3247 = vmatpush3.bf16.msra.mxu0 %v6953_v61  ;;  %v6955_v52 = vmin.f32 %v4574_v8, %v4719_v51  ;;  %v6957_v10 = vmin.f32 %v6956_v21, %v4719_v51  ;;  %v5685_v12 = vmul.f32 %v2149_v17, %v446_v47  ;;  %3268 = vmatprep.subr.bf16.mxu1 %v2566_v29  ;;  %v6965_v29 = vld [vmem:[#allocation145_spill] sm:$0xff] }
 0x22c   : > { %v5677_v63 = vpack.c.bf16 %v2093_v39, %v2092_v6  ;;  %v2447_v50 = vsub.f32 %v2031_v40, %v2319_v60  ;;  %v2446_v28 = vsub.f32 %v2030_v18, %v2318_v22  ;;  %v5688_v3 = vmul.f32 %v2149_v17, %v454_v7  ;;  %v6962_v17 = vld [vmem:[#allocation5_spill] sm:$0xff]  ;;  %v6966_v7 = vld [vmem:[#allocation6_spill] sm:$0xff] }
 0x22d   : > { %v1948_v53 = vsub.f32 %v6955_v52, %v1820_v23  ;;  %v1949_v57 = vsub.f32 %v6957_v10, %v1821_v62  ;;  %6958 = vst [vmem:[#allocation76_spill] sm:$0xff] %v5685_v12  ;;  %v1868_v35 = vmax.f32 %v1736_v9, %v4710_v20  ;;  %v1869_v55 = vmax.f32 %v1740_v31, %v4710_v20  ;;  %v1672_v21 = vpop.permute.xlu1 %1671 }
 0x22e   : > { %6954 = vst [vmem:[#allocation75_spill] sm:$0xff] %v5677_v63  ;;  %2639 = vmatmul.mubr.bf16.vlgmr.msra.gmra.mxu0 %v5597_v59  ;;  %6959 = vst [vmem:[#allocation78_spill] sm:$0xff] %v5688_v3  ;;  %v2381_v19 = vunpack.c.h.bf16 %v5677_v63  ;;  %v2558_v41 = vpack.c.bf16 %v2447_v50, %v2446_v28  ;;  %v2380_v47 = vunpack.c.l.bf16 %v5677_v63  ;;  %v5696_v40 = vpack.c.bf16 %v5688_v3, %v5685_v12  ;;  %v6968_v28 = vld [vmem:[#allocation144_spill] sm:$0xff] }
 0x22f   : > { %v2076_v34 = vmax.f32 %v1948_v53, 0.0  ;;  %v2077_v8 = vmax.f32 %v1949_v57, 0.0  ;;  %v6963_v61 = vmin.f32 %v6962_v17, %v4719_v51  ;;  %v5705_v60 = vpack.c.bf16 %v5622_v13, %v5612_v25 }
 0x230   : > { %6960 = vst [vmem:[#allocation77_spill] sm:$0xff] %v5696_v40  ;;  %v2509_v18 = vsub.f32 %v2093_v39, %v2381_v19  ;;  %v1212_v22 = vmin.f32 %v6965_v29, %v4719_v51  ;;  %v6967_v52 = vmin.f32 %v6966_v7, %v4719_v51  ;;  %3269 = vmatpush3.bf16.msra.mxu1 %v2558_v41  ;;  %v1676_v39 = vpop.permute.xlu0 %1675  ;;  %v6969_v41 = vld [vmem:[#allocation111_spill] sm:$0xff]  ;;  %v6970_v7 = vld [vmem:[#allocation128_spill] sm:$0xff] }
 0x231   : > { %v5698_v23 = vpack.c.bf16 %v2077_v8, %v2076_v34  ;;  %v1996_v62 = vsub.f32 %v6963_v61, %v1868_v35  ;;  %6964 = vst [vmem:[#allocation52_spill] sm:$0xff] %v5705_v60  ;;  %v2508_v10 = vsub.f32 %v2092_v6, %v2380_v47  ;;  %2720 = vmatprep.mubr.bf16.mxu0 %v5696_v40  ;;  %v6982_v40 = vld [vmem:[#allocation10_spill] sm:$0xff] }
 0x232   : > { %v1997_v53 = vsub.f32 %v6967_v52, %v1869_v55  ;;  %v1852_v31 = vmax.f32 %v1672_v21, %v4710_v20  ;;  %v1213_v19 = vmin.f32 %v6968_v28, %v4719_v51  ;;  %v1853_v17 = vmax.f32 %v1676_v39, %v4710_v20  ;;  %v6971_v52 = vld [vmem:[#allocation129_spill] sm:$0xff]  ;;  %v1600_v39 = vpop.permute.xlu1 %1599 }
 0x233   : > { %6961 = vst [vmem:[#allocation92_spill] sm:$0xff] %v5698_v23  ;;  %v2364_v57 = vunpack.c.l.bf16 %v5698_v23  ;;  %v2365_v50 = vunpack.c.h.bf16 %v5698_v23  ;;  %v2124_v9 = vmax.f32 %v1996_v62, 0.0  ;;  %v2589_v55 = vpack.c.bf16 %v2509_v18, %v2508_v10  ;;  %2680 = vmatmul.mubr.bf16.vlgmr.msra.gmra.mxu1 %v5705_v60 }
 0x234   : > { %v2125_v35 = vmax.f32 %v1997_v53, 0.0  ;;  %v1980_v29 = vsub.f32 %v1212_v22, %v1852_v31  ;;  %v1195_v62 = vmin.f32 %v6970_v7, %v4719_v51  ;;  %v1194_v21 = vmin.f32 %v6971_v52, %v4719_v51  ;;  %v1604_v18 = vpop.permute.xlu0 %1603  ;;  %v6973_v22 = vld [vmem:[#allocation113_spill] sm:$0xff]  ;;  %v6974_v52 = vld [vmem:[#allocation114_spill] sm:$0xff] }
 0x235   : > { %v2492_v6 = vsub.f32 %v2076_v34, %v2364_v57  ;;  %v2493_v47 = vsub.f32 %v2077_v8, %v2365_v50  ;;  %v1981_v53 = vsub.f32 %v1213_v19, %v1853_v17  ;;  %3276 = vmatprep.subr.bf16.mxu0 %v2589_v55  ;;  %v1834_v34 = vmax.f32 %v1600_v39, %v4710_v20  ;;  %v6975_v17 = vld [vmem:[#allocation126_spill] sm:$0xff] }
 0x236   : > { %v5726_v13 = vpack.c.bf16 %v2125_v35, %v2124_v9  ;;  %v2108_v28 = vmax.f32 %v1980_v29, 0.0  ;;  %v1835_v8 = vmax.f32 %v1604_v18, %v4710_v20  ;;  %v1179_v57 = vmin.f32 %v6973_v22, %v4719_v51  ;;  %v6976_v29 = vld [vmem:[#allocation127_spill] sm:$0xff]  ;;  %v1536_v22 = vpop.permute.xlu1 %1535 }
 0x237   : > { %v2581_v10 = vpack.c.bf16 %v2493_v47, %v2492_v6  ;;  %v2109_v31 = vmax.f32 %v1981_v53, 0.0  ;;  %v1178_v19 = vmin.f32 %v6974_v52, %v4719_v51  ;;  %v1962_v6 = vsub.f32 %v1194_v21, %v1834_v34  ;;  %v6978_v21 = vld [vmem:[#allocation142_spill] sm:$0xff] }
 0x238   : > { %6972 = vst [vmem:[#allocation51_spill] sm:$0xff] %v5726_v13  ;;  %v2413_v50 = vunpack.c.h.bf16 %v5726_v13  ;;  %v2412_v7 = vunpack.c.l.bf16 %v5726_v13  ;;  %v1963_v47 = vsub.f32 %v1195_v62, %v1835_v8  ;;  %v1540_v25 = vpop.permute.xlu0 %1539  ;;  %v1818_v60 = vmax.f32 %v1536_v22, %v4710_v20  ;;  %v187_v62 = vld [vmem:[%s6331_s0 + $0x38] sm:$0xff] }
 0x239   : > { %3277 = vmatpush3.bf16.msra.mxu0 %v2581_v10  ;;  %v5740_v61 = vpack.c.bf16 %v2109_v31, %v2108_v28  ;;  %v2090_v3 = vmax.f32 %v1962_v6, 0.0  ;;  %v1819_v52 = vmax.f32 %v1540_v25, %v4710_v20  ;;  %v1211_v10 = vmin.f32 %v6978_v21, %v4719_v51  ;;  %v6981_v25 = vld [vmem:[#allocation9_spill] sm:$0xff] }
 0x23a   : > { %v2541_v18 = vsub.f32 %v2125_v35, %v2413_v50  ;;  %v2540_v53 = vsub.f32 %v2124_v9, %v2412_v7  ;;  %v2091_v12 = vmax.f32 %v1963_v47, 0.0  ;;  %v6979_v9 = vld [vmem:[#allocation143_spill] sm:$0xff]  ;;  %v1946_v6 = vsub.f32 %v1178_v19, %v1818_v60  ;;  %v1728_v13 = vpop.permute.xlu1 %1727 }
 0x23b   : > { %6977 = vst [vmem:[#allocation95_spill] sm:$0xff] %v5740_v61  ;;  %v2396_v35 = vunpack.c.l.bf16 %v5740_v61  ;;  %v2397_v34 = vunpack.c.h.bf16 %v5740_v61  ;;  %v1210_v50 = vmin.f32 %v6979_v9, %v4719_v51  ;;  %v1947_v47 = vsub.f32 %v1179_v57, %v1819_v52 }
 0x23c   : > { %v2605_v8 = vpack.c.bf16 %v2541_v18, %v2540_v53  ;;  %v5753_v7 = vpack.c.bf16 %v2091_v12, %v2090_v3  ;;  %v1226_v22 = vmin.f32 %v6981_v25, %v4719_v51  ;;  %v1732_v21 = vpop.permute.xlu0 %1731  ;;  %v360_v32 = vrot.slane %v187_v62, %v4801_v48 }
 0x23d   : > { %v2524_v55 = vsub.f32 %v2108_v28, %v2396_v35  ;;  %v2525_v39 = vsub.f32 %v2109_v31, %v2397_v34  ;;  %v2074_v18 = vmax.f32 %v1946_v6, 0.0  ;;  %v2075_v53 = vmax.f32 %v1947_v47, 0.0 }
 0x23e   : > { %6980 = vst [vmem:[#allocation96_spill] sm:$0xff] %v5753_v7  ;;  %3298 = vmatprep.subr.bf16.mxu1 %v2605_v8  ;;  %v2379_v61 = vunpack.c.h.bf16 %v5753_v7  ;;  %v1866_v9 = vmax.f32 %v1728_v13, %v4710_v20  ;;  %v1227_v60 = vmin.f32 %v6982_v40, %v4719_v51  ;;  %v1867_v19 = vmax.f32 %v1732_v21, %v4710_v20  ;;  %v1664_v6 = vpop.permute.xlu1 %1663 }
 0x23f   : > { %v2597_v57 = vpack.c.bf16 %v2525_v39, %v2524_v55  ;;  %v2378_v28 = vunpack.c.l.bf16 %v5753_v7  ;;  %v5764_v52 = vpack.c.bf16 %v2075_v53, %v2074_v18  ;;  %v368_v34 = vmin.f32 %v360_v32, %v4836_v30 }
 0x240   : > { %v2507_v31 = vsub.f32 %v2091_v12, %v2379_v61  ;;  %v1994_v35 = vsub.f32 %v1226_v22, %v1866_v9  ;;  %v1995_v8 = vsub.f32 %v1227_v60, %v1867_v19  ;;  %v1668_v47 = vpop.permute.xlu0 %1667  ;;  %v376_v13 = vmin.f32 %v360_v32, %v4843_v1 }
 0x241   : > { %6983 = vst [vmem:[#allocation99_spill] sm:$0xff] %v5764_v52  ;;  %3299 = vmatpush3.bf16.msra.mxu1 %v2597_v57  ;;  %v2506_v25 = vsub.f32 %v2090_v3, %v2378_v28  ;;  %v408_v40 = vrot.slane %v187_v62, %v4819_v44  ;;  %v2362_v55 = vunpack.c.l.bf16 %v5764_v52  ;;  %v2363_v39 = vunpack.c.h.bf16 %v5764_v52 }
 0x242   : > { %v2122_v21 = vmax.f32 %v1994_v35, 0.0  ;;  %v1850_v12 = vmax.f32 %v1664_v6, %v4710_v20  ;;  %v2123_v61 = vmax.f32 %v1995_v8, 0.0  ;;  %v1851_v22 = vmax.f32 %v1668_v47, %v4710_v20  ;;  %v1592_v16 = vpop.permute.xlu1 %1591 }
 0x243   : > { %v2588_v9 = vpack.c.bf16 %v2507_v31, %v2506_v25  ;;  %v416_v60 = vmax.f32 %v408_v40, %v4814_v4  ;;  %v2490_v57 = vsub.f32 %v2074_v18, %v2362_v55  ;;  %v2491_v19 = vsub.f32 %v2075_v53, %v2363_v39 }
 0x244   : > { %v1978_v3 = vsub.f32 %v1210_v50, %v1850_v12  ;;  %v424_v32 = vmax.f32 %v408_v40, %v4816_v2  ;;  %v5775_v28 = vpack.c.bf16 %v2123_v61, %v2122_v21  ;;  %v1979_v7 = vsub.f32 %v1211_v10, %v1851_v22  ;;  %v1596_v52 = vpop.permute.xlu0 %1595  ;;  %v6985_v10 = vld [vmem:[#allocation112_spill] sm:$0xff] }
 0x245   : > { %3278 = vmatprep.subr.bf16.mxu0 %v2588_v9  ;;  %v432_v35 = vsub.f32 %v368_v34, %v416_v60  ;;  %v2157_v6 = vrot.slane %v187_v62, %v4915_v36  ;;  %v2580_v8 = vpack.c.bf16 %v2491_v19, %v2490_v57  ;;  %v1832_v31 = vmax.f32 %v1592_v16, %v4710_v20 }
 0x246   : > { %6984 = vst [vmem:[#allocation100_spill] sm:$0xff] %v5775_v28  ;;  %v2106_v23 = vmax.f32 %v1978_v3, 0.0  ;;  %v1833_v47 = vmax.f32 %v1596_v52, %v4710_v20  ;;  %v2411_v18 = vunpack.c.h.bf16 %v5775_v28  ;;  %v2107_v50 = vmax.f32 %v1979_v7, 0.0  ;;  %v1528_v7 = vpop.permute.xlu1 %1527 }
 0x247   : > { %v2410_v53 = vunpack.c.l.bf16 %v5775_v28  ;;  %v440_v25 = vsub.f32 %v376_v13, %v424_v32  ;;  %v1176_v40 = vmin.f32 %v6985_v10, %v4719_v51  ;;  %v6986_v34 = vmin.f32 %v6976_v29, %v4719_v51  ;;  %3279 = vmatpush3.bf16.msra.mxu0 %v2580_v8 }
 0x248   : > { %v6987_v62 = vmin.f32 %v6975_v17, %v4719_v51  ;;  %v448_v16 = vmax.f32 %v432_v35, 0.0  ;;  %v2539_v52 = vsub.f32 %v2123_v61, %v2411_v18  ;;  %v5790_v12 = vpack.c.bf16 %v2107_v50, %v2106_v23  ;;  %v1532_v22 = vpop.permute.xlu0 %1531  ;;  %v6993_v18 = vld [vmem:[#allocation156_spill] sm:$0xff] }
 0x249   : > { %v1960_v55 = vsub.f32 %v6986_v34, %v1832_v31  ;;  %v2538_v9 = vsub.f32 %v2122_v21, %v2410_v53  ;;  %v456_v13 = vmax.f32 %v440_v25, 0.0  ;;  %v1816_v19 = vmax.f32 %v1528_v7, %v4710_v20  ;;  %v6994_v25 = vld [vmem:[#allocation157_spill] sm:$0xff] }
 0x24a   : > { %v1961_v39 = vsub.f32 %v6987_v62, %v1833_v47  ;;  %6988 = vst [vmem:[#allocation30_spill] sm:$0xff] %v5790_v12  ;;  %v1817_v29 = vmax.f32 %v1532_v22, %v4710_v20  ;;  %v2394_v3 = vunpack.c.l.bf16 %v5790_v12  ;;  %v2395_v17 = vunpack.c.h.bf16 %v5790_v12  ;;  %v1720_v62 = vpop.permute.xlu1 %1719 }
 0x24b   : > { %v2088_v60 = vmax.f32 %v1960_v55, 0.0  ;;  %v2604_v32 = vpack.c.bf16 %v2539_v52, %v2538_v9  ;;  %v5796_v8 = vmul.f32 %v2157_v6, %v448_v16  ;;  %v1944_v35 = vsub.f32 %v1176_v40, %v1816_v19  ;;  %v6997_v19 = vld [vmem:[#allocation141_spill] sm:$0xff] }
 0x24c   : > { %v2089_v57 = vmax.f32 %v1961_v39, 0.0  ;;  %v6991_v21 = vmin.f32 %v6969_v41, %v4719_v51  ;;  %v5803_v47 = vmul.f32 %v2157_v6, %v456_v13  ;;  %v1225_v53 = vmin.f32 %v6993_v18, %v4719_v51  ;;  %v1724_v39 = vpop.permute.xlu0 %1723 }
 0x24d   : > { %6989 = vst [vmem:[#allocation29_spill] sm:$0xff] %v5796_v8  ;;  %v1224_v10 = vmin.f32 %v6994_v25, %v4719_v51  ;;  %v2522_v34 = vsub.f32 %v2106_v23, %v2394_v3  ;;  %v2523_v55 = vsub.f32 %v2107_v50, %v2395_v17  ;;  %3300 = vmatprep.subr.bf16.mxu1 %v2604_v32  ;;  %v2072_v40 = vmax.f32 %v1944_v35, 0.0  ;;  %v6998_v25 = vld [vmem:[#allocation140_spill] sm:$0xff] }
 0x24e   : > { %v5798_v61 = vpack.c.bf16 %v2089_v57, %v2088_v60  ;;  %v1945_v31 = vsub.f32 %v6991_v21, %v1817_v29  ;;  %6992 = vst [vmem:[#allocation97_spill] sm:$0xff] %v5803_v47  ;;  %v1864_v41 = vmax.f32 %v1720_v62, %v4710_v20  ;;  %v1865_v6 = vmax.f32 %v1724_v39, %v4710_v20  ;;  %v1656_v17 = vpop.permute.xlu1 %1655 }
 0x24f   : > { %v2596_v7 = vpack.c.bf16 %v2523_v55, %v2522_v34  ;;  %v5815_v9 = vpack.c.bf16 %v5803_v47, %v5796_v8  ;;  %v1208_v29 = vmin.f32 %v6997_v19, %v4719_v51 }
 0x250   : > { %6990 = vst [vmem:[#allocation98_spill] sm:$0xff] %v5798_v61  ;;  %v2377_v16 = vunpack.c.h.bf16 %v5798_v61  ;;  %v2073_v52 = vmax.f32 %v1945_v31, 0.0  ;;  %v2376_v22 = vunpack.c.l.bf16 %v5798_v61  ;;  %v1992_v13 = vsub.f32 %v1224_v10, %v1864_v41  ;;  %v1660_v32 = vpop.permute.xlu0 %1659 }
 0x251   : > { %6995 = vst [vmem:[#allocation74_spill] sm:$0xff] %v5815_v9  ;;  %v1993_v3 = vsub.f32 %v1225_v53, %v1865_v6  ;;  %3301 = vmatpush3.bf16.msra.mxu1 %v2596_v7  ;;  %2761 = vmatprep.mubr.bf16.mxu1 %v5815_v9  ;;  %v1209_v10 = vmin.f32 %v6998_v25, %v4719_v51  ;;  %v7000_v7 = vld [vmem:[#allocation125_spill] sm:$0xff] }
 0x252   : > { %v2505_v23 = vsub.f32 %v2089_v57, %v2377_v16  ;;  %v5817_v50 = vpack.c.bf16 %v2073_v52, %v2072_v40  ;;  %v2504_v35 = vsub.f32 %v2088_v60, %v2376_v22  ;;  %v2120_v18 = vmax.f32 %v1992_v13, 0.0  ;;  %v6999_v60 = vld [vmem:[#allocation124_spill] sm:$0xff]  ;;  %v1584_v19 = vpop.permute.xlu1 %1583 }
 0x253   : > { %v1848_v57 = vmax.f32 %v1656_v17, %v4710_v20  ;;  %v2121_v34 = vmax.f32 %v1993_v3, 0.0  ;;  %v1849_v55 = vmax.f32 %v1660_v32, %v4710_v20  ;;  %v1191_v41 = vmin.f32 %v6999_v60, %v4719_v51 }
 0x254   : > { %6996 = vst [vmem:[#allocation73_spill] sm:$0xff] %v5817_v50  ;;  %v2360_v21 = vunpack.c.l.bf16 %v5817_v50  ;;  %v2361_v31 = vunpack.c.h.bf16 %v5817_v50  ;;  %v2587_v53 = vpack.c.bf16 %v2505_v23, %v2504_v35  ;;  %v1190_v6 = vmin.f32 %v7000_v7, %v4719_v51  ;;  %v1588_v17 = vpop.permute.xlu0 %1587  ;;  %v7002_v35 = vld [vmem:[#allocation109_spill] sm:$0xff]  ;;  %v7049_v50 = vld [vmem:[#allocation148_spill] sm:$0xff] }
 0x255   : > { %v1976_v16 = vsub.f32 %v1208_v29, %v1848_v57  ;;  %v5832_v22 = vpack.c.bf16 %v2121_v34, %v2120_v18  ;;  %v1977_v13 = vsub.f32 %v1209_v10, %v1849_v55  ;;  %v1830_v32 = vmax.f32 %v1584_v19, %v4710_v20  ;;  %v7003_v10 = vld [vmem:[#allocation110_spill] sm:$0xff] }
 0x256   : > { %v2488_v62 = vsub.f32 %v2072_v40, %v2360_v21  ;;  %v2489_v39 = vsub.f32 %v2073_v52, %v2361_v31  ;;  %3280 = vmatprep.subr.bf16.mxu0 %v2587_v53  ;;  %v1831_v40 = vmax.f32 %v1588_v17, %v4710_v20  ;;  %v1175_v21 = vmin.f32 %v7002_v35, %v4719_v51 }
 0x257   : > { %7001 = vst [vmem:[#allocation48_spill] sm:$0xff] %v5832_v22  ;;  %v2104_v3 = vmax.f32 %v1976_v16, 0.0  ;;  %v2409_v52 = vunpack.c.h.bf16 %v5832_v22  ;;  %v2105_v23 = vmax.f32 %v1977_v13, 0.0  ;;  %v2408_v29 = vunpack.c.l.bf16 %v5832_v22 }
 0x258   : > { %v2579_v25 = vpack.c.bf16 %v2489_v39, %v2488_v62  ;;  %v1958_v31 = vsub.f32 %v1190_v6, %v1830_v32  ;;  %v1959_v57 = vsub.f32 %v1191_v41, %v1831_v40  ;;  %v1174_v55 = vmin.f32 %v7003_v10, %v4719_v51  ;;  %v1520_v39 = vpop.permute.xlu1 %1519  ;;  %v1524_v16 = vpop.permute.xlu0 %1523  ;;  %v7006_v40 = vld [vmem:[#allocation155_spill] sm:$0xff] }
 0x259   : > { %v2537_v53 = vsub.f32 %v2121_v34, %v2409_v52  ;;  %v5842_v62 = vpack.c.bf16 %v2105_v23, %v2104_v3  ;;  %v2536_v60 = vsub.f32 %v2120_v18, %v2408_v29  ;;  %v1814_v13 = vmax.f32 %v1520_v39, %v4710_v20 }
 0x25a   : > { %3281 = vmatpush3.bf16.msra.mxu0 %v2579_v25  ;;  %v2086_v7 = vmax.f32 %v1958_v31, 0.0  ;;  %v2087_v19 = vmax.f32 %v1959_v57, 0.0  ;;  %v1815_v17 = vmax.f32 %v1524_v16, %v4710_v20  ;;  %v1222_v52 = vmin.f32 %v7006_v40, %v4719_v51 }
 0x25b   : > { %7004 = vst [vmem:[#allocation47_spill] sm:$0xff] %v5842_v62  ;;  %v2392_v35 = vunpack.c.l.bf16 %v5842_v62  ;;  %v2393_v41 = vunpack.c.h.bf16 %v5842_v62  ;;  %v2603_v6 = vpack.c.bf16 %v2537_v53, %v2536_v60  ;;  %v1942_v32 = vsub.f32 %v1174_v55, %v1814_v13  ;;  %v7007_v53 = vld [vmem:[#allocation154_spill] sm:$0xff] }
 0x25c   : > { %v5848_v25 = vpack.c.bf16 %v2087_v19, %v2086_v7  ;;  %v1943_v34 = vsub.f32 %v1175_v21, %v1815_v17  ;;  %v1712_v29 = vpop.permute.xlu1 %1711  ;;  %v1716_v31 = vpop.permute.xlu0 %1715  ;;  %v1223_v60 = vmin.f32 %v7007_v53, %v4719_v51  ;;  %v7009_v17 = vld [vmem:[#allocation139_spill] sm:$0xff] }
 0x25d   : > { %v2520_v10 = vsub.f32 %v2104_v3, %v2392_v35  ;;  %v2521_v18 = vsub.f32 %v2105_v23, %v2393_v41  ;;  %3302 = vmatprep.subr.bf16.mxu1 %v2603_v6  ;;  %v2070_v39 = vmax.f32 %v1942_v32, 0.0  ;;  %v1862_v47 = vmax.f32 %v1712_v29, %v4710_v20 }
 0x25e   : > { %7005 = vst [vmem:[#allocation26_spill] sm:$0xff] %v5848_v25  ;;  %v2375_v57 = vunpack.c.h.bf16 %v5848_v25  ;;  %v2071_v16 = vmax.f32 %v1943_v34, 0.0  ;;  %v1863_v21 = vmax.f32 %v1716_v31, %v4710_v20  ;;  %v2374_v55 = vunpack.c.l.bf16 %v5848_v25 }
 0x25f   : > { %v2595_v8 = vpack.c.bf16 %v2521_v18, %v2520_v10  ;;  %v1990_v23 = vsub.f32 %v1222_v52, %v1862_v47  ;;  %v1206_v35 = vmin.f32 %v7009_v17, %v4719_v51 }
 0x260   : > { %v2503_v13 = vsub.f32 %v2087_v19, %v2375_v57  ;;  %v5858_v3 = vpack.c.bf16 %v2071_v16, %v2070_v39  ;;  %v1991_v41 = vsub.f32 %v1223_v60, %v1863_v21  ;;  %v1648_v6 = vpop.permute.xlu1 %1647  ;;  %v1652_v32 = vpop.permute.xlu0 %1651  ;;  %v2502_v34 = vsub.f32 %v2086_v7, %v2374_v55  ;;  %v7010_v19 = vld [vmem:[#allocation138_spill] sm:$0xff]  ;;  %v7012_v55 = vld [vmem:[#allocation123_spill] sm:$0xff] }
 0x261   : > { %3303 = vmatpush3.bf16.msra.mxu1 %v2595_v8  ;;  %v2118_v18 = vmax.f32 %v1990_v23, 0.0  ;;  %v1846_v29 = vmax.f32 %v1648_v6, %v4710_v20  ;;  %v1207_v31 = vmin.f32 %v7010_v19, %v4719_v51  ;;  %v1847_v47 = vmax.f32 %v1652_v32, %v4710_v20  ;;  %v7011_v21 = vld [vmem:[#allocation122_spill] sm:$0xff] }
 0x262   : > { %7008 = vst [vmem:[#allocation25_spill] sm:$0xff] %v5858_v3  ;;  %v2358_v40 = vunpack.c.l.bf16 %v5858_v3  ;;  %v2359_v10 = vunpack.c.h.bf16 %v5858_v3  ;;  %v2119_v57 = vmax.f32 %v1991_v41, 0.0  ;;  %v2586_v52 = vpack.c.bf16 %v2503_v13, %v2502_v34  ;;  %v7014_v34 = vld [vmem:[#allocation107_spill] sm:$0xff] }
 0x263   : > { %v1974_v8 = vsub.f32 %v1206_v35, %v1846_v29  ;;  %v1189_v7 = vmin.f32 %v7011_v21, %v4719_v51  ;;  %v1188_v17 = vmin.f32 %v7012_v55, %v4719_v51  ;;  %v1975_v23 = vsub.f32 %v1207_v31, %v1847_v47  ;;  %v7015_v31 = vld [vmem:[#allocation108_spill] sm:$0xff] }
 0x264   : > { %v2486_v53 = vsub.f32 %v2070_v39, %v2358_v40  ;;  %v2487_v60 = vsub.f32 %v2071_v16, %v2359_v10  ;;  %v5872_v62 = vpack.c.bf16 %v2119_v57, %v2118_v18  ;;  %3282 = vmatprep.subr.bf16.mxu0 %v2586_v52  ;;  %v1576_v6 = vpop.permute.xlu1 %1575  ;;  %v1580_v22 = vpop.permute.xlu0 %1579  ;;  %v1173_v40 = vmin.f32 %v7014_v34, %v4719_v51 }
 0x265   : > { %v2102_v41 = vmax.f32 %v1974_v8, 0.0  ;;  %v1828_v32 = vmax.f32 %v1576_v6, %v4710_v20  ;;  %v1829_v39 = vmax.f32 %v1580_v22, %v4710_v20  ;;  %v2103_v13 = vmax.f32 %v1975_v23, 0.0 }
 0x266   : > { %7013 = vst [vmem:[#allocation94_spill] sm:$0xff] %v5872_v62  ;;  %v2578_v19 = vpack.c.bf16 %v2487_v60, %v2486_v53  ;;  %v2407_v16 = vunpack.c.h.bf16 %v5872_v62  ;;  %v2406_v35 = vunpack.c.l.bf16 %v5872_v62  ;;  %v1172_v47 = vmin.f32 %v7015_v31, %v4719_v51 }
 0x267   : > { %v1956_v10 = vsub.f32 %v1188_v17, %v1828_v32  ;;  %v1957_v29 = vsub.f32 %v1189_v7, %v1829_v39  ;;  %v5882_v53 = vpack.c.bf16 %v2103_v13, %v2102_v41  ;;  %v7018_v39 = vld [vmem:[#allocation153_spill] sm:$0xff] }
 0x268   : > { %3283 = vmatpush3.bf16.msra.mxu0 %v2578_v19  ;;  %v2535_v52 = vsub.f32 %v2119_v57, %v2407_v16  ;;  %v1512_v60 = vpop.permute.xlu1 %1511  ;;  %v1516_v8 = vpop.permute.xlu0 %1515  ;;  %v2534_v22 = vsub.f32 %v2118_v18, %v2406_v35  ;;  %v1220_v16 = vmin.f32 %v7018_v39, %v4719_v51 }
 0x269   : > { %7016 = vst [vmem:[#allocation93_spill] sm:$0xff] %v5882_v53  ;;  %v2084_v21 = vmax.f32 %v1956_v10, 0.0  ;;  %v2085_v55 = vmax.f32 %v1957_v29, 0.0  ;;  %v1812_v23 = vmax.f32 %v1512_v60, %v4710_v20  ;;  %v1813_v6 = vmax.f32 %v1516_v8, %v4710_v20 }
 0x26a   : > { %v2390_v34 = vunpack.c.l.bf16 %v5882_v53  ;;  %v2391_v7 = vunpack.c.h.bf16 %v5882_v53  ;;  %v2602_v17 = vpack.c.bf16 %v2535_v52, %v2534_v22  ;;  %v7019_v52 = vld [vmem:[#allocation152_spill] sm:$0xff] }
 0x26b   : > { %v5888_v19 = vpack.c.bf16 %v2085_v55, %v2084_v21  ;;  %v1940_v32 = vsub.f32 %v1172_v47, %v1812_v23  ;;  %v1941_v57 = vsub.f32 %v1173_v40, %v1813_v6  ;;  %v1221_v22 = vmin.f32 %v7019_v52, %v4719_v51  ;;  %v7021_v6 = vld [vmem:[#allocation137_spill] sm:$0xff] }
 0x26c   : > { %v2518_v31 = vsub.f32 %v2102_v41, %v2390_v34  ;;  %v2519_v18 = vsub.f32 %v2103_v13, %v2391_v7  ;;  %3304 = vmatprep.subr.bf16.mxu1 %v2602_v17  ;;  %v1704_v35 = vpop.permute.xlu1 %1703  ;;  %v1708_v10 = vpop.permute.xlu0 %1707  ;;  %v1204_v34 = vmin.f32 %v7021_v6, %v4719_v51 }
 0x26d   : > { %7017 = vst [vmem:[#allocation70_spill] sm:$0xff] %v5888_v19  ;;  %v2373_v29 = vunpack.c.h.bf16 %v5888_v19  ;;  %v2068_v60 = vmax.f32 %v1940_v32, 0.0  ;;  %v2069_v8 = vmax.f32 %v1941_v57, 0.0  ;;  %v1860_v62 = vmax.f32 %v1704_v35, %v4710_v20 }
 0x26e   : > { %v2594_v53 = vpack.c.bf16 %v2519_v18, %v2518_v31  ;;  %v1861_v40 = vmax.f32 %v1708_v10, %v4710_v20  ;;  %v2372_v47 = vunpack.c.l.bf16 %v5888_v19 }
 0x26f   : > { %v2501_v23 = vsub.f32 %v2085_v55, %v2373_v29  ;;  %v5898_v41 = vpack.c.bf16 %v2069_v8, %v2068_v60  ;;  %v1988_v13 = vsub.f32 %v1220_v16, %v1860_v62  ;;  %v7022_v55 = vld [vmem:[#allocation136_spill] sm:$0xff] }
 0x270   : > { %v1989_v7 = vsub.f32 %v1221_v22, %v1861_v40  ;;  %3305 = vmatpush3.bf16.msra.mxu1 %v2594_v53  ;;  %v1640_v17 = vpop.permute.xlu1 %1639  ;;  %v1644_v32 = vpop.permute.xlu0 %1643  ;;  %v2500_v57 = vsub.f32 %v2084_v21, %v2372_v47  ;;  %v1205_v10 = vmin.f32 %v7022_v55, %v4719_v51  ;;  %v7023_v40 = vld [vmem:[#allocation120_spill] sm:$0xff]  ;;  %v7024_v47 = vld [vmem:[#allocation121_spill] sm:$0xff] }
 0x271   : > { %7020 = vst [vmem:[#allocation69_spill] sm:$0xff] %v5898_v41  ;;  %v2356_v39 = vunpack.c.l.bf16 %v5898_v41  ;;  %v2357_v31 = vunpack.c.h.bf16 %v5898_v41  ;;  %v2116_v18 = vmax.f32 %v1988_v13, 0.0  ;;  %v1844_v35 = vmax.f32 %v1640_v17, %v4710_v20 }
 0x272   : > { %v2117_v29 = vmax.f32 %v1989_v7, 0.0  ;;  %v1845_v62 = vmax.f32 %v1644_v32, %v4710_v20  ;;  %v2585_v16 = vpack.c.bf16 %v2501_v23, %v2500_v57  ;;  %v1187_v21 = vmin.f32 %v7023_v40, %v4719_v51  ;;  %v7026_v57 = vld [vmem:[#allocation105_spill] sm:$0xff] }
 0x273   : > { %v2484_v52 = vsub.f32 %v2068_v60, %v2356_v39  ;;  %v2485_v22 = vsub.f32 %v2069_v8, %v2357_v31  ;;  %v1972_v53 = vsub.f32 %v1204_v34, %v1844_v35  ;;  %v1186_v6 = vmin.f32 %v7024_v47, %v4719_v51 }
 0x274   : > { %v5912_v41 = vpack.c.bf16 %v2117_v29, %v2116_v18  ;;  %v1973_v13 = vsub.f32 %v1205_v10, %v1845_v62  ;;  %3284 = vmatprep.subr.bf16.mxu0 %v2585_v16  ;;  %v1568_v17 = vpop.permute.xlu1 %1567  ;;  %v1572_v19 = vpop.permute.xlu0 %1571  ;;  %v1171_v39 = vmin.f32 %v7026_v57, %v4719_v51  ;;  %v7027_v10 = vld [vmem:[#allocation106_spill] sm:$0xff] }
 0x275   : > { %v2577_v55 = vpack.c.bf16 %v2485_v22, %v2484_v52  ;;  %v2100_v7 = vmax.f32 %v1972_v53, 0.0  ;;  %v1826_v32 = vmax.f32 %v1568_v17, %v4710_v20  ;;  %v1827_v60 = vmax.f32 %v1572_v19, %v4710_v20 }
 0x276   : > { %7025 = vst [vmem:[#allocation90_spill] sm:$0xff] %v5912_v41  ;;  %v2405_v8 = vunpack.c.h.bf16 %v5912_v41  ;;  %v2101_v23 = vmax.f32 %v1973_v13, 0.0  ;;  %v2404_v34 = vunpack.c.l.bf16 %v5912_v41  ;;  %v1170_v62 = vmin.f32 %v7027_v10, %v4719_v51 }
 0x277   : > { %v1954_v31 = vsub.f32 %v1186_v6, %v1826_v32  ;;  %v1955_v35 = vsub.f32 %v1187_v21, %v1827_v60  ;;  %3285 = vmatpush3.bf16.msra.mxu0 %v2577_v55  ;;  %v7030_v60 = vld [vmem:[#allocation151_spill] sm:$0xff] }
 0x278   : > { %v2533_v16 = vsub.f32 %v2117_v29, %v2405_v8  ;;  %v5922_v52 = vpack.c.bf16 %v2101_v23, %v2100_v7  ;;  %v1504_v22 = vpop.permute.xlu1 %1503  ;;  %v1508_v53 = vpop.permute.xlu0 %1507  ;;  %v2532_v19 = vsub.f32 %v2116_v18, %v2404_v34  ;;  %v1218_v8 = vmin.f32 %v7030_v60, %v4719_v51 }
 0x279   : > { %v2082_v40 = vmax.f32 %v1954_v31, 0.0  ;;  %v2083_v47 = vmax.f32 %v1955_v35, 0.0  ;;  %v1810_v13 = vmax.f32 %v1504_v22, %v4710_v20  ;;  %v1811_v17 = vmax.f32 %v1508_v53, %v4710_v20 }
 0x27a   : > { %7028 = vst [vmem:[#allocation89_spill] sm:$0xff] %v5922_v52  ;;  %v2388_v57 = vunpack.c.l.bf16 %v5922_v52  ;;  %v2389_v21 = vunpack.c.h.bf16 %v5922_v52  ;;  %v2601_v6 = vpack.c.bf16 %v2533_v16, %v2532_v19  ;;  %v7031_v16 = vld [vmem:[#allocation150_spill] sm:$0xff] }
 0x27b   : > { %v5928_v55 = vpack.c.bf16 %v2083_v47, %v2082_v40  ;;  %v1938_v32 = vsub.f32 %v1170_v62, %v1810_v13  ;;  %v1939_v29 = vsub.f32 %v1171_v39, %v1811_v17  ;;  %v1219_v19 = vmin.f32 %v7031_v16, %v4719_v51 }
 0x27c   : > { %v2516_v10 = vsub.f32 %v2100_v7, %v2388_v57  ;;  %v2517_v18 = vsub.f32 %v2101_v23, %v2389_v21  ;;  %3306 = vmatprep.subr.bf16.mxu1 %v2601_v6  ;;  %v1696_v34 = vpop.permute.xlu1 %1695  ;;  %v1700_v31 = vpop.permute.xlu0 %1699  ;;  %v7032_v7 = vld [vmem:[#allocation101_spill] sm:$0xff]  ;;  %v7034_v21 = vld [vmem:[#allocation102_spill] sm:$0xff] }
 0x27d   : > { %7029 = vst [vmem:[#allocation91_spill] sm:$0xff] %v5928_v55  ;;  %v2371_v35 = vunpack.c.h.bf16 %v5928_v55  ;;  %v2066_v22 = vmax.f32 %v1938_v32, 0.0  ;;  %v2067_v53 = vmax.f32 %v1939_v29, 0.0  ;;  %v1858_v41 = vmax.f32 %v1696_v34, %v4710_v20  ;;  %v7035_v32 = vld [vmem:[#allocation135_spill] sm:$0xff] }
 0x27e   : > { %v2593_v52 = vpack.c.bf16 %v2517_v18, %v2516_v10  ;;  %v1859_v39 = vmax.f32 %v1700_v31, %v4710_v20  ;;  %v2370_v62 = vunpack.c.l.bf16 %v5928_v55  ;;  %v1202_v29 = vmin.f32 %v7035_v32, %v4719_v51  ;;  %v7038_v32 = vld [vmem:[#allocation104_spill] sm:$0xff] }
 0x27f   : > { %v2499_v13 = vsub.f32 %v2083_v47, %v2371_v35  ;;  %v5940_v17 = vpack.c.bf16 %v2067_v53, %v2066_v22  ;;  %v1986_v57 = vsub.f32 %v1218_v8, %v1858_v41  ;;  %v7036_v41 = vld [vmem:[#allocation134_spill] sm:$0xff] }
 0x280   : > { %v1987_v60 = vsub.f32 %v1219_v19, %v1859_v39  ;;  %3307 = vmatpush3.bf16.msra.mxu1 %v2593_v52  ;;  %v1632_v10 = vpop.permute.xlu1 %1631  ;;  %v2498_v18 = vsub.f32 %v2082_v40, %v2370_v62  ;;  %v1636_v35 = vpop.permute.xlu0 %1635  ;;  %v1203_v8 = vmin.f32 %v7036_v41, %v4719_v51  ;;  %v7037_v19 = vld [vmem:[#allocation103_spill] sm:$0xff] }
 0x281   : > { %7033 = vst [vmem:[#allocation12_spill] sm:$0xff] %v5940_v17  ;;  %v2354_v34 = vunpack.c.l.bf16 %v5940_v17  ;;  %v2355_v31 = vunpack.c.h.bf16 %v5940_v17  ;;  %v2114_v16 = vmax.f32 %v1986_v57, 0.0  ;;  %v1842_v47 = vmax.f32 %v1632_v10, %v4710_v20  ;;  %v7039_v57 = vld [vmem:[#allocation118_spill] sm:$0xff] }
 0x282   : > { %v2115_v23 = vmax.f32 %v1987_v60, 0.0  ;;  %v1843_v6 = vmax.f32 %v1636_v35, %v4710_v20  ;;  %v2584_v55 = vpack.c.bf16 %v2499_v13, %v2498_v18  ;;  %v1169_v52 = vmin.f32 %v7037_v19, %v4719_v51  ;;  %v7041_v35 = vld [vmem:[#allocation119_spill] sm:$0xff]  ;;  %v7042_v19 = vld [vmem:[#allocation116_spill] sm:$0xff] }
 0x283   : > { %v2482_v39 = vsub.f32 %v2066_v22, %v2354_v34  ;;  %v2483_v40 = vsub.f32 %v2067_v53, %v2355_v31  ;;  %v1970_v62 = vsub.f32 %v1202_v29, %v1842_v47  ;;  %v1168_v17 = vmin.f32 %v7038_v32, %v4719_v51  ;;  %v7044_v32 = vld [vmem:[#allocation130_spill] sm:$0xff] }
 0x284   : > { %v1185_v10 = vmin.f32 %v7039_v57, %v4719_v51  ;;  %v5958_v12 = vpack.c.bf16 %v2115_v23, %v2114_v16  ;;  %v1971_v3 = vsub.f32 %v1203_v8, %v1843_v6  ;;  %3286 = vmatprep.subr.bf16.mxu0 %v2584_v55  ;;  %v1560_v60 = vpop.permute.xlu1 %1559  ;;  %v1184_v13 = vmin.f32 %v7041_v35, %v4719_v51  ;;  %v1564_v53 = vpop.permute.xlu0 %1563  ;;  %v7043_v55 = vld [vmem:[#allocation117_spill] sm:$0xff]  ;;  %v7046_v6 = vld [vmem:[#allocation131_spill] sm:$0xff]  ;;  %v7047_v8 = vld [vmem:[#allocation132_spill] sm:$0xff] }
 0x285   : > { %v2576_v18 = vpack.c.bf16 %v2483_v40, %v2482_v39  ;;  %v2098_v41 = vmax.f32 %v1970_v62, 0.0  ;;  %v1824_v22 = vmax.f32 %v1560_v60, %v4710_v20  ;;  %v1825_v31 = vmax.f32 %v1564_v53, %v4710_v20  ;;  %v5977_v53 = vld [vmem:[%s6331_s0 + $0x20] sm:$0xff] }
 0x286   : > { %7040 = vst [vmem:[#allocation68_spill] sm:$0xff] %v5958_v12  ;;  %v2403_v29 = vunpack.c.h.bf16 %v5958_v12  ;;  %v2099_v34 = vmax.f32 %v1971_v3, 0.0  ;;  %v2402_v47 = vunpack.c.l.bf16 %v5958_v12  ;;  %v1201_v9 = vmin.f32 %v7047_v8, %v4719_v51 }
 0x287   : > { %v1952_v40 = vsub.f32 %v1184_v13, %v1824_v22  ;;  %3287 = vmatpush3.bf16.msra.mxu0 %v2576_v18  ;;  %v1953_v60 = vsub.f32 %v1185_v10, %v1825_v31  ;;  %v396_v12 = vrot.slane %v5977_v53, %v4819_v44 }
 0x288   : > { %v2531_v62 = vsub.f32 %v2115_v23, %v2403_v29  ;;  %v5972_v57 = vpack.c.bf16 %v2099_v34, %v2098_v41  ;;  %v1496_v3 = vpop.permute.xlu1 %1495  ;;  %v2530_v35 = vsub.f32 %v2114_v16, %v2402_v47  ;;  %v1500_v23 = vpop.permute.xlu0 %1499  ;;  %v348_v47 = vrot.slane %v5977_v53, %v4801_v48 }
 0x289   : > { %v2080_v39 = vmax.f32 %v1952_v40, 0.0  ;;  %v1808_v13 = vmax.f32 %v1496_v3, %v4710_v20  ;;  %v2081_v16 = vmax.f32 %v1953_v60, 0.0  ;;  %v1809_v22 = vmax.f32 %v1500_v23, %v4710_v20  ;;  %v7050_v60 = vld [vmem:[#allocation149_spill] sm:$0xff] }
 0x28a   : > { %7045 = vst [vmem:[#allocation11_spill] sm:$0xff] %v5972_v57  ;;  %v2386_v18 = vunpack.c.l.bf16 %v5972_v57  ;;  %v2387_v10 = vunpack.c.h.bf16 %v5972_v57  ;;  %v2600_v31 = vpack.c.bf16 %v2531_v62, %v2530_v35  ;;  %v1217_v57 = vmin.f32 %v7049_v50, %v4719_v51 }
 0x28b   : > { %v1936_v29 = vsub.f32 %v1168_v17, %v1808_v13  ;;  %v5991_v28 = vpack.c.bf16 %v2081_v16, %v2080_v39  ;;  %v1937_v3 = vsub.f32 %v1169_v52, %v1809_v22  ;;  %v1216_v23 = vmin.f32 %v7050_v60, %v4719_v51  ;;  %v7051_v22 = vld [vmem:[#allocation133_spill] sm:$0xff] }
 0x28c   : > { %v2514_v8 = vsub.f32 %v2098_v41, %v2386_v18  ;;  %v2515_v40 = vsub.f32 %v2099_v34, %v2387_v10  ;;  %v1688_v25 = vpop.permute.xlu1 %1687  ;;  %3308 = vmatprep.subr.bf16.mxu1 %v2600_v31  ;;  %v1692_v35 = vpop.permute.xlu0 %1691  ;;  %v365_v10 = vmin.f32 %v348_v47, %v4836_v30  ;;  %v413_v50 = vmax.f32 %v396_v12, %v4814_v4 }
 0x28d   : > { %7048 = vst [vmem:[#allocation67_spill] sm:$0xff] %v5991_v28  ;;  %v2064_v17 = vmax.f32 %v1936_v29, 0.0  ;;  %v1856_v62 = vmax.f32 %v1688_v25, %v4710_v20  ;;  %v2369_v61 = vunpack.c.h.bf16 %v5991_v28  ;;  %v2065_v41 = vmax.f32 %v1937_v3, 0.0 }
 0x28e   : > { %v2592_v13 = vpack.c.bf16 %v2515_v40, %v2514_v8  ;;  %v1857_v34 = vmax.f32 %v1692_v35, %v4710_v20  ;;  %v2368_v52 = vunpack.c.l.bf16 %v5991_v28  ;;  %v1200_v29 = vmin.f32 %v7051_v22, %v4719_v51 }
 0x28f   : > { %v1984_v18 = vsub.f32 %v1216_v23, %v1856_v62  ;;  %v2497_v31 = vsub.f32 %v2081_v16, %v2369_v61  ;;  %v6005_v60 = vpack.c.bf16 %v2065_v41, %v2064_v17  ;;  %v373_v62 = vmin.f32 %v348_v47, %v4843_v1  ;;  %v7053_v47 = vld [vmem:[#allocation146_spill] sm:$0xff] }
 0x290   : > { %v1985_v25 = vsub.f32 %v1217_v57, %v1857_v34  ;;  %3309 = vmatpush3.bf16.msra.mxu1 %v2592_v13  ;;  %v1624_v8 = vpop.permute.xlu1 %1623  ;;  %v1628_v35 = vpop.permute.xlu0 %1627  ;;  %v2496_v23 = vsub.f32 %v2080_v39, %v2368_v52  ;;  %v421_v57 = vmax.f32 %v396_v12, %v4816_v2  ;;  %v6013_v13 = vsub.f32 %v365_v10, %v413_v50 }
 0x291   : > { %7052 = vst [vmem:[#allocation44_spill] sm:$0xff] %v6005_v60  ;;  %v2112_v40 = vmax.f32 %v1984_v18, 0.0  ;;  %v1840_v3 = vmax.f32 %v1624_v8, %v4710_v20  ;;  %v2352_v28 = vunpack.c.l.bf16 %v6005_v60  ;;  %v2353_v14 = vunpack.c.h.bf16 %v6005_v60  ;;  %v7054_v60 = vld [vmem:[#allocation147_spill] sm:$0xff] }
 0x292   : > { %v2113_v59 = vmax.f32 %v1985_v25, 0.0  ;;  %v1841_v22 = vmax.f32 %v1628_v35, %v4710_v20  ;;  %v2583_v16 = vpack.c.bf16 %v2497_v31, %v2496_v23  ;;  %v1215_v63 = vmin.f32 %v7053_v47, %v4719_v51 }
 0x293   : > { %v1968_v61 = vsub.f32 %v1200_v29, %v1840_v3  ;;  %v2480_v34 = vsub.f32 %v2064_v17, %v2352_v28  ;;  %v2481_v18 = vsub.f32 %v2065_v41, %v2353_v14  ;;  %v1214_v25 = vmin.f32 %v7054_v60, %v4719_v51 }
 0x294   : > { %v6015_v8 = vpack.c.bf16 %v2113_v59, %v2112_v40  ;;  %v1969_v39 = vsub.f32 %v1201_v9, %v1841_v22  ;;  %v1552_v52 = vpop.permute.xlu1 %1551  ;;  %3288 = vmatprep.subr.bf16.mxu0 %v2583_v16  ;;  %v1556_v31 = vpop.permute.xlu0 %1555  ;;  %v6027_v9 = vld [vmem:[%s6331_s0 + $0x30] sm:$0xff]  ;;  %v7055_v17 = vmin.f32 %v7043_v55, %v4719_v51  ;;  %v437_v60 = vsub.f32 %v373_v62, %v421_v57 }
 0x295   : > { %v2096_v5 = vmax.f32 %v1968_v61, 0.0  ;;  %v1822_v29 = vmax.f32 %v1552_v52, %v4710_v20  ;;  %v2575_v12 = vpack.c.bf16 %v2481_v18, %v2480_v34  ;;  %v1823_v14 = vmax.f32 %v1556_v31, %v4710_v20 }
 0x296   : > { %v2401_v10 = vunpack.c.h.bf16 %v6015_v8  ;;  %v2097_v28 = vmax.f32 %v1969_v39, 0.0  ;;  %v2400_v50 = vunpack.c.l.bf16 %v6015_v8  ;;  %v2145_v3 = vrot.slane %v5977_v53, %v4915_v36 }
 0x297   : > { %v1950_v41 = vsub.f32 %v7055_v17, %v1822_v29  ;;  %v7056_v22 = vmin.f32 %v7042_v19, %v4719_v51  ;;  %3289 = vmatpush3.bf16.msra.mxu0 %v2575_v12  ;;  %v445_v34 = vmax.f32 %v6013_v13, 0.0  ;;  %v356_v62 = vrot.slane %v6027_v9, %v4801_v48 }
 0x298   : > { %v2529_v35 = vsub.f32 %v2113_v59, %v2401_v10  ;;  %v6035_v23 = vpack.c.bf16 %v2097_v28, %v2096_v5  ;;  %v1488_v16 = vpop.permute.xlu1 %1487  ;;  %v1492_v39 = vpop.permute.xlu0 %1491  ;;  %v2528_v52 = vsub.f32 %v2112_v40, %v2400_v50  ;;  %v7057_v47 = vmin.f32 %v7034_v21, %v4719_v51 }
 0x299   : > { %v1951_v61 = vsub.f32 %v7056_v22, %v1823_v14  ;;  %v2078_v18 = vmax.f32 %v1950_v41, 0.0  ;;  %v1806_v55 = vmax.f32 %v1488_v16, %v4710_v20  ;;  %v1807_v19 = vmax.f32 %v1492_v39, %v4710_v20 }
 0x29a   : > { %v2384_v59 = vunpack.c.l.bf16 %v6035_v23  ;;  %v2385_v53 = vunpack.c.h.bf16 %v6035_v23  ;;  %v2599_v13 = vpack.c.bf16 %v2529_v35, %v2528_v52  ;;  %v453_v31 = vmax.f32 %v437_v60, 0.0 }
 0x29b   : > { %v2079_v57 = vmax.f32 %v1951_v61, 0.0  ;;  %v1934_v29 = vsub.f32 %v7057_v47, %v1806_v55  ;;  %v404_v12 = vrot.slane %v6027_v9, %v4819_v44  ;;  %v7058_v48 = vmin.f32 %v7032_v7, %v4719_v51 }
 0x29c   : > { %v2512_v40 = vsub.f32 %v2096_v5, %v2384_v59  ;;  %v2513_v10 = vsub.f32 %v2097_v28, %v2385_v53  ;;  %v1680_v41 = vpop.permute.xlu1 %1679  ;;  %3310 = vmatprep.subr.bf16.mxu1 %v2599_v13  ;;  %v1684_v21 = vpop.permute.xlu0 %1683  ;;  %v367_v35 = vmin.f32 %v356_v62, %v4836_v30  ;;  %v375_v60 = vmin.f32 %v356_v62, %v4843_v1 }
 0x29d   : > { %v6052_v14 = vpack.c.bf16 %v2079_v57, %v2078_v18  ;;  %v1935_v17 = vsub.f32 %v7058_v48, %v1807_v19  ;;  %v2062_v50 = vmax.f32 %v1934_v29, 0.0  ;;  %v1854_v22 = vmax.f32 %v1680_v41, %v4710_v20 }
 0x29e   : > { %v2591_v61 = vpack.c.bf16 %v2513_v10, %v2512_v40  ;;  %v1855_v28 = vmax.f32 %v1684_v21, %v4710_v20  ;;  %v415_v55 = vmax.f32 %v404_v12, %v4814_v4  ;;  %v423_v39 = vmax.f32 %v404_v12, %v4816_v2 }
 0x29f   : > { %v2367_v44 = vunpack.c.h.bf16 %v6052_v14  ;;  %v2063_v5 = vmax.f32 %v1935_v17, 0.0  ;;  %v1982_v16 = vsub.f32 %v1214_v25, %v1854_v22  ;;  %v2366_v7 = vunpack.c.l.bf16 %v6052_v14 }
 0x2a0   : > { %v1983_v53 = vsub.f32 %v1215_v63, %v1855_v28  ;;  %3311 = vmatpush3.bf16.msra.mxu1 %v2591_v61  ;;  %v1616_v30 = vpop.permute.xlu1 %1615  ;;  %v6067_v1 = vmul.f32 %v2145_v3, %v445_v34  ;;  %v1620_v47 = vpop.permute.xlu0 %1619  ;;  %v6070_v25 = vmul.f32 %v2145_v3, %v453_v31  ;;  %v7061_v63 = vmin.f32 %v7046_v6, %v4719_v51 }
 0x2a1   : > { %v2495_v52 = vsub.f32 %v2079_v57, %v2367_v44  ;;  %v6065_v59 = vpack.c.bf16 %v2063_v5, %v2062_v50  ;;  %v2110_v62 = vmax.f32 %v1982_v16, 0.0  ;;  %v1838_v19 = vmax.f32 %v1616_v30, %v4710_v20 }
 0x2a2   : > { %7059 = vst [vmem:[#allocation22_spill] sm:$0xff] %v6067_v1  ;;  %v2494_v29 = vsub.f32 %v2078_v18, %v2366_v7  ;;  %7060 = vst [vmem:[#allocation20_spill] sm:$0xff] %v6070_v25  ;;  %v2111_v2 = vmax.f32 %v1983_v53, 0.0  ;;  %v1839_v57 = vmax.f32 %v1620_v47, %v4710_v20  ;;  %v431_v40 = vsub.f32 %v367_v35, %v415_v55  ;;  %v7067_v53 = vld [vmem:[#allocation16_spill] sm:$0xff] }
 0x2a3   : > { %v2350_v13 = vunpack.c.l.bf16 %v6065_v59  ;;  %v2351_v4 = vunpack.c.h.bf16 %v6065_v59  ;;  %v1966_v12 = vsub.f32 %v7061_v63, %v1838_v19  ;;  %v439_v10 = vsub.f32 %v375_v60, %v423_v39  ;;  %v7068_v19 = vld [vmem:[#allocation8_spill] sm:$0xff]  ;;  %v7075_v63 = vld [vmem:[#allocation55_spill] sm:$0xff] }
 0x2a4   : > { %v2582_v34 = vpack.c.bf16 %v2495_v52, %v2494_v29  ;;  %v6078_v41 = vpack.c.bf16 %v2111_v2, %v2110_v62  ;;  %v7062_v3 = vmin.f32 %v7044_v32, %v4719_v51  ;;  %v6087_v35 = vpack.c.bf16 %v6070_v25, %v6067_v1  ;;  %v7069_v47 = vld [vmem:[#allocation28_spill] sm:$0xff]  ;;  %v7070_v29 = vld [vmem:[#allocation27_spill] sm:$0xff]  ;;  %v7103_v1 = vld [vmem:[#allocation94_spill] sm:$0xff] }
 0x2a5   : > { %v2478_v48 = vsub.f32 %v2062_v50, %v2350_v13  ;;  %v2479_v17 = vsub.f32 %v2063_v5, %v2351_v4  ;;  %v2094_v31 = vmax.f32 %v1966_v12, 0.0  ;;  %v447_v50 = vmax.f32 %v431_v40, 0.0  ;;  %v7063_v5 = vld [vmem:[#allocation15_spill] sm:$0xff]  ;;  %v7072_v4 = vld [vmem:[#allocation32_spill] sm:$0xff]  ;;  %v7076_v12 = vld [vmem:[#allocation18_spill] sm:$0xff] }
 0x2a6   : > { %v1967_v18 = vsub.f32 %v7062_v3, %v1839_v57  ;;  %3290 = vmatprep.subr.bf16.mxu0 %v2582_v34  ;;  %v2399_v20 = vunpack.c.h.bf16 %v6078_v41  ;;  %v2398_v6 = vunpack.c.l.bf16 %v6078_v41  ;;  %v455_v60 = vmax.f32 %v439_v10, 0.0  ;;  %v7071_v13 = vld [vmem:[#allocation31_spill] sm:$0xff]  ;;  %v7074_v57 = vld [vmem:[#allocation56_spill] sm:$0xff]  ;;  %v7077_v34 = vld [vmem:[#allocation45_spill] sm:$0xff] }
 0x2a7   : > { %v2574_v22 = vpack.c.bf16 %v2479_v17, %v2478_v48  ;;  %v2153_v61 = vrot.slane %v6027_v9, %v4915_v36  ;;  %v7066_v9 = vld [vmem:[#allocation17_spill] sm:$0xff]  ;;  %v7079_v10 = vld [vmem:[#allocation75_spill] sm:$0xff]  ;;  %v7080_v48 = vld [vmem:[#allocation54_spill] sm:$0xff] }
 0x2a8   : > { %v2095_v21 = vmax.f32 %v1967_v18, 0.0  ;;  %v2527_v44 = vsub.f32 %v2111_v2, %v2399_v20  ;;  %v2526_v32 = vsub.f32 %v2110_v62, %v2398_v6  ;;  %v7073_v2 = vld [vmem:[#allocation24_spill] sm:$0xff]  ;;  %v7078_v40 = vld [vmem:[#allocation49_spill] sm:$0xff]  ;;  %v7083_v18 = vld [vmem:[#allocation71_spill] sm:$0xff] }
 0x2a9   : > { %3291 = vmatpush3.bf16.msra.mxu0 %v2574_v22  ;;  %v6097_v55 = vmul.f32 %v2153_v61, %v447_v50  ;;  %v6099_v39 = vmul.f32 %v2153_v61, %v455_v60  ;;  %v7081_v17 = vld [vmem:[#allocation53_spill] sm:$0xff]  ;;  %v7082_v3 = vld [vmem:[#allocation92_spill] sm:$0xff]  ;;  %v7088_v6 = vld [vmem:[#allocation98_spill] sm:$0xff] }
 0x2aa   : > { %v6091_v51 = vpack.c.bf16 %v2095_v21, %v2094_v31  ;;  %3320 = vmatprep.subr.bf16.mxu0 %v7063_v5  ;;  %v2598_v7 = vpack.c.bf16 %v2527_v44, %v2526_v32  ;;  %v7085_v22 = vld [vmem:[#allocation77_spill] sm:$0xff]  ;;  %v7086_v20 = vld [vmem:[#allocation72_spill] sm:$0xff]  ;;  %v7089_v50 = vld [vmem:[#allocation51_spill] sm:$0xff] }
 0x2ab   : > { %7064 = vst [vmem:[#allocation43_spill] sm:$0xff] %v6097_v55  ;;  %7065 = vst [vmem:[#allocation19_spill] sm:$0xff] %v6099_v39  ;;  %v6106_v62 = vpack.c.bf16 %v6099_v39, %v6097_v55  ;;  %v7090_v60 = vld [vmem:[#allocation52_spill] sm:$0xff]  ;;  %v7091_v61 = vld [vmem:[#allocation73_spill] sm:$0xff] }
 0x2ac   : > { %v2382_v28 = vunpack.c.l.bf16 %v6091_v51  ;;  %v2383_v16 = vunpack.c.h.bf16 %v6091_v51  ;;  %2721 = vmatmul.mubr.bf16.vlgmr.msra.gmra.mxu0 %v6087_v35  ;;  %3312 = vmatprep.subr.bf16.mxu1 %v2598_v7  ;;  %v7092_v44 = vld [vmem:[#allocation95_spill] sm:$0xff]  ;;  %v7093_v32 = vld [vmem:[#allocation26_spill] sm:$0xff]  ;;  %v7096_v7 = vld [vmem:[#allocation25_spill] sm:$0xff] }
 0x2ad   : > { %3321 = vmatpush3.bf16.msra.mxu0 %v7066_v9  ;;  %2802 = vmatprep.mubr.bf16.mxu0 %v7067_v53  ;;  %v7100_v39 = vld [vmem:[#allocation69_spill] sm:$0xff]  ;;  %v7101_v55 = vld [vmem:[#allocation47_spill] sm:$0xff] }
 0x2ae   : > { %v2510_v52 = vsub.f32 %v2094_v31, %v2382_v28  ;;  %v2511_v36 = vsub.f32 %v2095_v21, %v2383_v16  ;;  %3322 = vmatprep.subr.bf16.mxu0 %v5067_v58  ;;  %v7084_v31 = vld [vmem:[#allocation96_spill] sm:$0xff]  ;;  %v7087_v21 = vld [vmem:[#allocation99_spill] sm:$0xff]  ;;  %v7095_v16 = vld [vmem:[#allocation74_spill] sm:$0xff] }
 0x2af   : > { %v7094_v28 = vld [vmem:[#allocation100_spill] sm:$0xff]  ;;  %v7102_v25 = vld [vmem:[#allocation91_spill] sm:$0xff] }
 0x2b0   : > { %v2590_v30 = vpack.c.bf16 %v2511_v36, %v2510_v52  ;;  %v7097_v52 = vld [vmem:[#allocation30_spill] sm:$0xff] }
 0x2b1   : > { %3323 = vmatpush3.bf16.msra.mxu0 %v5087_v42  ;;  %v7098_v36 = vld [vmem:[#allocation70_spill] sm:$0xff] }
 0x2b2   : > { %3313 = vmatpush3.bf16.msra.mxu1 %v2590_v30  ;;  %3324 = vmatprep.subr.bf16.mxu0 %v5181_v56  ;;  %v7099_v30 = vld [vmem:[#allocation48_spill] sm:$0xff] }
 0x2b3   : > { %3342 = vmatprep.subr.bf16.mxu1 %v7068_v19 }
 0x2b5   : > { %2762 = vmatmul.mubr.bf16.vlgmr.msra.gmra.mxu1 %v6106_v62  ;;  %3325 = vmatpush3.bf16.msra.mxu0 %v5214_v11 }
 0x2b6   : > { %3343 = vmatpush3.bf16.msra.mxu1 %v5042_v38  ;;  %3326 = vmatprep.subr.bf16.mxu0 %v5303_v24 }
 0x2b7   : > { %3344 = vmatprep.subr.bf16.mxu1 %v5115_v15  ;;  %2843 = vmatprep.mubr.bf16.mxu1 %v5109_v45 }
 0x2b9   : > { %3327 = vmatpush3.bf16.msra.mxu0 %v5313_v37 }
 0x2ba   : > { %3345 = vmatpush3.bf16.msra.mxu1 %v5144_v33  ;;  %3328 = vmatprep.subr.bf16.mxu0 %v5382_v49 }
 0x2bb   : > { %3346 = vmatprep.subr.bf16.mxu1 %v5239_v26 }
 0x2bd   : > { %3329 = vmatpush3.bf16.msra.mxu0 %v5336_v54 }
 0x2be   : > { %3347 = vmatpush3.bf16.msra.mxu1 %v7069_v47  ;;  %3330 = vmatprep.subr.bf16.mxu0 %v5458_v43 }
 0x2bf   : > { %3348 = vmatprep.subr.bf16.mxu1 %v5326_v0 }
 0x2c1   : > { %3331 = vmatpush3.bf16.msra.mxu0 %v7070_v29 }
 0x2c2   : > { %3349 = vmatpush3.bf16.msra.mxu1 %v7071_v13  ;;  %3332 = vmatprep.subr.bf16.mxu0 %v5539_v27 }
 0x2c3   : > { %3350 = vmatprep.subr.bf16.mxu1 %v7072_v4 }
 0x2c5   : > { %3333 = vmatpush3.bf16.msra.mxu0 %v7073_v2 }
 0x2c6   : > { %3351 = vmatpush3.bf16.msra.mxu1 %v7074_v57  ;;  %3334 = vmatprep.subr.bf16.mxu0 %v5614_v46 }
 0x2c7   : > { %3352 = vmatprep.subr.bf16.mxu1 %v7075_v63 }
 0x2c9   : > { %3335 = vmatpush3.bf16.msra.mxu0 %v7076_v12 }
 0x2ca   : > { %3353 = vmatpush3.bf16.msra.mxu1 %v7077_v34  ;;  %3364 = vmatprep.subr.bf16.mxu0 %v7079_v10 }
 0x2cb   : > { %3354 = vmatprep.subr.bf16.mxu1 %v7078_v40 }
 0x2cc   : > { %2803 = vmatmul.mubr.bf16.vlgmr.msra.gmra.mxu0 %v7080_v48 }
 0x2cd   : > { %3365 = vmatpush3.bf16.msra.mxu0 %v7082_v3  ;;  %2884 = vmatprep.mubr.bf16.mxu0 %v7085_v22 }
 0x2ce   : > { %3355 = vmatpush3.bf16.msra.mxu1 %v7081_v17  ;;  %3366 = vmatprep.subr.bf16.mxu0 %v7084_v31 }
 0x2cf   : > { %3356 = vmatprep.subr.bf16.mxu1 %v7083_v18 }
 0x2d1   : > { %3367 = vmatpush3.bf16.msra.mxu0 %v7087_v21 }
 0x2d2   : > { %3357 = vmatpush3.bf16.msra.mxu1 %v7086_v20  ;;  %3368 = vmatprep.subr.bf16.mxu0 %v7088_v6 }
 0x2d3   : > { %3386 = vmatprep.subr.bf16.mxu1 %v7089_v50 }
 0x2d5   : > { %2844 = vmatmul.mubr.bf16.vlgmr.msra.gmra.mxu1 %v7090_v60  ;;  %3369 = vmatpush3.bf16.msra.mxu0 %v7091_v61 }
 0x2d6   : > { %3387 = vmatpush3.bf16.msra.mxu1 %v7092_v44  ;;  %3370 = vmatprep.subr.bf16.mxu0 %v7093_v32  ;;  %v7104_v32 = vld [vmem:[#allocation12_spill] sm:$0xff]  ;;  %v7106_v44 = vld [vmem:[#allocation67_spill] sm:$0xff] }
 0x2d7   : > { %3388 = vmatprep.subr.bf16.mxu1 %v7094_v28  ;;  %2925 = vmatprep.mubr.bf16.mxu1 %v7095_v16  ;;  %v7105_v28 = vld [vmem:[#allocation93_spill] sm:$0xff] }
 0x2d9   : > { %3371 = vmatpush3.bf16.msra.mxu0 %v7096_v7  ;;  %v7107_v7 = vld [vmem:[#allocation90_spill] sm:$0xff] }
 0x2da   : > { %3389 = vmatpush3.bf16.msra.mxu1 %v7097_v52  ;;  %3372 = vmatprep.subr.bf16.mxu0 %v7098_v36  ;;  %v2183_v36 = vunpack.c.l.bf16 %v7067_v53  ;;  %v7108_v52 = vld [vmem:[#allocation44_spill] sm:$0xff] }
 0x2db   : > { %3390 = vmatprep.subr.bf16.mxu1 %v7099_v30  ;;  %v2191_v30 = vunpack.c.h.bf16 %v7067_v53 }
 0x2dd   : > { %3373 = vmatpush3.bf16.msra.mxu0 %v7100_v39  ;;  %v7109_v39 = vld [vmem:[#allocation89_spill] sm:$0xff] }
 0x2de   : > { %3391 = vmatpush3.bf16.msra.mxu1 %v7101_v55  ;;  %3374 = vmatprep.subr.bf16.mxu0 %v7102_v25  ;;  %v7110_v25 = vld [vmem:[#allocation68_spill] sm:$0xff]  ;;  %v7112_v55 = vld [vmem:[#allocation14_spill] sm:$0xff] }
 0x2df   : > { %3392 = vmatprep.subr.bf16.mxu1 %v7103_v1  ;;  %v7111_v1 = vld [vmem:[#allocation13_spill] sm:$0xff] }
 0x2e1   : > { %3375 = vmatpush3.bf16.msra.mxu0 %v7104_v32  ;;  %v2199_v32 = vsub.f32 %v7111_v1, %v2183_v36  ;;  %v7114_v1 = vld [vmem:[#allocation7_spill] sm:$0xff] }
 0x2e2   : > { %3393 = vmatpush3.bf16.msra.mxu1 %v7105_v28  ;;  %3376 = vmatprep.subr.bf16.mxu0 %v7106_v44  ;;  %v2207_v28 = vsub.f32 %v7112_v55, %v2191_v30  ;;  %v7113_v44 = vld [vmem:[#allocation11_spill] sm:$0xff]  ;;  %v7139_v30 = vld [vmem:[#allocation20_spill] sm:$0xff] }
 0x2e3   : > { %3394 = vmatprep.subr.bf16.mxu1 %v7107_v7  ;;  %v7115_v36 = vld [vmem:[#allocation23_spill] sm:$0xff] }
 0x2e4   : > { %v2215_v53 = vpack.c.bf16 %v2207_v28, %v2199_v32  ;;  %v7136_v32 = vld [vmem:[#allocation93_spill] sm:$0xff]  ;;  %v7137_v28 = vld [vmem:[#allocation67_spill] sm:$0xff] }
 0x2e5   : > { %3377 = vmatpush3.bf16.msra.mxu0 %v7108_v52  ;;  %v2185_v52 = vunpack.c.l.bf16 %v5109_v45 }
 0x2e6   : > { %3395 = vmatpush3.bf16.msra.mxu1 %v7109_v39  ;;  %3378 = vmatprep.subr.bf16.mxu0 %v6052_v14  ;;  %v2193_v39 = vunpack.c.h.bf16 %v5109_v45 }
 0x2e7   : > { %3396 = vmatprep.subr.bf16.mxu1 %v7110_v25  ;;  %v2201_v55 = vsub.f32 %v7114_v1, %v2185_v52  ;;  %v7140_v1 = vld [vmem:[#allocation44_spill] sm:$0xff] }
 0x2e9   : > { %3379 = vmatpush3.bf16.msra.mxu0 %v6065_v59 }
 0x2ea   : > { %3397 = vmatpush3.bf16.msra.mxu1 %v7113_v44  ;;  %3408 = vmatprep.subr.bf16.mxu0 %v7063_v5  ;;  %v2209_v5 = vsub.f32 %v7115_v36, %v2193_v39  ;;  %v2189_v39 = vunpack.c.l.bf16 %v7095_v16  ;;  %v2188_v36 = vunpack.c.l.bf16 %v6106_v62 }
 0x2eb   : > { %3398 = vmatprep.subr.bf16.mxu1 %v6015_v8 }
 0x2ec   : > { %2885 = vmatmul.mubr.bf16.vlgmr.msra.gmra.mxu0 %v6087_v35  ;;  %v2217_v45 = vpack.c.bf16 %v2209_v5, %v2201_v55  ;;  %v7141_v55 = vld [vmem:[#allocation89_spill] sm:$0xff]  ;;  %v2196_v5 = vunpack.c.h.bf16 %v6106_v62 }
 0x2ed   : > { %3409 = vmatpush3.bf16.msra.mxu0 %v7066_v9  ;;  %2966 = vmatprep.mubr.bf16.mxu0 %v2215_v53  ;;  %v2197_v9 = vunpack.c.h.bf16 %v7095_v16  ;;  %v7138_v16 = vld [vmem:[#allocation22_spill] sm:$0xff] }
 0x2ee   : > { %3399 = vmatpush3.bf16.msra.mxu1 %v6035_v23  ;;  %3410 = vmatprep.subr.bf16.mxu0 %v5067_v58  ;;  %v2190_v58 = vunpack.c.h.bf16 %v7080_v48 }
 0x2ef   : > { %3400 = vmatprep.subr.bf16.mxu1 %v6078_v41 }
 0x2f1   : > { %3411 = vmatpush3.bf16.msra.mxu0 %v5087_v42  ;;  %v2187_v42 = vunpack.c.l.bf16 %v7085_v22 }
 0x2f2   : > { %3401 = vmatpush3.bf16.msra.mxu1 %v6091_v51  ;;  %3412 = vmatprep.subr.bf16.mxu0 %v5181_v56 }
 0x2f3   : > { %3430 = vmatprep.subr.bf16.mxu1 %v7068_v19  ;;  %v7120_v19 = vld [vmem:[#allocation34_spill] sm:$0xff] }
 0x2f5   : > { %2926 = vmatmul.mubr.bf16.vlgmr.msra.gmra.mxu1 %v6106_v62  ;;  %3413 = vmatpush3.bf16.msra.mxu0 %v5214_v11  ;;  %v7117_v11 = vld [vmem:[#allocation50_spill] sm:$0xff] }
 0x2f6   : > { %3431 = vmatpush3.bf16.msra.mxu1 %v5042_v38  ;;  %3414 = vmatprep.subr.bf16.mxu0 %v5303_v24  ;;  %v2182_v38 = vunpack.c.l.bf16 %v7080_v48  ;;  %v7118_v24 = vld [vmem:[#allocation76_spill] sm:$0xff] }
 0x2f7   : > { %3432 = vmatprep.subr.bf16.mxu1 %v5115_v15  ;;  %3007 = vmatprep.mubr.bf16.mxu1 %v2217_v45  ;;  %v2195_v15 = vunpack.c.h.bf16 %v7085_v22  ;;  %v7126_v48 = vld [vmem:[#allocation100_spill] sm:$0xff]  ;;  %v7131_v22 = vld [vmem:[#allocation69_spill] sm:$0xff] }
 0x2f9   : > { %3415 = vmatpush3.bf16.msra.mxu0 %v5313_v37  ;;  %v2203_v37 = vsub.f32 %v7118_v24, %v2187_v42 }
 0x2fa   : > { %3433 = vmatpush3.bf16.msra.mxu1 %v5144_v33  ;;  %3416 = vmatprep.subr.bf16.mxu0 %v5382_v49  ;;  %v7116_v33 = vld [vmem:[#allocation46_spill] sm:$0xff] }
 0x2fb   : > { %3434 = vmatprep.subr.bf16.mxu1 %v5239_v26  ;;  %v2198_v56 = vsub.f32 %v7116_v33, %v2182_v38  ;;  %v2206_v26 = vsub.f32 %v7117_v11, %v2190_v58  ;;  %v7143_v38 = vld [vmem:[#allocation19_spill] sm:$0xff] }
 0x2fc   : > { %v2212_v58 = vsub.f32 %v7143_v38, %v2196_v5 }
 0x2fd   : > { %3417 = vmatpush3.bf16.msra.mxu0 %v5336_v54  ;;  %v2214_v49 = vpack.c.bf16 %v2206_v26, %v2198_v56 }
 0x2fe   : > { %3435 = vmatpush3.bf16.msra.mxu1 %v7069_v47  ;;  %3418 = vmatprep.subr.bf16.mxu0 %v5458_v43  ;;  %v2184_v43 = vunpack.c.l.bf16 %v7090_v60 }
 0x2ff   : > { %3436 = vmatprep.subr.bf16.mxu1 %v5326_v0  ;;  %v7119_v0 = vld [vmem:[#allocation78_spill] sm:$0xff] }
 0x300   : > { %v2211_v54 = vsub.f32 %v7119_v0, %v2195_v15  ;;  %v2200_v47 = vsub.f32 %v7120_v19, %v2184_v43 }
 0x301   : > { %3419 = vmatpush3.bf16.msra.mxu0 %v7070_v29  ;;  %v7121_v29 = vld [vmem:[#allocation33_spill] sm:$0xff] }
 0x302   : > { %3437 = vmatpush3.bf16.msra.mxu1 %v7071_v13  ;;  %3420 = vmatprep.subr.bf16.mxu0 %v5539_v27  ;;  %v2192_v27 = vunpack.c.h.bf16 %v7090_v60  ;;  %v2194_v60 = vunpack.c.h.bf16 %v6087_v35 }
 0x303   : > { %3438 = vmatprep.subr.bf16.mxu1 %v7072_v4  ;;  %v7122_v4 = vld [vmem:[#allocation29_spill] sm:$0xff] }
 0x304   : > { %v2208_v13 = vsub.f32 %v7121_v29, %v2192_v27  ;;  %v2210_v53 = vsub.f32 %v7139_v30, %v2194_v60 }
 0x305   : > { %3421 = vmatpush3.bf16.msra.mxu0 %v7073_v2  ;;  %v2205_v2 = vsub.f32 %v7122_v4, %v2189_v39 }
 0x306   : > { %3439 = vmatpush3.bf16.msra.mxu1 %v7074_v57  ;;  %3422 = vmatprep.subr.bf16.mxu0 %v5614_v46  ;;  %v2219_v46 = vpack.c.bf16 %v2211_v54, %v2203_v37  ;;  %v7123_v57 = vld [vmem:[#allocation97_spill] sm:$0xff] }
 0x307   : > { %3440 = vmatprep.subr.bf16.mxu1 %v7075_v63  ;;  %v2213_v63 = vsub.f32 %v7123_v57, %v2197_v9 }
 0x309   : > { %3423 = vmatpush3.bf16.msra.mxu0 %v7076_v12  ;;  %v2216_v12 = vpack.c.bf16 %v2208_v13, %v2200_v47 }
 0x30a   : > { %3441 = vmatpush3.bf16.msra.mxu1 %v7077_v34  ;;  %3452 = vmatprep.subr.bf16.mxu0 %v7079_v10  ;;  %v2221_v34 = vpack.c.bf16 %v2213_v63, %v2205_v2  ;;  %v7125_v10 = vld [vmem:[#allocation26_spill] sm:$0xff] }
 0x30b   : > { %3442 = vmatprep.subr.bf16.mxu1 %v7078_v40  ;;  %v7124_v40 = vld [vmem:[#allocation95_spill] sm:$0xff] }
 0x30c   : > { %2967 = vmatmul.mubr.bf16.vlgmr.msra.gmra.mxu0 %v2214_v49 }
 0x30d   : > { %3453 = vmatpush3.bf16.msra.mxu0 %v7082_v3  ;;  %3048 = vmatprep.mubr.bf16.mxu0 %v2219_v46  ;;  %v7128_v3 = vld [vmem:[#allocation30_spill] sm:$0xff] }
 0x30e   : > { %3443 = vmatpush3.bf16.msra.mxu1 %v7081_v17  ;;  %3454 = vmatprep.subr.bf16.mxu0 %v7084_v31  ;;  %v7127_v17 = vld [vmem:[#allocation25_spill] sm:$0xff]  ;;  %v7130_v31 = vld [vmem:[#allocation48_spill] sm:$0xff] }
 0x30f   : > { %3444 = vmatprep.subr.bf16.mxu1 %v7083_v18  ;;  %v7129_v18 = vld [vmem:[#allocation70_spill] sm:$0xff] }
 0x311   : > { %3455 = vmatpush3.bf16.msra.mxu0 %v7087_v21  ;;  %v7133_v21 = vld [vmem:[#allocation91_spill] sm:$0xff] }
 0x312   : > { %3445 = vmatpush3.bf16.msra.mxu1 %v7086_v20  ;;  %3456 = vmatprep.subr.bf16.mxu0 %v7088_v6  ;;  %v7132_v20 = vld [vmem:[#allocation47_spill] sm:$0xff]  ;;  %v7134_v6 = vld [vmem:[#allocation94_spill] sm:$0xff] }
 0x313   : > { %3474 = vmatprep.subr.bf16.mxu1 %v7089_v50  ;;  %v2186_v50 = vunpack.c.l.bf16 %v6087_v35 }
 0x315   : > { %3008 = vmatmul.mubr.bf16.vlgmr.msra.gmra.mxu1 %v2216_v12  ;;  %3457 = vmatpush3.bf16.msra.mxu0 %v7091_v61  ;;  %v7135_v61 = vld [vmem:[#allocation12_spill] sm:$0xff]  ;;  %v2202_v52 = vsub.f32 %v7138_v16, %v2186_v50 }
 0x316   : > { %3475 = vmatpush3.bf16.msra.mxu1 %v7124_v40  ;;  %3458 = vmatprep.subr.bf16.mxu0 %v7125_v10 }
 0x317   : > { %3476 = vmatprep.subr.bf16.mxu1 %v7126_v48  ;;  %3089 = vmatprep.mubr.bf16.mxu1 %v2221_v34  ;;  %v2218_v35 = vpack.c.bf16 %v2210_v53, %v2202_v52 }
 0x319   : > { %3459 = vmatpush3.bf16.msra.mxu0 %v7127_v17 }
 0x31a   : > { %3477 = vmatpush3.bf16.msra.mxu1 %v7128_v3  ;;  %3460 = vmatprep.subr.bf16.mxu0 %v7129_v18 }
 0x31b   : > { %3478 = vmatprep.subr.bf16.mxu1 %v7130_v31 }
 0x31d   : > { %3461 = vmatpush3.bf16.msra.mxu0 %v7131_v22 }
 0x31e   : > { %3479 = vmatpush3.bf16.msra.mxu1 %v7132_v20  ;;  %3462 = vmatprep.subr.bf16.mxu0 %v7133_v21 }
 0x31f   : > { %3480 = vmatprep.subr.bf16.mxu1 %v7134_v6 }
 0x321   : > { %3463 = vmatpush3.bf16.msra.mxu0 %v7135_v61 }
 0x322   : > { %3481 = vmatpush3.bf16.msra.mxu1 %v7136_v32  ;;  %3464 = vmatprep.subr.bf16.mxu0 %v7137_v28 }
 0x323   : > { %3482 = vmatprep.subr.bf16.mxu1 %v7107_v7  ;;  %v7142_v7 = vld [vmem:[#allocation43_spill] sm:$0xff] }
 0x324   : > { %v2204_v45 = vsub.f32 %v7142_v7, %v2188_v36 }
 0x325   : > { %3465 = vmatpush3.bf16.msra.mxu0 %v7140_v1 }
 0x326   : > { %3483 = vmatpush3.bf16.msra.mxu1 %v7141_v55  ;;  %3466 = vmatprep.subr.bf16.mxu0 %v6052_v14  ;;  %v2220_v14 = vpack.c.bf16 %v2212_v58, %v2204_v45 }
 0x327   : > { %3484 = vmatprep.subr.bf16.mxu1 %v7110_v25  ;;  %v3248_v25 = vpop.f32.mrf.mxu0 }
 0x329   : > { %3467 = vmatpush3.bf16.msra.mxu0 %v6065_v59  ;;  %v3249_v62 = vpop.f32.mrf.mxu0  ;;  %v3270_v59 = vpop.f32.mrf.mxu1 }
 0x32a   : > { %3485 = vmatpush3.bf16.msra.mxu1 %v7113_v44  ;;  %v3250_v48 = vadd.f32 %v3249_v62, %v3248_v25 }
 0x32b   : > { %3486 = vmatprep.subr.bf16.mxu1 %v6015_v8  ;;  %v3251_v42 = vpop.f32.mrf.mxu0  ;;  %v3271_v44 = vpop.f32.mrf.mxu1 }
 0x32c   : > { %3049 = vmatmul.mubr.bf16.vlgmr.msra.gmra.mxu0 %v2218_v35  ;;  %v3272_v17 = vadd.f32 %v3271_v44, %v3270_v59 }
 0x32d   : > { %v3252_v15 = vpop.f32.mrf.mxu0  ;;  %v3273_v33 = vpop.f32.mrf.mxu1 }
 0x32e   : > { %3487 = vmatpush3.bf16.msra.mxu1 %v6035_v23  ;;  %v2682_v22 = vadd.f32 %v3272_v17, %v3250_v48  ;;  %v3253_v20 = vadd.f32 %v3252_v15, %v3251_v42 }
 0x32f   : > { %3488 = vmatprep.subr.bf16.mxu1 %v6078_v41  ;;  %v3274_v11 = vpop.f32.mrf.mxu1 }
 0x330   : > { %v3275_v21 = vadd.f32 %v3274_v11, %v3273_v33 }
 0x332   : > { %3489 = vmatpush3.bf16.msra.mxu1 %v6091_v51  ;;  %v2685_v52 = vadd.f32 %v3275_v21, %v3253_v20 }
 0x335   : > { %3090 = vmatmul.mubr.bf16.vlgmr.msra.gmra.mxu1 %v2220_v14 }
 0x36c   : > { %v3292_v8 = vpop.f32.mrf.mxu0 }
 0x36e   : > { %v3293_v56 = vpop.f32.mrf.mxu0 }
 0x36f   : > { %v3294_v3 = vadd.f32 %v3293_v56, %v3292_v8 }
 0x370   : > { %v3295_v26 = vpop.f32.mrf.mxu0 }
 0x371   : > { %v2723_v60 = vadd.f32 %v3294_v3, %v2682_v22 }
 0x372   : > { %v3296_v37 = vpop.f32.mrf.mxu0 }
 0x373   : > { %v3297_v61 = vadd.f32 %v3296_v37, %v3295_v26 }
 0x375   : > { %v3314_v24 = vpop.f32.mrf.mxu1  ;;  %v2726_v36 = vadd.f32 %v3297_v61, %v2685_v52 }
 0x377   : > { %v3315_v23 = vpop.f32.mrf.mxu1 }
 0x378   : > { %v3316_v6 = vadd.f32 %v3315_v23, %v3314_v24 }
 0x379   : > { %v3317_v41 = vpop.f32.mrf.mxu1 }
 0x37a   : > { %v2764_v30 = vadd.f32 %v3316_v6, %v2723_v60 }
 0x37b   : > { %v3318_v49 = vpop.f32.mrf.mxu1 }
 0x37c   : > { %v3319_v53 = vadd.f32 %v3318_v49, %v3317_v41 }
 0x37e   : > { %v2767_v25 = vadd.f32 %v3319_v53, %v2726_v36 }
 0x38c   : > { %v3336_v0 = vpop.f32.mrf.mxu0 }
 0x38e   : > { %v3337_v54 = vpop.f32.mrf.mxu0 }
 0x38f   : > { %v3338_v32 = vadd.f32 %v3337_v54, %v3336_v0 }
 0x390   : > { %v3339_v51 = vpop.f32.mrf.mxu0 }
 0x391   : > { %v2805_v5 = vadd.f32 %v3338_v32, %v2764_v30 }
 0x392   : > { %v3340_v27 = vpop.f32.mrf.mxu0 }
 0x393   : > { %v3341_v7 = vadd.f32 %v3340_v27, %v3339_v51 }
 0x395   : > { %v3358_v43 = vpop.f32.mrf.mxu1  ;;  %v2808_v56 = vadd.f32 %v3341_v7, %v2767_v25 }
 0x397   : > { %v3359_v46 = vpop.f32.mrf.mxu1 }
 0x398   : > { %v3360_v1 = vadd.f32 %v3359_v46, %v3358_v43 }
 0x399   : > { %v3361_v9 = vpop.f32.mrf.mxu1 }
 0x39a   : > { %v2846_v62 = vadd.f32 %v3360_v1, %v2805_v5 }
 0x39b   : > { %v3362_v47 = vpop.f32.mrf.mxu1 }
 0x39c   : > { %v3363_v59 = vadd.f32 %v3362_v47, %v3361_v9 }
 0x39e   : > { %v2849_v54 = vadd.f32 %v3363_v59, %v2808_v56 }
 0x3ac   : > { %v3380_v39 = vpop.f32.mrf.mxu0 }
 0x3ae   : > { %v3381_v19 = vpop.f32.mrf.mxu0 }
 0x3af   : > { %v3382_v45 = vadd.f32 %v3381_v19, %v3380_v39 }
 0x3b0   : > { %v3383_v29 = vpop.f32.mrf.mxu0 }
 0x3b1   : > { %v2887_v11 = vadd.f32 %v3382_v45, %v2846_v62 }
 0x3b2   : > { %v3384_v4 = vpop.f32.mrf.mxu0 }
 0x3b3   : > { %v3385_v26 = vadd.f32 %v3384_v4, %v3383_v29 }
 0x3b5   : > { %v3402_v13 = vpop.f32.mrf.mxu1  ;;  %v2890_v9 = vadd.f32 %v3385_v26, %v2849_v54 }
 0x3b7   : > { %v3403_v2 = vpop.f32.mrf.mxu1 }
 0x3b8   : > { %v3404_v15 = vadd.f32 %v3403_v2, %v3402_v13 }
 0x3b9   : > { %v3405_v63 = vpop.f32.mrf.mxu1 }
 0x3ba   : > { %v2928_v51 = vadd.f32 %v3404_v15, %v2887_v11 }
 0x3bb   : > { %v3406_v34 = vpop.f32.mrf.mxu1 }
 0x3bc   : > { %v3407_v43 = vadd.f32 %v3406_v34, %v3405_v63 }
 0x3be   : > { %v2931_v13 = vadd.f32 %v3407_v43, %v2890_v9 }
 0x3cc   : > { %v3424_v57 = vpop.f32.mrf.mxu0 }
 0x3ce   : > { %v3425_v12 = vpop.f32.mrf.mxu0 }
 0x3cf   : > { %v3426_v58 = vadd.f32 %v3425_v12, %v3424_v57 }
 0x3d0   : > { %v3427_v40 = vpop.f32.mrf.mxu0 }
 0x3d2   : > { %v3428_v18 = vpop.f32.mrf.mxu0 }
 0x3d3   : > { %v3429_v37 = vadd.f32 %v3428_v18, %v3427_v40 }
 0x3d5   : > { %v3446_v10 = vpop.f32.mrf.mxu1 }
 0x3d7   : > { %v3447_v31 = vpop.f32.mrf.mxu1 }
 0x3d8   : > { %v3448_v35 = vadd.f32 %v3447_v31, %v3446_v10 }
 0x3d9   : > { %v3449_v28 = vpop.f32.mrf.mxu1 }
 0x3da   : > { %v3010_v8 = vadd.f32 %v3448_v35, %v3426_v58 }
 0x3db   : > { %v3450_v38 = vpop.f32.mrf.mxu1 }
 0x3dc   : > { %v3451_v33 = vadd.f32 %v3450_v38, %v3449_v28 }
 0x3de   : > { %v3013_v27 = vadd.f32 %v3451_v33, %v3429_v37 }
 0x3ec   : > { %v3468_v50 = vpop.f32.mrf.mxu0 }
 0x3ee   : > { %v3469_v16 = vpop.f32.mrf.mxu0 }
 0x3ef   : > { %v3470_v14 = vadd.f32 %v3469_v16, %v3468_v50 }
 0x3f0   : > { %v3471_v55 = vpop.f32.mrf.mxu0 }
 0x3f1   : > { %v3051_v23 = vadd.f32 %v3470_v14, %v3010_v8 }
 0x3f2   : > { %v3472_v42 = vpop.f32.mrf.mxu0 }
 0x3f3   : > { %v3473_v0 = vadd.f32 %v3472_v42, %v3471_v55 }
 0x3f5   : > { %v3490_v44 = vpop.f32.mrf.mxu1  ;;  %v3054_v19 = vadd.f32 %v3473_v0, %v3013_v27 }
 0x3f7   : > { %v3491_v24 = vpop.f32.mrf.mxu1 }
 0x3f8   : > { %v3492_v41 = vadd.f32 %v3491_v24, %v3490_v44 }
 0x3f9   : > { %v3493_v49 = vpop.f32.mrf.mxu1 }
 0x3fa   : > { %v3092_v46 = vadd.f32 %v3492_v41, %v3051_v23 }
 0x3fb   : > { %v3494_v39 = vpop.f32.mrf.mxu1 }
 0x3fc   : > { %v3098_v47 = vadd.f32 %v3092_v46, %v2928_v51  ;;  %v3495_v29 = vadd.f32 %v3494_v39, %v3493_v49 }
 0x3fe   : > { %3104 = vst [vmem:[%s165_s5] sm:$0xff] %v3098_v47  ;;  %v3095_v4 = vadd.f32 %v3495_v29, %v3054_v19 }
 0x400   : > { %v3099_v2 = vadd.f32 %v3095_v4, %v2931_v13 }
 0x402   : > { %3105 = vst [vmem:[%s165_s5 + $0x8] sm:$0xff] %v3099_v2 }
 0x403   : > { %3610 = shalt.err (!%p3607_p3)
}
 0x404   : > { %s3611_s25 = scalar_lea.hbm %s6282_s16, 256  ;;  %s3615_s28 = scalar_lea.hbm %s6333_s2, 512 }
 0x405   : > { %p3612_p5 = scmp.ne.s32.totalorder %s6282_s16, %s3611_s25  ;;  %p3616_p9 = scmp.lt.s32.totalorder %s6282_s16, %s6333_s2 }
 0x406   : > { %p3617_p10 = scmp.lt.s32.totalorder %s3615_s28, %s3611_s25 }
 0x407   : > { %p3613_p6 = pnand %p3612_p5, %p3735_p4 }
 0x408   : > { %p3618_p11 = por %p3617_p10, %p3616_p9 }
 0x409   : > { %p3614_p7 = pneg %p3613_p6 }
 0x40b   : > { %p3619_p12 = pnand %p3618_p11, %p3614_p7 }
 0x40d   : > { %3622 = shalt.err (!%p3619_p12)
}
 0x40e   : > { %s3678_s3 = smov 128   ;;  %s3679_s4 = smov 8  }
 0x40f   : > { %3496 = dma.vmem_to_hbm [thread:$0]  (%p3735_p4), %s6277_s6, 256, %s6282_s16, %s6286_s18, %s3678_s3, %s3678_s3, %s3679_s4  }
 0x410 PF: > { %p3502_p13 = scmp.ge.s32.totalorder %s3673_s14, 2  ;;  %s3145_s5 = sand.u32 1, %s3653_s9  }
 0x411   : > { %s3146_s7 = scalar_lea.sflag [#allocation3], %s3145_s5 }
 0x412   : > { %p3499_p0 = pnand %p3502_p13, %p3742_p8 }
 0x414   : > { %p3500_p1 = pneg %p3499_p0 }
 0x416   : > { %3648 = dma.done.wait (%p3500_p1), %s3146_s7, 256  }
 0x417   : > { %3650 = vsyncadd (%p3500_p1), %s3146_s7, 4294967040  ;;  %s15_s14 = sadd.s32 1, %s3673_s14   ;;  %s7144_s9 = smov %s3657_s10 }
 0x418   : > { %p12_p2 = scmp.ge.s32.totalorder %s15_s14, 4   ;;  %s7145_s10 = smov %s3661_s11 }
 0x419   : > { %s7146_s11 = smov %s3748_s22  ;;  %s7147_s12 = smov %s3669_s13 }
 0x41a   : > { %s7148_s13 = smov %s7150_s17  ;;  %14 = sbr.rel (!%p12_p2) target bundleno = 4 (0x4), region = 74 }
 0x41f   :  { %3151 = vsyncpa [#allocation3], 1 }
 0x420   :  { %3153 = vsyncpa [#allocation3 + $0x1], 1 }

</bundles_post_ra>
